<compile_context>
chip_gen: v7x
topology: tpu7x:2x2x1
jax: 0.10.0
libtpu: 0.0.40
codegen_flags: <defaults>
</compile_context>

<pallas_src>
import functools

import jax
import jax.numpy as jnp
from jax.experimental import pallas as pl
from jax.experimental.pallas import tpu as pltpu

INPUT_DIM = 216         # LSTM input size
HIDDEN = 128            # LSTM hidden size
X_DIM = 594             # side-info feature size
D1_IN = X_DIM + HIDDEN  # 722
MLP = 512


def _farmer_kernel(T, BP,
                   z2d_ref, x_ref,
                   w_ih_ref, w_hh_ref, b_lstm_ref,
                   w1h_ref, b1_ref,
                   b2_ref, b3_ref, b4_ref, b5_ref,
                   w6_ref, b6_ref,
                   w1x_hbm_ref, wstack_hbm_ref,
                   out_ref,
                   w1x_vmem, wstack_vmem, dma_sem):
    H = HIDDEN

    # Kick off DMAs for the large dense weights (not needed until after the
    # recurrence) so they overlap with the serial LSTM loop.  w1x first: it is
    # the first one consumed.  Each dense layer gets its own semaphore so we
    # only wait on the chunk we are about to use.
    cp_w1x = pltpu.make_async_copy(w1x_hbm_ref, w1x_vmem, dma_sem.at[0])
    cp_w1x.start()
    cps = []
    for i in range(4):
        cp = pltpu.make_async_copy(wstack_hbm_ref.at[i], wstack_vmem.at[i],
                                   dma_sem.at[i + 1])
        cp.start()
        cps.append(cp)

    # ---- LSTM recurrence: bf16 operands, f32 accumulation, f32 state ----
    # One big matmul: input projection + bias for ALL timesteps at once.
    zp = (jnp.dot(z2d_ref[...], w_ih_ref[...],
                  preferred_element_type=jnp.float32)
          + b_lstm_ref[...])                       # (T*BP, 4H) f32

    w_hh = w_hh_ref[...]                           # (H, 4H) bf16
    h = jnp.zeros((BP, H), jnp.float32)
    c = jnp.zeros((BP, H), jnp.float32)

    # Fully unrolled time loop (T static and tiny).  BP is a multiple of 8 so
    # every zp row slice is sublane-aligned.
    for t in range(T):
        gates = zp[t * BP:(t + 1) * BP, :] + jnp.dot(
            h.astype(jnp.bfloat16), w_hh, preferred_element_type=jnp.float32)
        # PyTorch gate order: i, f, g, o
        i_g = jax.nn.sigmoid(gates[:, 0 * H:1 * H])
        f_g = jax.nn.sigmoid(gates[:, 1 * H:2 * H])
        g_g = jnp.tanh(gates[:, 2 * H:3 * H])
        o_g = jax.nn.sigmoid(gates[:, 3 * H:4 * H])
        c = f_g * c + i_g * g_g
        h = o_g * jnp.tanh(c)

    # ---- dense stack: bf16 operands, f32 accumulation ----
    # dense1: cat([lstm_out, x]) @ W1 + b1 == h @ W1[:128] + x @ W1[128:] + b1
    cp_w1x.wait()                                  # only w1x needs to be here
    h_bf = h.astype(jnp.bfloat16)
    x_bf = x_ref[...]                              # already bf16
    a = (jnp.dot(h_bf, w1h_ref[...], preferred_element_type=jnp.float32)
         + jnp.dot(x_bf, w1x_vmem[...], preferred_element_type=jnp.float32)
         + b1_ref[...])
    a = jnp.maximum(a, 0.0)

    biases = (b2_ref, b3_ref, b4_ref, b5_ref)
    for i in range(4):
        cps[i].wait()                              # per-layer wait, not up-front
        a = jnp.dot(a.astype(jnp.bfloat16), wstack_vmem[i],
                    preferred_element_type=jnp.float32) + biases[i][...]
        a = jnp.maximum(a, 0.0)

    # Final value head (K=512, N=1): VPU multiply + lane reduce, keeps the
    # one-column matmul off the MXU.
    out_ref[...] = (jnp.sum(a * w6_ref[...], axis=-1, keepdims=True)
                    + b6_ref[...])


@jax.jit
def farmer_forward(z, x, params):
    """z: (B, T, 216) batch-first (PyTorch convention); x: (B, 594).
    Returns values of shape (B, 1) float32."""
    B, T, _ = z.shape
    BP = ((B + 7) // 8) * 8          # pad batch to the f32 sublane count
    pad = BP - B

    # batch_first -> time-major, bf16, batch padded, flattened to (T*BP, 216)
    # for the single input-projection matmul inside the kernel.
    z_tm = jnp.transpose(z, (1, 0, 2)).astype(jnp.bfloat16)     # (T, B, 216)
    z_tm = jnp.pad(z_tm, ((0, 0), (0, pad), (0, 0)))
    z2d = z_tm.reshape(T * BP, INPUT_DIM)
    x_p = jnp.pad(x.astype(jnp.bfloat16), ((0, pad), (0, 0)))   # (BP, 594)

    vmem = pl.BlockSpec(memory_space=pltpu.MemorySpace.VMEM)
    hbm = pl.BlockSpec(memory_space=pl.ANY)

    kernel = functools.partial(_farmer_kernel, T, BP)

    values = pl.pallas_call(
        kernel,
        out_shape=jax.ShapeDtypeStruct((BP, 1), jnp.float32),
        in_specs=[vmem] * 13 + [hbm, hbm],
        out_specs=vmem,
        scratch_shapes=[
            pltpu.VMEM((X_DIM, MLP), jnp.bfloat16),      # w1x landing buffer
            pltpu.VMEM((4, MLP, MLP), jnp.bfloat16),     # w2..w5 landing buffer
            pltpu.SemaphoreType.DMA((5,)),               # w1x + 4 dense layers
        ],
        compiler_params=pltpu.CompilerParams(vmem_limit_bytes=16 << 20),
    )(
        z2d, x_p,
        params["w_ih"], params["w_hh"], params["b_lstm"],
        params["w1h"], params["b1"],
        params["b2"], params["b3"], params["b4"], params["b5"],
        params["w6_row"], params["b6"],
        params["w1x"], params["wstack"],
    )
    # Padded rows are dropped here, so they can never win a downstream argmax.
    return values[:B]


def init_params(key):
    """Deterministic synthetic init matching the PyTorch module's shapes."""
    ks = jax.random.split(key, 16)
    s_lstm = 1.0 / jnp.sqrt(jnp.float32(HIDDEN))

    def u(k, shape, scale):
        return jax.random.uniform(k, shape, jnp.float32, -scale, scale)

    # LSTM weights, stored transposed: (in, 4H), gate order [i, f, g, o]
    w_ih = u(ks[0], (INPUT_DIM, 4 * HIDDEN), s_lstm)
    w_hh = u(ks[1], (HIDDEN, 4 * HIDDEN), s_lstm)
    b_lstm = (u(ks[2], (1, 4 * HIDDEN), s_lstm)
              + u(ks[3], (1, 4 * HIDDEN), s_lstm))      # b_ih + b_hh

    def linear(k_w, k_b, fan_in, fan_out):
        s = 1.0 / jnp.sqrt(jnp.float32(fan_in))
        return u(k_w, (fan_in, fan_out), s), u(k_b, (1, fan_out), s)

    w1, b1 = linear(ks[4], ks[5], D1_IN, MLP)   # 722 -> 512
    w2, b2 = linear(ks[6], ks[7], MLP, MLP)
    w3, b3 = linear(ks[8], ks[9], MLP, MLP)
    w4, b4 = linear(ks[10], ks[11], MLP, MLP)
    w5, b5 = linear(ks[12], ks[13], MLP, MLP)
    w6, b6 = linear(ks[14], ks[15], MLP, 1)

    # All matmul weights stored as bf16 (halved HBM traffic, native MXU path);
    # biases, value-head row and LSTM state math stay f32.
    return dict(
        w_ih=w_ih.astype(jnp.bfloat16),
        w_hh=w_hh.astype(jnp.bfloat16),
        b_lstm=b_lstm,
        w1h=w1[:HIDDEN, :].astype(jnp.bfloat16),
        w1x=w1[HIDDEN:, :].astype(jnp.bfloat16),
        b1=b1,
        wstack=jnp.stack([w2, w3, w4, w5], axis=0).astype(jnp.bfloat16),
        b2=b2, b3=b3, b4=b4, b5=b5,
        w6_row=w6.T,     # (1, 512) f32
        b6=b6,           # (1, 1) f32
    )


def farmer_forward_ref(z, x, params):
    """Pure-JAX reference emulating the kernel's arithmetic (bf16 operands,
    f32 accumulation) for the correctness check."""
    def bf(v):
        return v.astype(jnp.bfloat16).astype(jnp.float32)

    B, T, _ = z.shape
    H = HIDDEN
    w_ih = params["w_ih"].astype(jnp.float32)
    w_hh = params["w_hh"].astype(jnp.float32)
    h = jnp.zeros((B, H), jnp.float32)
    c = jnp.zeros((B, H), jnp.float32)
    for t in range(T):
        gates = bf(z[:, t, :]) @ w_ih + bf(h) @ w_hh + params["b_lstm"]
        i_g = jax.nn.sigmoid(gates[:, 0 * H:1 * H])
        f_g = jax.nn.sigmoid(gates[:, 1 * H:2 * H])
        g_g = jnp.tanh(gates[:, 2 * H:3 * H])
        o_g = jax.nn.sigmoid(gates[:, 3 * H:4 * H])
        c = f_g * c + i_g * g_g
        h = o_g * jnp.tanh(c)
    w1h = params["w1h"].astype(jnp.float32)
    w1x = params["w1x"].astype(jnp.float32)
    wstack = params["wstack"].astype(jnp.float32)
    a = jnp.maximum(bf(h) @ w1h + bf(x) @ w1x + params["b1"], 0.0)
    for i, b in enumerate((params["b2"], params["b3"], params["b4"], params["b5"])):
        a = jnp.maximum(bf(a) @ wstack[i] + b, 0.0)
    return a @ params["w6_row"].T + params["b6"]


if __name__ == "__main__":
    key = jax.random.PRNGKey(0)
    k_p, k_z, k_x = jax.random.split(key, 3)

    B, T = 4, 8  # batch of candidate actions, sequence length
    params = init_params(k_p)
    z = jax.random.normal(k_z, (B, T, INPUT_DIM), jnp.float32)
    x = jax.random.normal(k_x, (B, X_DIM), jnp.float32)

    values = jax.block_until_ready(farmer_forward(z, x, params))

    # Greedy action selection (glue, mirrors torch.argmax(x, dim=0)[0]).
    # TODO(synk): the epsilon-greedy random-action branch (np.random/torch.randint)
    # is host-side control flow and stays outside the kernel.
    action = jax.block_until_ready(jnp.argmax(values[:, 0], axis=0))

    ref = farmer_forward_ref(z, x, params)
    assert values.shape == (B, 1)
    # bf16-operand matmuls (f32 accumulate) -> loosened tolerance vs reference.
    assert jnp.allclose(values, ref, rtol=5e-2, atol=5e-2), "mismatch vs JAX reference"

    print("KERNEL_OK")
</pallas_src>

<mosaic_0001>
module attributes {stable_mosaic.version = 11 : i64} {
  func.func @_farmer_kernel(%arg0: memref<64x216xbf16, #tpu.memory_space<vmem>>, %arg1: memref<8x594xbf16, #tpu.memory_space<vmem>>, %arg2: memref<216x512xbf16, #tpu.memory_space<vmem>>, %arg3: memref<128x512xbf16, #tpu.memory_space<vmem>>, %arg4: memref<1x512xf32, #tpu.memory_space<vmem>>, %arg5: memref<128x512xbf16, #tpu.memory_space<vmem>>, %arg6: memref<1x512xf32, #tpu.memory_space<vmem>>, %arg7: memref<1x512xf32, #tpu.memory_space<vmem>>, %arg8: memref<1x512xf32, #tpu.memory_space<vmem>>, %arg9: memref<1x512xf32, #tpu.memory_space<vmem>>, %arg10: memref<1x512xf32, #tpu.memory_space<vmem>>, %arg11: memref<1x512xf32, #tpu.memory_space<vmem>>, %arg12: memref<1x1xf32, #tpu.memory_space<vmem>>, %arg13: memref<594x512xbf16, #tpu.memory_space<any>>, %arg14: memref<4x512x512xbf16, #tpu.memory_space<any>>, %arg15: memref<8x1xf32, #tpu.memory_space<vmem>>, %arg16: memref<594x512xbf16, #tpu.memory_space<vmem>>, %arg17: memref<4x512x512xbf16, #tpu.memory_space<vmem>>, %arg18: memref<5x!tpu.dma_semaphore, #tpu.memory_space<semaphore_mem>>) attributes {dimension_semantics = [], scalar_prefetch = 0 : i64, scratch_operands = 3 : i64, tpu.core_type = #tpu.core_type<tc>} {
    %c0_i32 = arith.constant 0 : i32
    %0 = tpu.memref_slice %arg18[%c0_i32] : memref<5x!tpu.dma_semaphore, #tpu.memory_space<semaphore_mem>> -> memref<1x!tpu.dma_semaphore, #tpu.memory_space<semaphore_mem>>
    %1 = tpu.memref_squeeze %0 : memref<1x!tpu.dma_semaphore, #tpu.memory_space<semaphore_mem>> -> memref<!tpu.dma_semaphore, #tpu.memory_space<semaphore_mem>>
    tpu.enqueue_dma source(%arg13 : memref<594x512xbf16, #tpu.memory_space<any>>) target(%arg16 : memref<594x512xbf16, #tpu.memory_space<vmem>>) target_semaphore(%1 : memref<!tpu.dma_semaphore, #tpu.memory_space<semaphore_mem>>)
    %c0_i32_0 = arith.constant 0 : i32
    %c0_i32_1 = arith.constant 0 : i32
    %c1_i32 = arith.constant 1 : i32
    %c0_i32_2 = arith.constant 0 : i32
    %c0_i32_3 = arith.constant 0 : i32
    %2 = tpu.memref_slice %arg14[%c0_i32_0, %c0_i32_2, %c0_i32_3] : memref<4x512x512xbf16, #tpu.memory_space<any>> -> memref<1x512x512xbf16, #tpu.memory_space<any>>
    %3 = tpu.memref_squeeze %2 : memref<1x512x512xbf16, #tpu.memory_space<any>> -> memref<512x512xbf16, #tpu.memory_space<any>>
    %c0_i32_4 = arith.constant 0 : i32
    %c0_i32_5 = arith.constant 0 : i32
    %4 = tpu.memref_slice %arg17[%c0_i32_1, %c0_i32_4, %c0_i32_5] : memref<4x512x512xbf16, #tpu.memory_space<vmem>> -> memref<1x512x512xbf16, #tpu.memory_space<vmem>>
    %5 = tpu.memref_squeeze %4 : memref<1x512x512xbf16, #tpu.memory_space<vmem>> -> memref<512x512xbf16, #tpu.memory_space<vmem>>
    %6 = tpu.memref_slice %arg18[%c1_i32] : memref<5x!tpu.dma_semaphore, #tpu.memory_space<semaphore_mem>> -> memref<1x!tpu.dma_semaphore, #tpu.memory_space<semaphore_mem>>
    %7 = tpu.memref_squeeze %6 : memref<1x!tpu.dma_semaphore, #tpu.memory_space<semaphore_mem>> -> memref<!tpu.dma_semaphore, #tpu.memory_space<semaphore_mem>>
    tpu.enqueue_dma source(%3 : memref<512x512xbf16, #tpu.memory_space<any>>) target(%5 : memref<512x512xbf16, #tpu.memory_space<vmem>>) target_semaphore(%7 : memref<!tpu.dma_semaphore, #tpu.memory_space<semaphore_mem>>)
    %c1_i32_6 = arith.constant 1 : i32
    %c1_i32_7 = arith.constant 1 : i32
    %c2_i32 = arith.constant 2 : i32
    %c0_i32_8 = arith.constant 0 : i32
    %c0_i32_9 = arith.constant 0 : i32
    %8 = tpu.memref_slice %arg14[%c1_i32_6, %c0_i32_8, %c0_i32_9] : memref<4x512x512xbf16, #tpu.memory_space<any>> -> memref<1x512x512xbf16, #tpu.memory_space<any>>
    %9 = tpu.memref_squeeze %8 : memref<1x512x512xbf16, #tpu.memory_space<any>> -> memref<512x512xbf16, #tpu.memory_space<any>>
    %c0_i32_10 = arith.constant 0 : i32
    %c0_i32_11 = arith.constant 0 : i32
    %10 = tpu.memref_slice %arg17[%c1_i32_7, %c0_i32_10, %c0_i32_11] : memref<4x512x512xbf16, #tpu.memory_space<vmem>> -> memref<1x512x512xbf16, #tpu.memory_space<vmem>>
    %11 = tpu.memref_squeeze %10 : memref<1x512x512xbf16, #tpu.memory_space<vmem>> -> memref<512x512xbf16, #tpu.memory_space<vmem>>
    %12 = tpu.memref_slice %arg18[%c2_i32] : memref<5x!tpu.dma_semaphore, #tpu.memory_space<semaphore_mem>> -> memref<1x!tpu.dma_semaphore, #tpu.memory_space<semaphore_mem>>
    %13 = tpu.memref_squeeze %12 : memref<1x!tpu.dma_semaphore, #tpu.memory_space<semaphore_mem>> -> memref<!tpu.dma_semaphore, #tpu.memory_space<semaphore_mem>>
    tpu.enqueue_dma source(%9 : memref<512x512xbf16, #tpu.memory_space<any>>) target(%11 : memref<512x512xbf16, #tpu.memory_space<vmem>>) target_semaphore(%13 : memref<!tpu.dma_semaphore, #tpu.memory_space<semaphore_mem>>)
    %c2_i32_12 = arith.constant 2 : i32
    %c2_i32_13 = arith.constant 2 : i32
    %c3_i32 = arith.constant 3 : i32
    %c0_i32_14 = arith.constant 0 : i32
    %c0_i32_15 = arith.constant 0 : i32
    %14 = tpu.memref_slice %arg14[%c2_i32_12, %c0_i32_14, %c0_i32_15] : memref<4x512x512xbf16, #tpu.memory_space<any>> -> memref<1x512x512xbf16, #tpu.memory_space<any>>
    %15 = tpu.memref_squeeze %14 : memref<1x512x512xbf16, #tpu.memory_space<any>> -> memref<512x512xbf16, #tpu.memory_space<any>>
    %c0_i32_16 = arith.constant 0 : i32
    %c0_i32_17 = arith.constant 0 : i32
    %16 = tpu.memref_slice %arg17[%c2_i32_13, %c0_i32_16, %c0_i32_17] : memref<4x512x512xbf16, #tpu.memory_space<vmem>> -> memref<1x512x512xbf16, #tpu.memory_space<vmem>>
    %17 = tpu.memref_squeeze %16 : memref<1x512x512xbf16, #tpu.memory_space<vmem>> -> memref<512x512xbf16, #tpu.memory_space<vmem>>
    %18 = tpu.memref_slice %arg18[%c3_i32] : memref<5x!tpu.dma_semaphore, #tpu.memory_space<semaphore_mem>> -> memref<1x!tpu.dma_semaphore, #tpu.memory_space<semaphore_mem>>
    %19 = tpu.memref_squeeze %18 : memref<1x!tpu.dma_semaphore, #tpu.memory_space<semaphore_mem>> -> memref<!tpu.dma_semaphore, #tpu.memory_space<semaphore_mem>>
    tpu.enqueue_dma source(%15 : memref<512x512xbf16, #tpu.memory_space<any>>) target(%17 : memref<512x512xbf16, #tpu.memory_space<vmem>>) target_semaphore(%19 : memref<!tpu.dma_semaphore, #tpu.memory_space<semaphore_mem>>)
    %c3_i32_18 = arith.constant 3 : i32
    %c3_i32_19 = arith.constant 3 : i32
    %c4_i32 = arith.constant 4 : i32
    %c0_i32_20 = arith.constant 0 : i32
    %c0_i32_21 = arith.constant 0 : i32
    %20 = tpu.memref_slice %arg14[%c3_i32_18, %c0_i32_20, %c0_i32_21] : memref<4x512x512xbf16, #tpu.memory_space<any>> -> memref<1x512x512xbf16, #tpu.memory_space<any>>
    %21 = tpu.memref_squeeze %20 : memref<1x512x512xbf16, #tpu.memory_space<any>> -> memref<512x512xbf16, #tpu.memory_space<any>>
    %c0_i32_22 = arith.constant 0 : i32
    %c0_i32_23 = arith.constant 0 : i32
    %22 = tpu.memref_slice %arg17[%c3_i32_19, %c0_i32_22, %c0_i32_23] : memref<4x512x512xbf16, #tpu.memory_space<vmem>> -> memref<1x512x512xbf16, #tpu.memory_space<vmem>>
    %23 = tpu.memref_squeeze %22 : memref<1x512x512xbf16, #tpu.memory_space<vmem>> -> memref<512x512xbf16, #tpu.memory_space<vmem>>
    %24 = tpu.memref_slice %arg18[%c4_i32] : memref<5x!tpu.dma_semaphore, #tpu.memory_space<semaphore_mem>> -> memref<1x!tpu.dma_semaphore, #tpu.memory_space<semaphore_mem>>
    %25 = tpu.memref_squeeze %24 : memref<1x!tpu.dma_semaphore, #tpu.memory_space<semaphore_mem>> -> memref<!tpu.dma_semaphore, #tpu.memory_space<semaphore_mem>>
    tpu.enqueue_dma source(%21 : memref<512x512xbf16, #tpu.memory_space<any>>) target(%23 : memref<512x512xbf16, #tpu.memory_space<vmem>>) target_semaphore(%25 : memref<!tpu.dma_semaphore, #tpu.memory_space<semaphore_mem>>)
    %c0 = arith.constant 0 : index
    %c0_24 = arith.constant 0 : index
    %26 = vector.load %arg0[%c0, %c0_24] : memref<64x216xbf16, #tpu.memory_space<vmem>>, vector<64x216xbf16>
    %c0_25 = arith.constant 0 : index
    %c0_26 = arith.constant 0 : index
    %27 = vector.load %arg2[%c0_25, %c0_26] : memref<216x512xbf16, #tpu.memory_space<vmem>>, vector<216x512xbf16>
    %cst = arith.constant dense<0.000000e+00> : vector<64x512xf32>
    %28 = tpu.matmul %26, %27, %cst {dimension_numbers = #tpu.dot_dimension_numbers<[1], [0], [0], [1], [0, 0, 1, 1], [], []>} : vector<64x216xbf16>, vector<216x512xbf16>, vector<64x512xf32> -> vector<64x512xf32>
    %c0_27 = arith.constant 0 : index
    %c0_28 = arith.constant 0 : index
    %29 = vector.load %arg4[%c0_27, %c0_28] : memref<1x512xf32, #tpu.memory_space<vmem>>, vector<1x512xf32>
    %30 = vector.broadcast %29 : vector<1x512xf32> to vector<64x512xf32>
    %31 = arith.addf %28, %30 : vector<64x512xf32>
    %c0_29 = arith.constant 0 : index
    %c0_30 = arith.constant 0 : index
    %32 = vector.load %arg3[%c0_29, %c0_30] : memref<128x512xbf16, #tpu.memory_space<vmem>>, vector<128x512xbf16>
    %cst_31 = arith.constant 0.000000e+00 : f32
    %33 = vector.broadcast %cst_31 : f32 to vector<8x128xf32>
    %cst_32 = arith.constant 0.000000e+00 : f32
    %34 = vector.broadcast %cst_32 : f32 to vector<8x128xf32>
    %35 = vector.extract_strided_slice %31 {offsets = [0, 0], sizes = [8, 512], strides = [1, 1]} : vector<64x512xf32> to vector<8x512xf32>
    %36 = arith.truncf %33 : vector<8x128xf32> to vector<8x128xbf16>
    %cst_33 = arith.constant dense<0.000000e+00> : vector<8x512xf32>
    %37 = tpu.matmul %36, %32, %cst_33 {dimension_numbers = #tpu.dot_dimension_numbers<[1], [0], [0], [1], [0, 0, 1, 1], [], []>} : vector<8x128xbf16>, vector<128x512xbf16>, vector<8x512xf32> -> vector<8x512xf32>
    %38 = arith.addf %35, %37 : vector<8x512xf32>
    %39 = vector.extract_strided_slice %38 {offsets = [0, 0], sizes = [8, 128], strides = [1, 1]} : vector<8x512xf32> to vector<8x128xf32>
    %40 = arith.negf %39 : vector<8x128xf32>
    %41 = math.exp %40 : vector<8x128xf32>
    %cst_34 = arith.constant 1.000000e+00 : f32
    %42 = vector.broadcast %cst_34 : f32 to vector<8x128xf32>
    %43 = arith.addf %42, %41 : vector<8x128xf32>
    %44 = arith.divf %42, %43 : vector<8x128xf32>
    %45 = vector.extract_strided_slice %38 {offsets = [0, 128], sizes = [8, 128], strides = [1, 1]} : vector<8x512xf32> to vector<8x128xf32>
    %46 = arith.negf %45 : vector<8x128xf32>
    %47 = math.exp %46 : vector<8x128xf32>
    %cst_35 = arith.constant 1.000000e+00 : f32
    %48 = vector.broadcast %cst_35 : f32 to vector<8x128xf32>
    %49 = arith.addf %48, %47 : vector<8x128xf32>
    %50 = arith.divf %48, %49 : vector<8x128xf32>
    %51 = vector.extract_strided_slice %38 {offsets = [0, 256], sizes = [8, 128], strides = [1, 1]} : vector<8x512xf32> to vector<8x128xf32>
    %52 = math.tanh %51 : vector<8x128xf32>
    %53 = vector.extract_strided_slice %38 {offsets = [0, 384], sizes = [8, 128], strides = [1, 1]} : vector<8x512xf32> to vector<8x128xf32>
    %54 = arith.negf %53 : vector<8x128xf32>
    %55 = math.exp %54 : vector<8x128xf32>
    %cst_36 = arith.constant 1.000000e+00 : f32
    %56 = vector.broadcast %cst_36 : f32 to vector<8x128xf32>
    %57 = arith.addf %56, %55 : vector<8x128xf32>
    %58 = arith.divf %56, %57 : vector<8x128xf32>
    %59 = arith.mulf %50, %34 : vector<8x128xf32>
    %60 = arith.mulf %44, %52 : vector<8x128xf32>
    %61 = arith.addf %59, %60 : vector<8x128xf32>
    %62 = math.tanh %61 : vector<8x128xf32>
    %63 = arith.mulf %58, %62 : vector<8x128xf32>
    %64 = vector.extract_strided_slice %31 {offsets = [8, 0], sizes = [8, 512], strides = [1, 1]} : vector<64x512xf32> to vector<8x512xf32>
    %65 = arith.truncf %63 : vector<8x128xf32> to vector<8x128xbf16>
    %cst_37 = arith.constant dense<0.000000e+00> : vector<8x512xf32>
    %66 = tpu.matmul %65, %32, %cst_37 {dimension_numbers = #tpu.dot_dimension_numbers<[1], [0], [0], [1], [0, 0, 1, 1], [], []>} : vector<8x128xbf16>, vector<128x512xbf16>, vector<8x512xf32> -> vector<8x512xf32>
    %67 = arith.addf %64, %66 : vector<8x512xf32>
    %68 = vector.extract_strided_slice %67 {offsets = [0, 0], sizes = [8, 128], strides = [1, 1]} : vector<8x512xf32> to vector<8x128xf32>
    %69 = arith.negf %68 : vector<8x128xf32>
    %70 = math.exp %69 : vector<8x128xf32>
    %cst_38 = arith.constant 1.000000e+00 : f32
    %71 = vector.broadcast %cst_38 : f32 to vector<8x128xf32>
    %72 = arith.addf %71, %70 : vector<8x128xf32>
    %73 = arith.divf %71, %72 : vector<8x128xf32>
    %74 = vector.extract_strided_slice %67 {offsets = [0, 128], sizes = [8, 128], strides = [1, 1]} : vector<8x512xf32> to vector<8x128xf32>
    %75 = arith.negf %74 : vector<8x128xf32>
    %76 = math.exp %75 : vector<8x128xf32>
    %cst_39 = arith.constant 1.000000e+00 : f32
    %77 = vector.broadcast %cst_39 : f32 to vector<8x128xf32>
    %78 = arith.addf %77, %76 : vector<8x128xf32>
    %79 = arith.divf %77, %78 : vector<8x128xf32>
    %80 = vector.extract_strided_slice %67 {offsets = [0, 256], sizes = [8, 128], strides = [1, 1]} : vector<8x512xf32> to vector<8x128xf32>
    %81 = math.tanh %80 : vector<8x128xf32>
    %82 = vector.extract_strided_slice %67 {offsets = [0, 384], sizes = [8, 128], strides = [1, 1]} : vector<8x512xf32> to vector<8x128xf32>
    %83 = arith.negf %82 : vector<8x128xf32>
    %84 = math.exp %83 : vector<8x128xf32>
    %cst_40 = arith.constant 1.000000e+00 : f32
    %85 = vector.broadcast %cst_40 : f32 to vector<8x128xf32>
    %86 = arith.addf %85, %84 : vector<8x128xf32>
    %87 = arith.divf %85, %86 : vector<8x128xf32>
    %88 = arith.mulf %79, %61 : vector<8x128xf32>
    %89 = arith.mulf %73, %81 : vector<8x128xf32>
    %90 = arith.addf %88, %89 : vector<8x128xf32>
    %91 = math.tanh %90 : vector<8x128xf32>
    %92 = arith.mulf %87, %91 : vector<8x128xf32>
    %93 = vector.extract_strided_slice %31 {offsets = [16, 0], sizes = [8, 512], strides = [1, 1]} : vector<64x512xf32> to vector<8x512xf32>
    %94 = arith.truncf %92 : vector<8x128xf32> to vector<8x128xbf16>
    %cst_41 = arith.constant dense<0.000000e+00> : vector<8x512xf32>
    %95 = tpu.matmul %94, %32, %cst_41 {dimension_numbers = #tpu.dot_dimension_numbers<[1], [0], [0], [1], [0, 0, 1, 1], [], []>} : vector<8x128xbf16>, vector<128x512xbf16>, vector<8x512xf32> -> vector<8x512xf32>
    %96 = arith.addf %93, %95 : vector<8x512xf32>
    %97 = vector.extract_strided_slice %96 {offsets = [0, 0], sizes = [8, 128], strides = [1, 1]} : vector<8x512xf32> to vector<8x128xf32>
    %98 = arith.negf %97 : vector<8x128xf32>
    %99 = math.exp %98 : vector<8x128xf32>
    %cst_42 = arith.constant 1.000000e+00 : f32
    %100 = vector.broadcast %cst_42 : f32 to vector<8x128xf32>
    %101 = arith.addf %100, %99 : vector<8x128xf32>
    %102 = arith.divf %100, %101 : vector<8x128xf32>
    %103 = vector.extract_strided_slice %96 {offsets = [0, 128], sizes = [8, 128], strides = [1, 1]} : vector<8x512xf32> to vector<8x128xf32>
    %104 = arith.negf %103 : vector<8x128xf32>
    %105 = math.exp %104 : vector<8x128xf32>
    %cst_43 = arith.constant 1.000000e+00 : f32
    %106 = vector.broadcast %cst_43 : f32 to vector<8x128xf32>
    %107 = arith.addf %106, %105 : vector<8x128xf32>
    %108 = arith.divf %106, %107 : vector<8x128xf32>
    %109 = vector.extract_strided_slice %96 {offsets = [0, 256], sizes = [8, 128], strides = [1, 1]} : vector<8x512xf32> to vector<8x128xf32>
    %110 = math.tanh %109 : vector<8x128xf32>
    %111 = vector.extract_strided_slice %96 {offsets = [0, 384], sizes = [8, 128], strides = [1, 1]} : vector<8x512xf32> to vector<8x128xf32>
    %112 = arith.negf %111 : vector<8x128xf32>
    %113 = math.exp %112 : vector<8x128xf32>
    %cst_44 = arith.constant 1.000000e+00 : f32
    %114 = vector.broadcast %cst_44 : f32 to vector<8x128xf32>
    %115 = arith.addf %114, %113 : vector<8x128xf32>
    %116 = arith.divf %114, %115 : vector<8x128xf32>
    %117 = arith.mulf %108, %90 : vector<8x128xf32>
    %118 = arith.mulf %102, %110 : vector<8x128xf32>
    %119 = arith.addf %117, %118 : vector<8x128xf32>
    %120 = math.tanh %119 : vector<8x128xf32>
    %121 = arith.mulf %116, %120 : vector<8x128xf32>
    %122 = vector.extract_strided_slice %31 {offsets = [24, 0], sizes = [8, 512], strides = [1, 1]} : vector<64x512xf32> to vector<8x512xf32>
    %123 = arith.truncf %121 : vector<8x128xf32> to vector<8x128xbf16>
    %cst_45 = arith.constant dense<0.000000e+00> : vector<8x512xf32>
    %124 = tpu.matmul %123, %32, %cst_45 {dimension_numbers = #tpu.dot_dimension_numbers<[1], [0], [0], [1], [0, 0, 1, 1], [], []>} : vector<8x128xbf16>, vector<128x512xbf16>, vector<8x512xf32> -> vector<8x512xf32>
    %125 = arith.addf %122, %124 : vector<8x512xf32>
    %126 = vector.extract_strided_slice %125 {offsets = [0, 0], sizes = [8, 128], strides = [1, 1]} : vector<8x512xf32> to vector<8x128xf32>
    %127 = arith.negf %126 : vector<8x128xf32>
    %128 = math.exp %127 : vector<8x128xf32>
    %cst_46 = arith.constant 1.000000e+00 : f32
    %129 = vector.broadcast %cst_46 : f32 to vector<8x128xf32>
    %130 = arith.addf %129, %128 : vector<8x128xf32>
    %131 = arith.divf %129, %130 : vector<8x128xf32>
    %132 = vector.extract_strided_slice %125 {offsets = [0, 128], sizes = [8, 128], strides = [1, 1]} : vector<8x512xf32> to vector<8x128xf32>
    %133 = arith.negf %132 : vector<8x128xf32>
    %134 = math.exp %133 : vector<8x128xf32>
    %cst_47 = arith.constant 1.000000e+00 : f32
    %135 = vector.broadcast %cst_47 : f32 to vector<8x128xf32>
    %136 = arith.addf %135, %134 : vector<8x128xf32>
    %137 = arith.divf %135, %136 : vector<8x128xf32>
    %138 = vector.extract_strided_slice %125 {offsets = [0, 256], sizes = [8, 128], strides = [1, 1]} : vector<8x512xf32> to vector<8x128xf32>
    %139 = math.tanh %138 : vector<8x128xf32>
    %140 = vector.extract_strided_slice %125 {offsets = [0, 384], sizes = [8, 128], strides = [1, 1]} : vector<8x512xf32> to vector<8x128xf32>
    %141 = arith.negf %140 : vector<8x128xf32>
    %142 = math.exp %141 : vector<8x128xf32>
    %cst_48 = arith.constant 1.000000e+00 : f32
    %143 = vector.broadcast %cst_48 : f32 to vector<8x128xf32>
    %144 = arith.addf %143, %142 : vector<8x128xf32>
    %145 = arith.divf %143, %144 : vector<8x128xf32>
    %146 = arith.mulf %137, %119 : vector<8x128xf32>
    %147 = arith.mulf %131, %139 : vector<8x128xf32>
    %148 = arith.addf %146, %147 : vector<8x128xf32>
    %149 = math.tanh %148 : vector<8x128xf32>
    %150 = arith.mulf %145, %149 : vector<8x128xf32>
    %151 = vector.extract_strided_slice %31 {offsets = [32, 0], sizes = [8, 512], strides = [1, 1]} : vector<64x512xf32> to vector<8x512xf32>
    %152 = arith.truncf %150 : vector<8x128xf32> to vector<8x128xbf16>
    %cst_49 = arith.constant dense<0.000000e+00> : vector<8x512xf32>
    %153 = tpu.matmul %152, %32, %cst_49 {dimension_numbers = #tpu.dot_dimension_numbers<[1], [0], [0], [1], [0, 0, 1, 1], [], []>} : vector<8x128xbf16>, vector<128x512xbf16>, vector<8x512xf32> -> vector<8x512xf32>
    %154 = arith.addf %151, %153 : vector<8x512xf32>
    %155 = vector.extract_strided_slice %154 {offsets = [0, 0], sizes = [8, 128], strides = [1, 1]} : vector<8x512xf32> to vector<8x128xf32>
    %156 = arith.negf %155 : vector<8x128xf32>
    %157 = math.exp %156 : vector<8x128xf32>
    %cst_50 = arith.constant 1.000000e+00 : f32
    %158 = vector.broadcast %cst_50 : f32 to vector<8x128xf32>
    %159 = arith.addf %158, %157 : vector<8x128xf32>
    %160 = arith.divf %158, %159 : vector<8x128xf32>
    %161 = vector.extract_strided_slice %154 {offsets = [0, 128], sizes = [8, 128], strides = [1, 1]} : vector<8x512xf32> to vector<8x128xf32>
    %162 = arith.negf %161 : vector<8x128xf32>
    %163 = math.exp %162 : vector<8x128xf32>
    %cst_51 = arith.constant 1.000000e+00 : f32
    %164 = vector.broadcast %cst_51 : f32 to vector<8x128xf32>
    %165 = arith.addf %164, %163 : vector<8x128xf32>
    %166 = arith.divf %164, %165 : vector<8x128xf32>
    %167 = vector.extract_strided_slice %154 {offsets = [0, 256], sizes = [8, 128], strides = [1, 1]} : vector<8x512xf32> to vector<8x128xf32>
    %168 = math.tanh %167 : vector<8x128xf32>
    %169 = vector.extract_strided_slice %154 {offsets = [0, 384], sizes = [8, 128], strides = [1, 1]} : vector<8x512xf32> to vector<8x128xf32>
    %170 = arith.negf %169 : vector<8x128xf32>
    %171 = math.exp %170 : vector<8x128xf32>
    %cst_52 = arith.constant 1.000000e+00 : f32
    %172 = vector.broadcast %cst_52 : f32 to vector<8x128xf32>
    %173 = arith.addf %172, %171 : vector<8x128xf32>
    %174 = arith.divf %172, %173 : vector<8x128xf32>
    %175 = arith.mulf %166, %148 : vector<8x128xf32>
    %176 = arith.mulf %160, %168 : vector<8x128xf32>
    %177 = arith.addf %175, %176 : vector<8x128xf32>
    %178 = math.tanh %177 : vector<8x128xf32>
    %179 = arith.mulf %174, %178 : vector<8x128xf32>
    %180 = vector.extract_strided_slice %31 {offsets = [40, 0], sizes = [8, 512], strides = [1, 1]} : vector<64x512xf32> to vector<8x512xf32>
    %181 = arith.truncf %179 : vector<8x128xf32> to vector<8x128xbf16>
    %cst_53 = arith.constant dense<0.000000e+00> : vector<8x512xf32>
    %182 = tpu.matmul %181, %32, %cst_53 {dimension_numbers = #tpu.dot_dimension_numbers<[1], [0], [0], [1], [0, 0, 1, 1], [], []>} : vector<8x128xbf16>, vector<128x512xbf16>, vector<8x512xf32> -> vector<8x512xf32>
    %183 = arith.addf %180, %182 : vector<8x512xf32>
    %184 = vector.extract_strided_slice %183 {offsets = [0, 0], sizes = [8, 128], strides = [1, 1]} : vector<8x512xf32> to vector<8x128xf32>
    %185 = arith.negf %184 : vector<8x128xf32>
    %186 = math.exp %185 : vector<8x128xf32>
    %cst_54 = arith.constant 1.000000e+00 : f32
    %187 = vector.broadcast %cst_54 : f32 to vector<8x128xf32>
    %188 = arith.addf %187, %186 : vector<8x128xf32>
    %189 = arith.divf %187, %188 : vector<8x128xf32>
    %190 = vector.extract_strided_slice %183 {offsets = [0, 128], sizes = [8, 128], strides = [1, 1]} : vector<8x512xf32> to vector<8x128xf32>
    %191 = arith.negf %190 : vector<8x128xf32>
    %192 = math.exp %191 : vector<8x128xf32>
    %cst_55 = arith.constant 1.000000e+00 : f32
    %193 = vector.broadcast %cst_55 : f32 to vector<8x128xf32>
    %194 = arith.addf %193, %192 : vector<8x128xf32>
    %195 = arith.divf %193, %194 : vector<8x128xf32>
    %196 = vector.extract_strided_slice %183 {offsets = [0, 256], sizes = [8, 128], strides = [1, 1]} : vector<8x512xf32> to vector<8x128xf32>
    %197 = math.tanh %196 : vector<8x128xf32>
    %198 = vector.extract_strided_slice %183 {offsets = [0, 384], sizes = [8, 128], strides = [1, 1]} : vector<8x512xf32> to vector<8x128xf32>
    %199 = arith.negf %198 : vector<8x128xf32>
    %200 = math.exp %199 : vector<8x128xf32>
    %cst_56 = arith.constant 1.000000e+00 : f32
    %201 = vector.broadcast %cst_56 : f32 to vector<8x128xf32>
    %202 = arith.addf %201, %200 : vector<8x128xf32>
    %203 = arith.divf %201, %202 : vector<8x128xf32>
    %204 = arith.mulf %195, %177 : vector<8x128xf32>
    %205 = arith.mulf %189, %197 : vector<8x128xf32>
    %206 = arith.addf %204, %205 : vector<8x128xf32>
    %207 = math.tanh %206 : vector<8x128xf32>
    %208 = arith.mulf %203, %207 : vector<8x128xf32>
    %209 = vector.extract_strided_slice %31 {offsets = [48, 0], sizes = [8, 512], strides = [1, 1]} : vector<64x512xf32> to vector<8x512xf32>
    %210 = arith.truncf %208 : vector<8x128xf32> to vector<8x128xbf16>
    %cst_57 = arith.constant dense<0.000000e+00> : vector<8x512xf32>
    %211 = tpu.matmul %210, %32, %cst_57 {dimension_numbers = #tpu.dot_dimension_numbers<[1], [0], [0], [1], [0, 0, 1, 1], [], []>} : vector<8x128xbf16>, vector<128x512xbf16>, vector<8x512xf32> -> vector<8x512xf32>
    %212 = arith.addf %209, %211 : vector<8x512xf32>
    %213 = vector.extract_strided_slice %212 {offsets = [0, 0], sizes = [8, 128], strides = [1, 1]} : vector<8x512xf32> to vector<8x128xf32>
    %214 = arith.negf %213 : vector<8x128xf32>
    %215 = math.exp %214 : vector<8x128xf32>
    %cst_58 = arith.constant 1.000000e+00 : f32
    %216 = vector.broadcast %cst_58 : f32 to vector<8x128xf32>
    %217 = arith.addf %216, %215 : vector<8x128xf32>
    %218 = arith.divf %216, %217 : vector<8x128xf32>
    %219 = vector.extract_strided_slice %212 {offsets = [0, 128], sizes = [8, 128], strides = [1, 1]} : vector<8x512xf32> to vector<8x128xf32>
    %220 = arith.negf %219 : vector<8x128xf32>
    %221 = math.exp %220 : vector<8x128xf32>
    %cst_59 = arith.constant 1.000000e+00 : f32
    %222 = vector.broadcast %cst_59 : f32 to vector<8x128xf32>
    %223 = arith.addf %222, %221 : vector<8x128xf32>
    %224 = arith.divf %222, %223 : vector<8x128xf32>
    %225 = vector.extract_strided_slice %212 {offsets = [0, 256], sizes = [8, 128], strides = [1, 1]} : vector<8x512xf32> to vector<8x128xf32>
    %226 = math.tanh %225 : vector<8x128xf32>
    %227 = vector.extract_strided_slice %212 {offsets = [0, 384], sizes = [8, 128], strides = [1, 1]} : vector<8x512xf32> to vector<8x128xf32>
    %228 = arith.negf %227 : vector<8x128xf32>
    %229 = math.exp %228 : vector<8x128xf32>
    %cst_60 = arith.constant 1.000000e+00 : f32
    %230 = vector.broadcast %cst_60 : f32 to vector<8x128xf32>
    %231 = arith.addf %230, %229 : vector<8x128xf32>
    %232 = arith.divf %230, %231 : vector<8x128xf32>
    %233 = arith.mulf %224, %206 : vector<8x128xf32>
    %234 = arith.mulf %218, %226 : vector<8x128xf32>
    %235 = arith.addf %233, %234 : vector<8x128xf32>
    %236 = math.tanh %235 : vector<8x128xf32>
    %237 = arith.mulf %232, %236 : vector<8x128xf32>
    %238 = vector.extract_strided_slice %31 {offsets = [56, 0], sizes = [8, 512], strides = [1, 1]} : vector<64x512xf32> to vector<8x512xf32>
    %239 = arith.truncf %237 : vector<8x128xf32> to vector<8x128xbf16>
    %cst_61 = arith.constant dense<0.000000e+00> : vector<8x512xf32>
    %240 = tpu.matmul %239, %32, %cst_61 {dimension_numbers = #tpu.dot_dimension_numbers<[1], [0], [0], [1], [0, 0, 1, 1], [], []>} : vector<8x128xbf16>, vector<128x512xbf16>, vector<8x512xf32> -> vector<8x512xf32>
    %241 = arith.addf %238, %240 : vector<8x512xf32>
    %242 = vector.extract_strided_slice %241 {offsets = [0, 0], sizes = [8, 128], strides = [1, 1]} : vector<8x512xf32> to vector<8x128xf32>
    %243 = arith.negf %242 : vector<8x128xf32>
    %244 = math.exp %243 : vector<8x128xf32>
    %cst_62 = arith.constant 1.000000e+00 : f32
    %245 = vector.broadcast %cst_62 : f32 to vector<8x128xf32>
    %246 = arith.addf %245, %244 : vector<8x128xf32>
    %247 = arith.divf %245, %246 : vector<8x128xf32>
    %248 = vector.extract_strided_slice %241 {offsets = [0, 128], sizes = [8, 128], strides = [1, 1]} : vector<8x512xf32> to vector<8x128xf32>
    %249 = arith.negf %248 : vector<8x128xf32>
    %250 = math.exp %249 : vector<8x128xf32>
    %cst_63 = arith.constant 1.000000e+00 : f32
    %251 = vector.broadcast %cst_63 : f32 to vector<8x128xf32>
    %252 = arith.addf %251, %250 : vector<8x128xf32>
    %253 = arith.divf %251, %252 : vector<8x128xf32>
    %254 = vector.extract_strided_slice %241 {offsets = [0, 256], sizes = [8, 128], strides = [1, 1]} : vector<8x512xf32> to vector<8x128xf32>
    %255 = math.tanh %254 : vector<8x128xf32>
    %256 = vector.extract_strided_slice %241 {offsets = [0, 384], sizes = [8, 128], strides = [1, 1]} : vector<8x512xf32> to vector<8x128xf32>
    %257 = arith.negf %256 : vector<8x128xf32>
    %258 = math.exp %257 : vector<8x128xf32>
    %cst_64 = arith.constant 1.000000e+00 : f32
    %259 = vector.broadcast %cst_64 : f32 to vector<8x128xf32>
    %260 = arith.addf %259, %258 : vector<8x128xf32>
    %261 = arith.divf %259, %260 : vector<8x128xf32>
    %262 = arith.mulf %253, %235 : vector<8x128xf32>
    %263 = arith.mulf %247, %255 : vector<8x128xf32>
    %264 = arith.addf %262, %263 : vector<8x128xf32>
    %265 = math.tanh %264 : vector<8x128xf32>
    %266 = arith.mulf %261, %265 : vector<8x128xf32>
    %c0_i32_65 = arith.constant 0 : i32
    %267 = tpu.memref_slice %arg18[%c0_i32_65] : memref<5x!tpu.dma_semaphore, #tpu.memory_space<semaphore_mem>> -> memref<1x!tpu.dma_semaphore, #tpu.memory_space<semaphore_mem>>
    %268 = tpu.memref_squeeze %267 : memref<1x!tpu.dma_semaphore, #tpu.memory_space<semaphore_mem>> -> memref<!tpu.dma_semaphore, #tpu.memory_space<semaphore_mem>>
    tpu.wait_dma2 semaphore(%268 : memref<!tpu.dma_semaphore, #tpu.memory_space<semaphore_mem>>) src(%arg13 : memref<594x512xbf16, #tpu.memory_space<any>>) dst(%arg16 : memref<594x512xbf16, #tpu.memory_space<vmem>>)
    %269 = arith.truncf %266 : vector<8x128xf32> to vector<8x128xbf16>
    %c0_66 = arith.constant 0 : index
    %c0_67 = arith.constant 0 : index
    %270 = vector.load %arg1[%c0_66, %c0_67] : memref<8x594xbf16, #tpu.memory_space<vmem>>, vector<8x594xbf16>
    %c0_68 = arith.constant 0 : index
    %c0_69 = arith.constant 0 : index
    %271 = vector.load %arg5[%c0_68, %c0_69] : memref<128x512xbf16, #tpu.memory_space<vmem>>, vector<128x512xbf16>
    %cst_70 = arith.constant dense<0.000000e+00> : vector<8x512xf32>
    %272 = tpu.matmul %269, %271, %cst_70 {dimension_numbers = #tpu.dot_dimension_numbers<[1], [0], [0], [1], [0, 0, 1, 1], [], []>} : vector<8x128xbf16>, vector<128x512xbf16>, vector<8x512xf32> -> vector<8x512xf32>
    %c0_71 = arith.constant 0 : index
    %c0_72 = arith.constant 0 : index
    %273 = vector.load %arg16[%c0_71, %c0_72] : memref<594x512xbf16, #tpu.memory_space<vmem>>, vector<594x512xbf16>
    %cst_73 = arith.constant dense<0.000000e+00> : vector<8x512xf32>
    %274 = tpu.matmul %270, %273, %cst_73 {dimension_numbers = #tpu.dot_dimension_numbers<[1], [0], [0], [1], [0, 0, 1, 1], [], []>} : vector<8x594xbf16>, vector<594x512xbf16>, vector<8x512xf32> -> vector<8x512xf32>
    %275 = arith.addf %272, %274 : vector<8x512xf32>
    %c0_74 = arith.constant 0 : index
    %c0_75 = arith.constant 0 : index
    %276 = vector.load %arg6[%c0_74, %c0_75] : memref<1x512xf32, #tpu.memory_space<vmem>>, vector<1x512xf32>
    %277 = vector.broadcast %276 : vector<1x512xf32> to vector<8x512xf32>
    %278 = arith.addf %275, %277 : vector<8x512xf32>
    %cst_76 = arith.constant 0.000000e+00 : f32
    %279 = vector.broadcast %cst_76 : f32 to vector<8x512xf32>
    %280 = arith.maximumf %278, %279 : vector<8x512xf32>
    %c0_i32_77 = arith.constant 0 : i32
    %c0_i32_78 = arith.constant 0 : i32
    %c1_i32_79 = arith.constant 1 : i32
    %c0_i32_80 = arith.constant 0 : i32
    %c0_i32_81 = arith.constant 0 : i32
    %281 = tpu.memref_slice %arg14[%c0_i32_77, %c0_i32_80, %c0_i32_81] : memref<4x512x512xbf16, #tpu.memory_space<any>> -> memref<1x512x512xbf16, #tpu.memory_space<any>>
    %282 = tpu.memref_squeeze %281 : memref<1x512x512xbf16, #tpu.memory_space<any>> -> memref<512x512xbf16, #tpu.memory_space<any>>
    %c0_i32_82 = arith.constant 0 : i32
    %c0_i32_83 = arith.constant 0 : i32
    %283 = tpu.memref_slice %arg17[%c0_i32_78, %c0_i32_82, %c0_i32_83] : memref<4x512x512xbf16, #tpu.memory_space<vmem>> -> memref<1x512x512xbf16, #tpu.memory_space<vmem>>
    %284 = tpu.memref_squeeze %283 : memref<1x512x512xbf16, #tpu.memory_space<vmem>> -> memref<512x512xbf16, #tpu.memory_space<vmem>>
    %285 = tpu.memref_slice %arg18[%c1_i32_79] : memref<5x!tpu.dma_semaphore, #tpu.memory_space<semaphore_mem>> -> memref<1x!tpu.dma_semaphore, #tpu.memory_space<semaphore_mem>>
    %286 = tpu.memref_squeeze %285 : memref<1x!tpu.dma_semaphore, #tpu.memory_space<semaphore_mem>> -> memref<!tpu.dma_semaphore, #tpu.memory_space<semaphore_mem>>
    tpu.wait_dma2 semaphore(%286 : memref<!tpu.dma_semaphore, #tpu.memory_space<semaphore_mem>>) src(%282 : memref<512x512xbf16, #tpu.memory_space<any>>) dst(%284 : memref<512x512xbf16, #tpu.memory_space<vmem>>)
    %287 = arith.truncf %280 : vector<8x512xf32> to vector<8x512xbf16>
    %c0_84 = arith.constant 0 : index
    %c0_85 = arith.constant 0 : index
    %c0_86 = arith.constant 0 : index
    %288 = vector.load %arg17[%c0_84, %c0_85, %c0_86] : memref<4x512x512xbf16, #tpu.memory_space<vmem>>, vector<1x512x512xbf16>
    %289 = vector.shape_cast %288 : vector<1x512x512xbf16> to vector<512x512xbf16>
    %cst_87 = arith.constant dense<0.000000e+00> : vector<8x512xf32>
    %290 = tpu.matmul %287, %289, %cst_87 {dimension_numbers = #tpu.dot_dimension_numbers<[1], [0], [0], [1], [0, 0, 1, 1], [], []>} : vector<8x512xbf16>, vector<512x512xbf16>, vector<8x512xf32> -> vector<8x512xf32>
    %c0_88 = arith.constant 0 : index
    %c0_89 = arith.constant 0 : index
    %291 = vector.load %arg7[%c0_88, %c0_89] : memref<1x512xf32, #tpu.memory_space<vmem>>, vector<1x512xf32>
    %292 = vector.broadcast %291 : vector<1x512xf32> to vector<8x512xf32>
    %293 = arith.addf %290, %292 : vector<8x512xf32>
    %cst_90 = arith.constant 0.000000e+00 : f32
    %294 = vector.broadcast %cst_90 : f32 to vector<8x512xf32>
    %295 = arith.maximumf %293, %294 : vector<8x512xf32>
    %c1_i32_91 = arith.constant 1 : i32
    %c1_i32_92 = arith.constant 1 : i32
    %c2_i32_93 = arith.constant 2 : i32
    %c0_i32_94 = arith.constant 0 : i32
    %c0_i32_95 = arith.constant 0 : i32
    %296 = tpu.memref_slice %arg14[%c1_i32_91, %c0_i32_94, %c0_i32_95] : memref<4x512x512xbf16, #tpu.memory_space<any>> -> memref<1x512x512xbf16, #tpu.memory_space<any>>
    %297 = tpu.memref_squeeze %296 : memref<1x512x512xbf16, #tpu.memory_space<any>> -> memref<512x512xbf16, #tpu.memory_space<any>>
    %c0_i32_96 = arith.constant 0 : i32
    %c0_i32_97 = arith.constant 0 : i32
    %298 = tpu.memref_slice %arg17[%c1_i32_92, %c0_i32_96, %c0_i32_97] : memref<4x512x512xbf16, #tpu.memory_space<vmem>> -> memref<1x512x512xbf16, #tpu.memory_space<vmem>>
    %299 = tpu.memref_squeeze %298 : memref<1x512x512xbf16, #tpu.memory_space<vmem>> -> memref<512x512xbf16, #tpu.memory_space<vmem>>
    %300 = tpu.memref_slice %arg18[%c2_i32_93] : memref<5x!tpu.dma_semaphore, #tpu.memory_space<semaphore_mem>> -> memref<1x!tpu.dma_semaphore, #tpu.memory_space<semaphore_mem>>
    %301 = tpu.memref_squeeze %300 : memref<1x!tpu.dma_semaphore, #tpu.memory_space<semaphore_mem>> -> memref<!tpu.dma_semaphore, #tpu.memory_space<semaphore_mem>>
    tpu.wait_dma2 semaphore(%301 : memref<!tpu.dma_semaphore, #tpu.memory_space<semaphore_mem>>) src(%297 : memref<512x512xbf16, #tpu.memory_space<any>>) dst(%299 : memref<512x512xbf16, #tpu.memory_space<vmem>>)
    %302 = arith.truncf %295 : vector<8x512xf32> to vector<8x512xbf16>
    %c1 = arith.constant 1 : index
    %c0_98 = arith.constant 0 : index
    %c0_99 = arith.constant 0 : index
    %303 = vector.load %arg17[%c1, %c0_98, %c0_99] : memref<4x512x512xbf16, #tpu.memory_space<vmem>>, vector<1x512x512xbf16>
    %304 = vector.shape_cast %303 : vector<1x512x512xbf16> to vector<512x512xbf16>
    %cst_100 = arith.constant dense<0.000000e+00> : vector<8x512xf32>
    %305 = tpu.matmul %302, %304, %cst_100 {dimension_numbers = #tpu.dot_dimension_numbers<[1], [0], [0], [1], [0, 0, 1, 1], [], []>} : vector<8x512xbf16>, vector<512x512xbf16>, vector<8x512xf32> -> vector<8x512xf32>
    %c0_101 = arith.constant 0 : index
    %c0_102 = arith.constant 0 : index
    %306 = vector.load %arg8[%c0_101, %c0_102] : memref<1x512xf32, #tpu.memory_space<vmem>>, vector<1x512xf32>
    %307 = vector.broadcast %306 : vector<1x512xf32> to vector<8x512xf32>
    %308 = arith.addf %305, %307 : vector<8x512xf32>
    %cst_103 = arith.constant 0.000000e+00 : f32
    %309 = vector.broadcast %cst_103 : f32 to vector<8x512xf32>
    %310 = arith.maximumf %308, %309 : vector<8x512xf32>
    %c2_i32_104 = arith.constant 2 : i32
    %c2_i32_105 = arith.constant 2 : i32
    %c3_i32_106 = arith.constant 3 : i32
    %c0_i32_107 = arith.constant 0 : i32
    %c0_i32_108 = arith.constant 0 : i32
    %311 = tpu.memref_slice %arg14[%c2_i32_104, %c0_i32_107, %c0_i32_108] : memref<4x512x512xbf16, #tpu.memory_space<any>> -> memref<1x512x512xbf16, #tpu.memory_space<any>>
    %312 = tpu.memref_squeeze %311 : memref<1x512x512xbf16, #tpu.memory_space<any>> -> memref<512x512xbf16, #tpu.memory_space<any>>
    %c0_i32_109 = arith.constant 0 : i32
    %c0_i32_110 = arith.constant 0 : i32
    %313 = tpu.memref_slice %arg17[%c2_i32_105, %c0_i32_109, %c0_i32_110] : memref<4x512x512xbf16, #tpu.memory_space<vmem>> -> memref<1x512x512xbf16, #tpu.memory_space<vmem>>
    %314 = tpu.memref_squeeze %313 : memref<1x512x512xbf16, #tpu.memory_space<vmem>> -> memref<512x512xbf16, #tpu.memory_space<vmem>>
    %315 = tpu.memref_slice %arg18[%c3_i32_106] : memref<5x!tpu.dma_semaphore, #tpu.memory_space<semaphore_mem>> -> memref<1x!tpu.dma_semaphore, #tpu.memory_space<semaphore_mem>>
    %316 = tpu.memref_squeeze %315 : memref<1x!tpu.dma_semaphore, #tpu.memory_space<semaphore_mem>> -> memref<!tpu.dma_semaphore, #tpu.memory_space<semaphore_mem>>
    tpu.wait_dma2 semaphore(%316 : memref<!tpu.dma_semaphore, #tpu.memory_space<semaphore_mem>>) src(%312 : memref<512x512xbf16, #tpu.memory_space<any>>) dst(%314 : memref<512x512xbf16, #tpu.memory_space<vmem>>)
    %317 = arith.truncf %310 : vector<8x512xf32> to vector<8x512xbf16>
    %c2 = arith.constant 2 : index
    %c0_111 = arith.constant 0 : index
    %c0_112 = arith.constant 0 : index
    %318 = vector.load %arg17[%c2, %c0_111, %c0_112] : memref<4x512x512xbf16, #tpu.memory_space<vmem>>, vector<1x512x512xbf16>
    %319 = vector.shape_cast %318 : vector<1x512x512xbf16> to vector<512x512xbf16>
    %cst_113 = arith.constant dense<0.000000e+00> : vector<8x512xf32>
    %320 = tpu.matmul %317, %319, %cst_113 {dimension_numbers = #tpu.dot_dimension_numbers<[1], [0], [0], [1], [0, 0, 1, 1], [], []>} : vector<8x512xbf16>, vector<512x512xbf16>, vector<8x512xf32> -> vector<8x512xf32>
    %c0_114 = arith.constant 0 : index
    %c0_115 = arith.constant 0 : index
    %321 = vector.load %arg9[%c0_114, %c0_115] : memref<1x512xf32, #tpu.memory_space<vmem>>, vector<1x512xf32>
    %322 = vector.broadcast %321 : vector<1x512xf32> to vector<8x512xf32>
    %323 = arith.addf %320, %322 : vector<8x512xf32>
    %cst_116 = arith.constant 0.000000e+00 : f32
    %324 = vector.broadcast %cst_116 : f32 to vector<8x512xf32>
    %325 = arith.maximumf %323, %324 : vector<8x512xf32>
    %c3_i32_117 = arith.constant 3 : i32
    %c3_i32_118 = arith.constant 3 : i32
    %c4_i32_119 = arith.constant 4 : i32
    %c0_i32_120 = arith.constant 0 : i32
    %c0_i32_121 = arith.constant 0 : i32
    %326 = tpu.memref_slice %arg14[%c3_i32_117, %c0_i32_120, %c0_i32_121] : memref<4x512x512xbf16, #tpu.memory_space<any>> -> memref<1x512x512xbf16, #tpu.memory_space<any>>
    %327 = tpu.memref_squeeze %326 : memref<1x512x512xbf16, #tpu.memory_space<any>> -> memref<512x512xbf16, #tpu.memory_space<any>>
    %c0_i32_122 = arith.constant 0 : i32
    %c0_i32_123 = arith.constant 0 : i32
    %328 = tpu.memref_slice %arg17[%c3_i32_118, %c0_i32_122, %c0_i32_123] : memref<4x512x512xbf16, #tpu.memory_space<vmem>> -> memref<1x512x512xbf16, #tpu.memory_space<vmem>>
    %329 = tpu.memref_squeeze %328 : memref<1x512x512xbf16, #tpu.memory_space<vmem>> -> memref<512x512xbf16, #tpu.memory_space<vmem>>
    %330 = tpu.memref_slice %arg18[%c4_i32_119] : memref<5x!tpu.dma_semaphore, #tpu.memory_space<semaphore_mem>> -> memref<1x!tpu.dma_semaphore, #tpu.memory_space<semaphore_mem>>
    %331 = tpu.memref_squeeze %330 : memref<1x!tpu.dma_semaphore, #tpu.memory_space<semaphore_mem>> -> memref<!tpu.dma_semaphore, #tpu.memory_space<semaphore_mem>>
    tpu.wait_dma2 semaphore(%331 : memref<!tpu.dma_semaphore, #tpu.memory_space<semaphore_mem>>) src(%327 : memref<512x512xbf16, #tpu.memory_space<any>>) dst(%329 : memref<512x512xbf16, #tpu.memory_space<vmem>>)
    %332 = arith.truncf %325 : vector<8x512xf32> to vector<8x512xbf16>
    %c3 = arith.constant 3 : index
    %c0_124 = arith.constant 0 : index
    %c0_125 = arith.constant 0 : index
    %333 = vector.load %arg17[%c3, %c0_124, %c0_125] : memref<4x512x512xbf16, #tpu.memory_space<vmem>>, vector<1x512x512xbf16>
    %334 = vector.shape_cast %333 : vector<1x512x512xbf16> to vector<512x512xbf16>
    %cst_126 = arith.constant dense<0.000000e+00> : vector<8x512xf32>
    %335 = tpu.matmul %332, %334, %cst_126 {dimension_numbers = #tpu.dot_dimension_numbers<[1], [0], [0], [1], [0, 0, 1, 1], [], []>} : vector<8x512xbf16>, vector<512x512xbf16>, vector<8x512xf32> -> vector<8x512xf32>
    %c0_127 = arith.constant 0 : index
    %c0_128 = arith.constant 0 : index
    %336 = vector.load %arg10[%c0_127, %c0_128] : memref<1x512xf32, #tpu.memory_space<vmem>>, vector<1x512xf32>
    %337 = vector.broadcast %336 : vector<1x512xf32> to vector<8x512xf32>
    %338 = arith.addf %335, %337 : vector<8x512xf32>
    %cst_129 = arith.constant 0.000000e+00 : f32
    %339 = vector.broadcast %cst_129 : f32 to vector<8x512xf32>
    %340 = arith.maximumf %338, %339 : vector<8x512xf32>
    %c0_130 = arith.constant 0 : index
    %c0_131 = arith.constant 0 : index
    %341 = vector.load %arg11[%c0_130, %c0_131] : memref<1x512xf32, #tpu.memory_space<vmem>>, vector<1x512xf32>
    %342 = vector.broadcast %341 : vector<1x512xf32> to vector<8x512xf32>
    %343 = arith.mulf %340, %342 : vector<8x512xf32>
    %cst_132 = arith.constant dense<0.000000e+00> : vector<8xf32>
    %344 = vector.multi_reduction <add>, %343, %cst_132 [1] : vector<8x512xf32> to vector<8xf32>
    %345 = vector.shape_cast %344 : vector<8xf32> to vector<8x1xf32>
    %c0_133 = arith.constant 0 : index
    %c0_134 = arith.constant 0 : index
    %346 = vector.load %arg12[%c0_133, %c0_134] : memref<1x1xf32, #tpu.memory_space<vmem>>, vector<1x1xf32>
    %347 = vector.broadcast %346 : vector<1x1xf32> to vector<8x1xf32>
    %348 = arith.addf %345, %347 : vector<8x1xf32>
    %c0_135 = arith.constant 0 : index
    %c0_136 = arith.constant 0 : index
    %349 = vector.load %arg15[%c0_135, %c0_136] : memref<8x1xf32, #tpu.memory_space<vmem>>, vector<8x1xf32>
    tpu.vector_store %arg15[%c0_135, %c0_136], %348 {strides = array<i32>} : memref<8x1xf32, #tpu.memory_space<vmem>>, vector<8x1xf32>,
    return
  }
}

</mosaic_0001>

<bundles_post_ra>
// kernel: farmer_forward.1
= control target key start
LH: loop header
LB: loop body
LE: loop exit
PB: predicated region body
PF: predicated region fallthrough
CT: control target
= control target key end

     0   :  { %s7108_s0 = inlined_call_operand.vmem [shape: bf16[64,216], index: 0, kind: input, shape index: {}]   ;;  %s7109_s1 = inlined_call_operand.vmem [shape: bf16[8,594], index: 1, kind: input, shape index: {}]   ;;  %s7110_s2 = inlined_call_operand.hbm [shape: bf16[216,512], index: 2, kind: input, shape index: {}]   ;;  %s7111_s3 = inlined_call_operand.hbm [shape: bf16[128,512], index: 3, kind: input, shape index: {}]   ;;  %s7112_s4 = inlined_call_operand.hbm [shape: f32[1,512], index: 4, kind: input, shape index: {}]   ;;  %s7113_s5 = inlined_call_operand.hbm [shape: bf16[128,512], index: 5, kind: input, shape index: {}]   ;;  %s7114_s6 = inlined_call_operand.hbm [shape: f32[1,512], index: 6, kind: input, shape index: {}]   ;;  %s7115_s7 = inlined_call_operand.hbm [shape: f32[1,512], index: 7, kind: input, shape index: {}]   ;;  %s7116_s8 = inlined_call_operand.hbm [shape: f32[1,512], index: 8, kind: input, shape index: {}]   ;;  %s7117_s9 = inlined_call_operand.hbm [shape: f32[1,512], index: 9, kind: input, shape index: {}]   ;;  %s7118_s10 = inlined_call_operand.hbm [shape: f32[1,512], index: 10, kind: input, shape index: {}]   ;;  %s7119_s11 = inlined_call_operand.hbm [shape: f32[1,512], index: 11, kind: input, shape index: {}]   ;;  %s7120_s12 = inlined_call_operand.<no memory space> [shape: f32[1,1], index: 12, kind: input, shape index: {}]   ;;  %s7121_s13 = inlined_call_operand.hbm [shape: bf16[594,512], index: 13, kind: input, shape index: {}]   ;;  %s7122_s14 = inlined_call_operand.hbm [shape: bf16[4,512,512], index: 14, kind: input, shape index: {}]   ;;  %s7123_s15 = inlined_call_operand.vmem [shape: f32[8,1], index: 15, kind: output, shape index: {}]  }
   0x1   :  { %v20_v0 = vstv %s7120_s12 }
   0x2   :  { %21 = vst [vmem:[#allocation5] sm:$0x1] %v20_v0 }
   0x3   :  { %22 = vsyncpa [#allocation7], 0 }
   0x4   :  { %23 = vsyncpa [#allocation9], 0 }
   0x5   :  { %24 = vsyncpa [#allocation12], 0 }
   0x6   :  { %25 = vsyncpa [#allocation15], 0 }
   0x7   :  { %26 = vsyncpa [#allocation18], 0 }
   0x8   :  { %27 = vsyncpa [#allocation21], 0  ;;  %s6106_s20 = smov [#allocation8]   ;;  %s6107_s22 = smov [#allocation11]  }
   0x9   :  { %s49_s21 = sshll.u32 %s6106_s20, 4  ;;  %s71_s23 = sshll.u32 %s6107_s22, 4  ;;  %s50_s21 = int_to_ptr.vmem [resolvable:$true] %s49_s21  ;;  %s6220_s23 = int_to_ptr.vmem [resolvable:$true] %s71_s23 }
   0xa   :  { %s5842_s26 = scalar_lea.hbm %s7111_s3, 4096 }
   0xb   :  { %p5843_p0 = scmp.ne.s32.totalorder %s7111_s3, %s5842_s26  ;;  %p5846_p1 = scmp.lt.u32.totalorder %s5842_s26, %s7111_s3 }
   0xd   :  { %p5848_p2 = pnand %p5846_p1, %p5843_p0 }
   0xf   :  { %5851 = shalt.err (!%p5848_p2)
}
  0x10   :  { %s5852_s30 = scalar_lea.vmem %s50_s21, 4096  ;;  %p5857_p4 = scmp.lt.s32.totalorder %s50_s21, %s50_s21 }
  0x11   :  { %p5853_p3 = scmp.ne.s32.totalorder %s50_s21, %s5852_s30  ;;  %p5858_p5 = scmp.lt.s32.totalorder %s5852_s30, %s5852_s30 }
  0x13   :  { %p5859_p6 = por %p5858_p5, %p5857_p4 }
  0x15   :  { %p5860_p7 = pnand %p5859_p6, %p5853_p3 }
  0x17   :  { %5863 = shalt.err (!%p5860_p7)
}
  0x18   :  { %s6108_s16 = smov 256   ;;  %s6109_s17 = smov 16  }
  0x19   :  { %55 = dma.hbm_to_vmem [thread:$0]  %s7111_s3, 4096, %s50_s21, [#allocation9], %s6108_s16, %s6108_s16, %s6109_s17  }
  0x1a   :  { %s5864_s24 = scalar_lea.hbm %s7113_s5, 4096 }
  0x1b   :  { %p5865_p8 = scmp.ne.s32.totalorder %s7113_s5, %s5864_s24  ;;  %p5868_p9 = scmp.lt.u32.totalorder %s5864_s24, %s7113_s5 }
  0x1d   :  { %p5870_p10 = pnand %p5868_p9, %p5865_p8 }
  0x1f   :  { %5873 = shalt.err (!%p5870_p10)
}
  0x20   :  { %s5874_s28 = scalar_lea.vmem %s6220_s23, 4096  ;;  %p5879_p12 = scmp.lt.s32.totalorder %s6220_s23, %s6220_s23 }
  0x21   :  { %p5875_p11 = scmp.ne.s32.totalorder %s6220_s23, %s5874_s28  ;;  %p5880_p13 = scmp.lt.s32.totalorder %s5874_s28, %s5874_s28 }
  0x23   :  { %p5881_p0 = por %p5880_p13, %p5879_p12 }
  0x25   :  { %p5882_p1 = pnand %p5881_p0, %p5875_p11 }
  0x27   :  { %5885 = shalt.err (!%p5882_p1)
}
  0x28   :  { %77 = dma.hbm_to_vmem [thread:$0]  %s7113_s5, 4096, %s6220_s23, [#allocation12], %s6108_s16, %s6108_s16, %s6109_s17  }
  0x29   :  { %s6110_s29 = smov [#allocation14]   ;;  %s6111_s18 = smov [#allocation17]  }
  0x2a   :  { %s94_s30 = sshll.u32 %s6110_s29, 4  ;;  %s114_s19 = sshll.u32 %s6111_s18, 4  ;;  %s95_s30 = int_to_ptr.vmem [resolvable:$true] %s94_s30  ;;  %s115_s19 = int_to_ptr.vmem [resolvable:$true] %s114_s19 }
  0x2b   :  { %s5886_s24 = scalar_lea.hbm %s7115_s7, 64 }
  0x2c   :  { %p5887_p2 = scmp.ne.s32.totalorder %s7115_s7, %s5886_s24  ;;  %p5890_p3 = scmp.lt.u32.totalorder %s5886_s24, %s7115_s7 }
  0x2e   :  { %p5892_p4 = pnand %p5890_p3, %p5887_p2 }
  0x30   :  { %5895 = shalt.err (!%p5892_p4)
}
  0x31   :  { %s5896_s5 = scalar_lea.vmem %s95_s30, 64  ;;  %p5901_p6 = scmp.lt.s32.totalorder %s95_s30, %s95_s30 }
  0x32   :  { %p5897_p5 = scmp.ne.s32.totalorder %s95_s30, %s5896_s5  ;;  %p5902_p7 = scmp.lt.s32.totalorder %s5896_s5, %s5896_s5 }
  0x34   :  { %p5903_p8 = por %p5902_p7, %p5901_p6 }
  0x36   :  { %p5904_p9 = pnand %p5903_p8, %p5897_p5 }
  0x38   :  { %5907 = shalt.err (!%p5904_p9)
}
  0x39   :  { %97 = dma.hbm_to_vmem [thread:$0]  %s7115_s7, 64, %s95_s30, [#allocation15]  }
  0x3a   :  { %s5908_s29 = scalar_lea.hbm %s7117_s9, 64 }
  0x3b   :  { %p5909_p10 = scmp.ne.s32.totalorder %s7117_s9, %s5908_s29  ;;  %p5912_p11 = scmp.lt.u32.totalorder %s5908_s29, %s7117_s9 }
  0x3d   :  { %p5914_p12 = pnand %p5912_p11, %p5909_p10 }
  0x3f   :  { %5917 = shalt.err (!%p5914_p12)
}
  0x40   :  { %s5918_s25 = scalar_lea.vmem %s115_s19, 64  ;;  %p5923_p0 = scmp.lt.s32.totalorder %s115_s19, %s115_s19 }
  0x41   :  { %p5919_p13 = scmp.ne.s32.totalorder %s115_s19, %s5918_s25  ;;  %p5924_p1 = scmp.lt.s32.totalorder %s5918_s25, %s5918_s25 }
  0x43   :  { %p5925_p2 = por %p5924_p1, %p5923_p0 }
  0x45   :  { %p5926_p3 = pnand %p5925_p2, %p5919_p13 }
  0x47   :  { %5929 = shalt.err (!%p5926_p3)
}
  0x48   :  { %117 = dma.hbm_to_vmem [thread:$0]  %s7117_s9, 64, %s115_s19, [#allocation18]  }
  0x49   :  { %s6112_s26 = smov [#allocation6]   ;;  %s6113_s12 = smov [#allocation10]  }
  0x4a   :  { %s37_s27 = sshll.u32 %s6112_s26, 4  ;;  %s62_s5 = sshll.u32 %s6113_s12, 4  ;;  %s38_s27 = int_to_ptr.vmem [resolvable:$true] %s37_s27  ;;  %s63_s5 = int_to_ptr.vmem [resolvable:$true] %s62_s5 }
  0x4b   :  { %s5930_s3 = scalar_lea.hbm %s7110_s2, 6912 }
  0x4c   :  { %p5931_p4 = scmp.ne.s32.totalorder %s7110_s2, %s5930_s3  ;;  %p5934_p5 = scmp.lt.u32.totalorder %s5930_s3, %s7110_s2 }
  0x4e   :  { %p5936_p6 = pnand %p5934_p5, %p5931_p4 }
  0x50   :  { %5939 = shalt.err (!%p5936_p6)
}
  0x51   :  { %s5940_s9 = scalar_lea.vmem %s38_s27, 6912  ;;  %p5945_p8 = scmp.lt.s32.totalorder %s38_s27, %s38_s27 }
  0x52   :  { %p5941_p7 = scmp.ne.s32.totalorder %s38_s27, %s5940_s9  ;;  %p5946_p9 = scmp.lt.s32.totalorder %s5940_s9, %s5940_s9 }
  0x54   :  { %p5947_p10 = por %p5946_p9, %p5945_p8 }
  0x56   :  { %p5948_p11 = pnand %p5947_p10, %p5941_p7 }
  0x58   :  { %5951 = shalt.err (!%p5948_p11)
}
  0x59   :  { %43 = dma.hbm_to_vmem [thread:$0]  %s7110_s2, 6912, %s38_s27, [#allocation7], %s6108_s16, %s6108_s16, %s6109_s17  }
  0x5a   :  { %s5952_s7 = scalar_lea.hbm %s7112_s4, 64 }
  0x5b   :  { %p5953_p12 = scmp.ne.s32.totalorder %s7112_s4, %s5952_s7  ;;  %p5956_p13 = scmp.lt.u32.totalorder %s5952_s7, %s7112_s4 }
  0x5d   :  { %p5958_p0 = pnand %p5956_p13, %p5953_p12 }
  0x5f   :  { %5961 = shalt.err (!%p5958_p0)
}
  0x60   :  { %s5962_s28 = scalar_lea.vmem %s63_s5, 64  ;;  %p5967_p2 = scmp.lt.s32.totalorder %s63_s5, %s63_s5 }
  0x61   :  { %p5963_p1 = scmp.ne.s32.totalorder %s63_s5, %s5962_s28  ;;  %p5968_p3 = scmp.lt.s32.totalorder %s5962_s28, %s5962_s28 }
  0x63   :  { %p5969_p4 = por %p5968_p3, %p5967_p2 }
  0x65   :  { %p5970_p5 = pnand %p5969_p4, %p5963_p1 }
  0x67   :  { %5973 = shalt.err (!%p5970_p5)
}
  0x68   :  { %65 = dma.hbm_to_vmem [thread:$0]  %s7112_s4, 64, %s63_s5, [#allocation9]  }
  0x69   :  { %s6114_s27 = smov [#allocation13]   ;;  %s6115_s21 = smov [#allocation16]  }
  0x6a   :  { %s84_s3 = sshll.u32 %s6114_s27, 4  ;;  %s104_s29 = sshll.u32 %s6115_s21, 4  ;;  %s85_s3 = int_to_ptr.vmem [resolvable:$true] %s84_s3  ;;  %s105_s29 = int_to_ptr.vmem [resolvable:$true] %s104_s29 }
  0x6b   :  { %s5974_s9 = scalar_lea.hbm %s7114_s6, 64 }
  0x6c   :  { %p5975_p6 = scmp.ne.s32.totalorder %s7114_s6, %s5974_s9  ;;  %p5978_p7 = scmp.lt.u32.totalorder %s5974_s9, %s7114_s6 }
  0x6e   :  { %p5980_p8 = pnand %p5978_p7, %p5975_p6 }
  0x70   :  { %5983 = shalt.err (!%p5980_p8)
}
  0x71   :  { %s5984_s4 = scalar_lea.vmem %s85_s3, 64  ;;  %p5989_p10 = scmp.lt.s32.totalorder %s85_s3, %s85_s3 }
  0x72   :  { %p5985_p9 = scmp.ne.s32.totalorder %s85_s3, %s5984_s4  ;;  %p5990_p11 = scmp.lt.s32.totalorder %s5984_s4, %s5984_s4 }
  0x74   :  { %p5991_p12 = por %p5990_p11, %p5989_p10 }
  0x76   :  { %p5992_p13 = pnand %p5991_p12, %p5985_p9 }
  0x78   :  { %5995 = shalt.err (!%p5992_p13)
}
  0x79   :  { %87 = dma.hbm_to_vmem [thread:$0]  %s7114_s6, 64, %s85_s3, [#allocation12]  }
  0x7a   :  { %s5996_s12 = scalar_lea.hbm %s7116_s8, 64 }
  0x7b   :  { %p5997_p0 = scmp.ne.s32.totalorder %s7116_s8, %s5996_s12  ;;  %p6000_p1 = scmp.lt.u32.totalorder %s5996_s12, %s7116_s8 }
  0x7d   :  { %p6002_p2 = pnand %p6000_p1, %p5997_p0 }
  0x7f   :  { %6005 = shalt.err (!%p6002_p2)
}
  0x80   :  { %s6006_s27 = scalar_lea.vmem %s105_s29, 64  ;;  %p6011_p4 = scmp.lt.s32.totalorder %s105_s29, %s105_s29 }
  0x81   :  { %p6007_p3 = scmp.ne.s32.totalorder %s105_s29, %s6006_s27  ;;  %p6012_p5 = scmp.lt.s32.totalorder %s6006_s27, %s6006_s27 }
  0x83   :  { %p6013_p6 = por %p6012_p5, %p6011_p4 }
  0x85   :  { %p6014_p7 = pnand %p6013_p6, %p6007_p3 }
  0x87   :  { %6017 = shalt.err (!%p6014_p7)
}
  0x88   :  { %107 = dma.hbm_to_vmem [thread:$0]  %s7116_s8, 64, %s105_s29, [#allocation15]  }
  0x89   :  { %s6116_s21 = smov [#allocation19]   ;;  %s6117_s20 = smov [#allocation20]  }
  0x8a   :  { %s124_s18 = sshll.u32 %s6116_s21, 4  ;;  %s134_s9 = sshll.u32 %s6117_s20, 4  ;;  %s125_s18 = int_to_ptr.vmem [resolvable:$true] %s124_s18  ;;  %s135_s9 = int_to_ptr.vmem [resolvable:$true] %s134_s9 }
  0x8b   :  { %s6018_s24 = scalar_lea.hbm %s7118_s10, 64 }
  0x8c   :  { %p6019_p8 = scmp.ne.s32.totalorder %s7118_s10, %s6018_s24  ;;  %p6022_p9 = scmp.lt.u32.totalorder %s6018_s24, %s7118_s10 }
  0x8e   :  { %p6024_p10 = pnand %p6022_p9, %p6019_p8 }
  0x90   :  { %6027 = shalt.err (!%p6024_p10)
}
  0x91   :  { %s6028_s8 = scalar_lea.vmem %s125_s18, 64  ;;  %p6033_p12 = scmp.lt.s32.totalorder %s125_s18, %s125_s18 }
  0x92   :  { %p6029_p11 = scmp.ne.s32.totalorder %s125_s18, %s6028_s8  ;;  %p6034_p13 = scmp.lt.s32.totalorder %s6028_s8, %s6028_s8 }
  0x94   :  { %p6035_p0 = por %p6034_p13, %p6033_p12 }
  0x96   :  { %p6036_p1 = pnand %p6035_p0, %p6029_p11 }
  0x98   :  { %6039 = shalt.err (!%p6036_p1)
}
  0x99   :  { %127 = dma.hbm_to_vmem [thread:$0]  %s7118_s10, 64, %s125_s18, [#allocation18]  }
  0x9a   :  { %s6040_s23 = scalar_lea.hbm %s7119_s11, 64 }
  0x9b   :  { %p6041_p2 = scmp.ne.s32.totalorder %s7119_s11, %s6040_s23  ;;  %p6044_p3 = scmp.lt.u32.totalorder %s6040_s23, %s7119_s11 }
  0x9d   :  { %p6046_p4 = pnand %p6044_p3, %p6041_p2 }
  0x9f   :  { %6049 = shalt.err (!%p6046_p4)
}
  0xa0   :  { %s6050_s6 = scalar_lea.vmem %s135_s9, 64  ;;  %p6055_p6 = scmp.lt.s32.totalorder %s135_s9, %s135_s9 }
  0xa1   :  { %p6051_p5 = scmp.ne.s32.totalorder %s135_s9, %s6050_s6  ;;  %p6056_p7 = scmp.lt.s32.totalorder %s6050_s6, %s6050_s6 }
  0xa3   :  { %p6057_p8 = por %p6056_p7, %p6055_p6 }
  0xa5   :  { %p6058_p9 = pnand %p6057_p8, %p6051_p5 }
  0xa7   :  { %6061 = shalt.err (!%p6058_p9)
}
  0xa8   :  { %137 = dma.hbm_to_vmem [thread:$0]  %s7119_s11, 64, %s135_s9, [#allocation21]  }
  0xa9   :  { %6084 = dma.done.wait [#allocation7], 6912  }
  0xaa   :  { %6085 = vsyncadd [#allocation7], 4294960384 }
  0xab   :  { %6086 = dma.done.wait [#allocation9], 4160  }
  0xac   :  { %6087 = vsyncadd [#allocation9], 4294963136 }
  0xad   :  { %6088 = dma.done.wait [#allocation12], 4160  }
  0xae   :  { %6089 = vsyncadd [#allocation12], 4294963136 }
  0xaf   :  { %6090 = dma.done.wait [#allocation15], 128  }
  0xb0   :  { %6091 = vsyncadd [#allocation15], 4294967168 }
  0xb1   :  { %6092 = dma.done.wait [#allocation18], 128  }
  0xb2   :  { %6093 = vsyncadd [#allocation18], 4294967168 }
  0xb3   :  { %6094 = dma.done.wait [#allocation21], 64  }
  0xb4   :  { %6095 = vsyncadd [#allocation21], 4294967232  ;;  %s187_s21 = sld [smem:[#allocation0]]   ;;  %s6118_s18 = smov 512  }
  0xb5   :  { %199 = sst [smem:[#allocation27]] %s6118_s18  ;;  %s6119_s20 = smov 4  }
  0xb6   :  { %201 = sst [smem:[#allocation27 + $0x1]] %s6118_s18  ;;  %s6120_s11 = smov 64  }
  0xb7   :  { %203 = sst [smem:[#allocation27 + $0x2]] %s6119_s20  ;;  %s6121_s9 = smov [#allocation2]  }
  0xb8   :  { %205 = sst [smem:[#allocation27 + $0x3]] %s6120_s11  ;;  %s178_s19 = sshll.u32 %s6121_s9, 4  ;;  %s179_s19 = int_to_ptr.vmem [resolvable:$true] %s178_s19 }
  0xb9   :  { %211 = sst [smem:[#allocation27 + $0x6]] %s6108_s16  ;;  %s6122_s25 = smov [#allocation3]  }
  0xba   :  { %213 = sst [smem:[#allocation27 + $0x7]] %s6120_s11  ;;  %s4845_s22 = sshll.u32 %s187_s21, 26 }
  0xbb   :  { %215 = sst [smem:[#allocation27 + $0x8]] %s6119_s20  ;;  %s6363_s24 = sadd.s32 134217728, %s4845_s22 }
  0xbc   :  { %s195_s4 = sshll.u32 %s6122_s25, 4  ;;  %s6062_s8 = scalar_lea.hbm %s7121_s13, 19200  ;;  %s196_s4 = int_to_ptr.vmem [resolvable:$true] %s195_s4 }
  0xbd   :  { %p6063_p10 = scmp.ne.s32.totalorder %s7121_s13, %s6062_s8  ;;  %p6066_p11 = scmp.lt.u32.totalorder %s6062_s8, %s7121_s13 }
  0xbf   :  { %p6068_p12 = pnand %p6066_p11, %p6063_p10 }
  0xc1   :  { %6071 = shalt.err (!%p6068_p12)  }
  0xc2   :  { %s6072_s23 = scalar_lea.vmem %s179_s19, 19200  ;;  %p6077_p0 = scmp.lt.s32.totalorder %s179_s19, %s179_s19 }
  0xc3   :  { %p6073_p13 = scmp.ne.s32.totalorder %s179_s19, %s6072_s23  ;;  %p6078_p1 = scmp.lt.s32.totalorder %s6072_s23, %s6072_s23 }
  0xc5   :  { %p6079_p2 = por %p6078_p1, %p6077_p0 }
  0xc7   :  { %p6080_p3 = pnand %p6079_p2, %p6073_p13 }
  0xc9   :  { %6083 = shalt.err (!%p6080_p3)  }
  0xca   :  { %181 = dma.hbm_to_vmem [thread:$0]  %s7121_s13, 19200, %s179_s19, [#allocation4]  ;;  %vm719_vm0 = vcmask 719872   ;;  %vm732_vm1 = vcmask 1043456  }
  0xcb   :  { %s6123_s17 = smov 128   ;;  %s6124_s27 = smov 2  }
  0xcc   :  { %207 = sst [smem:[#allocation27 + $0x4]] %s6123_s17  ;;  %s6125_s6 = smov [#allocation4 + $0x1]  }
  0xcd   :  { %209 = sst [smem:[#allocation27 + $0x5]] %s6124_s27  ;;  %s6126_s10 = smov [#allocation26]  }
  0xce   :  { %217 = dma.general %s7122_s14, 16384, %s196_s4, %s6125_s6, %s6126_s10, [#allocation27], %s6363_s24, 0  }
  0xcf   :  { %236 = sst [smem:[#allocation29]] %s6118_s18  ;;  %s6127_s9 = smov [#allocation3 + $0x400]  }
  0xd0   :  { %238 = sst [smem:[#allocation29 + $0x1]] %s6118_s18  ;;  %s232_s13 = sshll.u32 %s6127_s9, 4  ;;  %s233_s13 = int_to_ptr.vmem [resolvable:$true] %s232_s13 }
  0xd1   :  { %240 = sst [smem:[#allocation29 + $0x2]] %s6119_s20  ;;  %s218_s25 = scalar_lea.hbm %s7122_s14, 16384 }
  0xd2   :  { %242 = sst [smem:[#allocation29 + $0x3]] %s6120_s11  ;;  %s6128_s4 = smov [#allocation4 + $0x2]  }
  0xd3   :  { %244 = sst [smem:[#allocation29 + $0x4]] %s6123_s17  ;;  %s6129_s5 = smov [#allocation28]  }
  0xd4   :  { %246 = sst [smem:[#allocation29 + $0x5]] %s6124_s27  ;;  %s6130_s7 = smov [#allocation3 + $0x800]  }
  0xd5   :  { %248 = sst [smem:[#allocation29 + $0x6]] %s6108_s16  ;;  %s269_s8 = sshll.u32 %s6130_s7, 4  ;;  %s270_s8 = int_to_ptr.vmem [resolvable:$true] %s269_s8 }
  0xd6   :  { %250 = sst [smem:[#allocation29 + $0x7]] %s6120_s11  ;;  %s255_s26 = scalar_lea.hbm %s7122_s14, 32768 }
  0xd7   :  { %252 = sst [smem:[#allocation29 + $0x8]] %s6119_s20  ;;  %s6131_s12 = smov [#allocation4 + $0x3]  }
  0xd8   :  { %254 = dma.general %s218_s25, 16384, %s233_s13, %s6128_s4, %s6129_s5, [#allocation29], %s6363_s24, 0  }
  0xd9   :  { %273 = sst [smem:[#allocation31]] %s6118_s18  ;;  %s6132_s23 = smov [#allocation30]  }
  0xda   :  { %275 = sst [smem:[#allocation31 + $0x1]] %s6118_s18  ;;  %s6133_s28 = smov [#allocation3 + $0xc00]  }
  0xdb   :  { %277 = sst [smem:[#allocation31 + $0x2]] %s6119_s20  ;;  %s306_s2 = sshll.u32 %s6133_s28, 4  ;;  %s307_s2 = int_to_ptr.vmem [resolvable:$true] %s306_s2 }
  0xdc   :  { %279 = sst [smem:[#allocation31 + $0x3]] %s6120_s11  ;;  %s292_s3 = scalar_lea.hbm %s7122_s14, 49152 }
  0xdd   :  { %281 = sst [smem:[#allocation31 + $0x4]] %s6123_s17  ;;  %s6135_s21 = smov [#allocation32]  }
  0xde   :  { %283 = sst [smem:[#allocation31 + $0x5]] %s6124_s27 }
  0xdf   :  { %285 = sst [smem:[#allocation31 + $0x6]] %s6108_s16 }
  0xe0   :  { %287 = sst [smem:[#allocation31 + $0x7]] %s6120_s11 }
  0xe1   :  { %289 = sst [smem:[#allocation31 + $0x8]] %s6119_s20 }
  0xe2   :  { %291 = dma.general %s255_s26, 16384, %s270_s8, %s6131_s12, %s6132_s23, [#allocation31], %s6363_s24, 0  }
  0xe3   :  { %310 = sst [smem:[#allocation33]] %s6118_s18 }
  0xe4   :  { %312 = sst [smem:[#allocation33 + $0x1]] %s6118_s18  ;;  %s6134_s18 = smov [#allocation4 + $0x4]  }
  0xe5   :  { %314 = sst [smem:[#allocation33 + $0x2]] %s6119_s20 }
  0xe6   :  { %316 = sst [smem:[#allocation33 + $0x3]] %s6120_s11 }
  0xe7   :  { %318 = sst [smem:[#allocation33 + $0x4]] %s6123_s17 }
  0xe8   :  { %320 = sst [smem:[#allocation33 + $0x5]] %s6124_s27 }
  0xe9   :  { %322 = sst [smem:[#allocation33 + $0x6]] %s6108_s16 }
  0xea   :  { %324 = sst [smem:[#allocation33 + $0x7]] %s6120_s11 }
  0xeb   :  { %326 = sst [smem:[#allocation33 + $0x8]] %s6119_s20 }
  0xec   :  { %328 = dma.general %s292_s3, 16384, %s307_s2, %s6134_s18, %s6135_s21, [#allocation33], %s6363_s24, 0  }
  0xed   :  { %v5261_v1 = vld [vmem:[#allocation6 + $0x4] ss:$16 sps:$4 sm:$0xff]   ;;  %v5263_v2 = vld [vmem:[#allocation6 + $0xc] ss:$16 sps:$4 sm:$0xff]   ;;  %v5265_v3 = vld [vmem:[#allocation6] ss:$16 sps:$4 sm:$0xff]  }
  0xee   :  { %745 = vmatprep.subr.bf16.mxu0 %v5261_v1  ;;  %v5266_v4 = vld [vmem:[#allocation6 + $0x8] ss:$16 sps:$4 sm:$0xff]   ;;  %818 = vmatprep.subr.bf16.mxu1 %v5263_v2  ;;  %v5267_v5 = vld [vmem:[#allocation6 + $0x24] ss:$16 sps:$4 sm:$0xff]   ;;  %v5269_v6 = vld [vmem:[#allocation6 + $0x2c] ss:$16 sps:$4 sm:$0xff]  }
  0xef   :  { %746 = vmatpush1.bf16.msra.mxu0 %v5265_v3  ;;  %819 = vmatpush1.bf16.msra.mxu1 %v5266_v4  ;;  %v5271_v7 = vld [vmem:[#allocation6 + $0x20] ss:$16 sps:$4 sm:$0xff]   ;;  %v5272_v8 = vld [vmem:[#allocation6 + $0x28] ss:$16 sps:$4 sm:$0xff]   ;;  %v5273_v9 = vld [vmem:[#allocation6 + $0x44] ss:$16 sps:$4 sm:$0xff]  }
  0xf0   :  { %747 = vmatprep.subr.bf16.mxu0 %v5267_v5  ;;  %820 = vmatprep.subr.bf16.mxu1 %v5269_v6  ;;  %v5275_v10 = vld [vmem:[#allocation6 + $0x4c] ss:$16 sps:$4 sm:$0xff]   ;;  %v5277_v11 = vld [vmem:[#allocation6 + $0x40] ss:$16 sps:$4 sm:$0xff]   ;;  %v5278_v12 = vld [vmem:[#allocation6 + $0x48] ss:$16 sps:$4 sm:$0xff]  }
  0xf1   :  { %v5279_v13 = vld [vmem:[#allocation6 + $0x64] ss:$16 sps:$4 sm:$0xff]   ;;  %v5281_v14 = vld [vmem:[#allocation6 + $0x6c] ss:$16 sps:$4 sm:$0xff]   ;;  %v5283_v15 = vld [vmem:[#allocation6 + $0x60] ss:$16 sps:$4 sm:$0xff]  }
  0xf2   :  { %v5284_v16 = vld [vmem:[#allocation6 + $0x68] ss:$16 sps:$4 sm:$0xff]   ;;  %v5285_v17 = vld [vmem:[#allocation6 + $0x84] ss:$16 sps:$4 sm:$0xff]   ;;  %v5287_v18 = vld [vmem:[#allocation6 + $0x8c] ss:$16 sps:$4 sm:$0xff]  }
  0xf3   :  { %748 = vmatpush1.bf16.msra.mxu0 %v5271_v7  ;;  %821 = vmatpush1.bf16.msra.mxu1 %v5272_v8  ;;  %v5289_v19 = vld [vmem:[#allocation6 + $0x80] ss:$16 sps:$4 sm:$0xff]   ;;  %v5290_v20 = vld [vmem:[#allocation6 + $0x88] ss:$16 sps:$4 sm:$0xff]   ;;  %v5291_v21 = vld [vmem:[#allocation6 + $0xa4] ss:$16 sps:$4 sm:$0xff]  }
  0xf4   :  { %749 = vmatprep.subr.bf16.mxu0 %v5273_v9  ;;  %822 = vmatprep.subr.bf16.mxu1 %v5275_v10  ;;  %v5293_v22 = vld [vmem:[#allocation6 + $0xac] ss:$16 sps:$4 sm:$0xff]   ;;  %v5295_v23 = vld [vmem:[#allocation6 + $0xa0] ss:$16 sps:$4 sm:$0xff]   ;;  %v5296_v24 = vld [vmem:[#allocation6 + $0xa8] ss:$16 sps:$4 sm:$0xff]  }
  0xf5   :  { %v5297_v25 = vld [vmem:[#allocation6 + $0xc4] ss:$16 sps:$4 sm:$0xff]   ;;  %v5299_v26 = vld [vmem:[#allocation6 + $0xcc] ss:$16 sps:$4 sm:$0xff]   ;;  %v5301_v27 = vld [vmem:[#allocation6 + $0xc0] ss:$16 sps:$4 sm:$0xff]  }
  0xf6   :  { %v5302_v28 = vld [vmem:[#allocation6 + $0xc8] ss:$16 sps:$4 sm:$0xff]   ;;  %v5303_v29 = vld [vmem:[#allocation6 + $0xe4] ss:$16 sps:$4 sm:$0xff]   ;;  %v5305_v30 = vld [vmem:[#allocation6 + $0xec] ss:$16 sps:$4 sm:$0xff]  }
  0xf7   :  { %750 = vmatpush1.bf16.msra.mxu0 %v5277_v11  ;;  %823 = vmatpush1.bf16.msra.mxu1 %v5278_v12  ;;  %v5307_v31 = vld [vmem:[#allocation6 + $0xe0] ss:$16 sps:$4 sm:$0xff]   ;;  %v5308_v32 = vld [vmem:[#allocation6 + $0xe8] ss:$16 sps:$4 sm:$0xff]   ;;  %v5309_v33 = vld [vmem:[#allocation6 + $0x104] ss:$16 sps:$4 sm:$0xff]  }
  0xf8   :  { %751 = vmatprep.subr.bf16.mxu0 %v5279_v13  ;;  %824 = vmatprep.subr.bf16.mxu1 %v5281_v14  ;;  %v5311_v34 = vld [vmem:[#allocation6 + $0x10c] ss:$16 sps:$4 sm:$0xff]   ;;  %v5313_v35 = vld [vmem:[#allocation6 + $0x100] ss:$16 sps:$4 sm:$0xff]   ;;  %v5314_v36 = vld [vmem:[#allocation6 + $0x108] ss:$16 sps:$4 sm:$0xff]  }
  0xf9   :  { %v5315_v37 = vld [vmem:[#allocation6 + $0x124] ss:$16 sps:$4 sm:$0xff]   ;;  %v5317_v38 = vld [vmem:[#allocation6 + $0x12c] ss:$16 sps:$4 sm:$0xff]   ;;  %v5319_v39 = vld [vmem:[#allocation6 + $0x120] ss:$16 sps:$4 sm:$0xff]  }
  0xfa   :  { %v5320_v40 = vld [vmem:[#allocation6 + $0x128] ss:$16 sps:$4 sm:$0xff]   ;;  %v5321_v41 = vld [vmem:[#allocation6 + $0x144] ss:$16 sps:$4 sm:$0xff]   ;;  %v5323_v43 = vld [vmem:[#allocation6 + $0x14c] ss:$16 sps:$4 sm:$0xff]  }
  0xfb   :  { %752 = vmatpush1.bf16.msra.mxu0 %v5283_v15  ;;  %825 = vmatpush1.bf16.msra.mxu1 %v5284_v16  ;;  %v5345_v42 = vld [vmem:[%s7108_s0 + $0x4] ss:$8 sps:$4 sm:$0xff]   ;;  %v389_v52 = vld [vmem:[#allocation6 + $0x1a0] sm:$0xff]  ;;  %v390_v53 = vld [vmem:[#allocation6 + $0x1a8] sm:$0xff] }
  0xfc   :  { %753 = vmatprep.subr.bf16.mxu0 %v5285_v17  ;;  %826 = vmatprep.subr.bf16.mxu1 %v5287_v18  ;;  %v5325_v44 = vld [vmem:[#allocation6 + $0x140] ss:$16 sps:$4 sm:$0xff]   ;;  %v5326_v45 = vld [vmem:[#allocation6 + $0x148] ss:$16 sps:$4 sm:$0xff]   ;;  %v5327_v46 = vld [vmem:[#allocation6 + $0x164] ss:$16 sps:$4 sm:$0xff]   ;;  %v4914_v56 = vcombine.high %v389_v52, %v389_v52  ;;  %v4916_v57 = vcombine.high %v390_v53, %v390_v53  ;;  %v4913_v58 = vcombine.low %v389_v52, %v389_v52 }
  0xfd   :  { %4918 = vmatprep.mubr.msk.bf16.mxu0 %vm719_vm0, %v5345_v42  ;;  %4923 = vmatprep.mubr.msk.bf16.mxu1 %vm719_vm0, %v5345_v42  ;;  %v5329_v47 = vld [vmem:[#allocation6 + $0x16c] ss:$16 sps:$4 sm:$0xff]   ;;  %v5331_v48 = vld [vmem:[#allocation6 + $0x160] ss:$16 sps:$4 sm:$0xff]   ;;  %v5332_v49 = vld [vmem:[#allocation6 + $0x168] ss:$16 sps:$4 sm:$0xff]   ;;  %v4915_v59 = vcombine.low %v390_v53, %v390_v53 }
  0xfe   :  { %v5333_v50 = vld [vmem:[#allocation6 + $0x184] ss:$16 sps:$4 sm:$0xff]   ;;  %v5335_v51 = vld [vmem:[#allocation6 + $0x18c] ss:$16 sps:$4 sm:$0xff]   ;;  %v5337_v54 = vld [vmem:[#allocation6 + $0x180] ss:$16 sps:$4 sm:$0xff]  }
  0xff   :  { %754 = vmatpush1.bf16.msra.mxu0 %v5289_v19  ;;  %827 = vmatpush1.bf16.msra.mxu1 %v5290_v20  ;;  %v5338_v55 = vld [vmem:[#allocation6 + $0x188] ss:$16 sps:$4 sm:$0xff]   ;;  %v6427_v60 = vld [vmem:[#allocation8 + $0x4] ss:$16 sps:$4 sm:$0xff]   ;;  %v734_v61 = vsel %vm732_vm1, %v4913_v58, 0  ;;  %v740_v62 = vsel %vm732_vm1, %v4915_v59, 0 }
 0x100   :  { %755 = vmatprep.subr.bf16.mxu0 %v5291_v21  ;;  %828 = vmatprep.subr.bf16.mxu1 %v5293_v22  ;;  %v6429_v63 = vld [vmem:[#allocation8 + $0xc] ss:$16 sps:$4 sm:$0xff]   ;;  %v6434_v1 = vld [vmem:[#allocation8] ss:$16 sps:$4 sm:$0xff]   ;;  %v6436_v2 = vld [vmem:[#allocation8 + $0x8] ss:$16 sps:$4 sm:$0xff]  }
 0x101   :  { %v5343_v0 = vld [vmem:[%s7108_s0] ss:$8 sps:$4 sm:$0xff]   ;;  %v5358_v5 = vld [vmem:[%s7108_s0 + $0x14] ss:$8 sps:$4 sm:$0xff]   ;;  %v5360_v10 = vld [vmem:[%s7108_s0 + $0x10] ss:$8 sps:$4 sm:$0xff]  }
 0x102   :  { %v6438_v3 = vld [vmem:[#allocation8 + $0x24] ss:$16 sps:$4 sm:$0xff]   ;;  %v6442_v4 = vld [vmem:[#allocation8 + $0x2c] ss:$16 sps:$4 sm:$0xff]   ;;  %v6447_v6 = vld [vmem:[#allocation8 + $0x20] ss:$16 sps:$4 sm:$0xff]  }
 0x103   :  { %756 = vmatpush1.bf16.msra.mxu0 %v5295_v23  ;;  %829 = vmatpush1.bf16.msra.mxu1 %v5296_v24  ;;  %v6451_v7 = vld [vmem:[#allocation8 + $0x28] ss:$16 sps:$4 sm:$0xff]   ;;  %v6455_v8 = vld [vmem:[#allocation8 + $0x44] ss:$16 sps:$4 sm:$0xff]   ;;  %v6457_v9 = vld [vmem:[#allocation8 + $0x4c] ss:$16 sps:$4 sm:$0xff]  }
 0x104   :  { %757 = vmatprep.subr.bf16.mxu0 %v5297_v25  ;;  %830 = vmatprep.subr.bf16.mxu1 %v5299_v26  ;;  %v6466_v11 = vld [vmem:[#allocation8 + $0x40] ss:$16 sps:$4 sm:$0xff]   ;;  %v6468_v12 = vld [vmem:[#allocation8 + $0x48] ss:$16 sps:$4 sm:$0xff]   ;;  %v6472_v13 = vld [vmem:[#allocation8 + $0x64] ss:$16 sps:$4 sm:$0xff]  }
 0x105   :  { %v6474_v14 = vld [vmem:[#allocation8 + $0x6c] ss:$16 sps:$4 sm:$0xff]   ;;  %v6481_v16 = vld [vmem:[#allocation8 + $0x60] ss:$16 sps:$4 sm:$0xff]   ;;  %v6483_v17 = vld [vmem:[#allocation8 + $0x68] ss:$16 sps:$4 sm:$0xff]  }
 0x106   :  { %v5373_v15 = vld [vmem:[%s7108_s0 + $0x24] ss:$8 sps:$4 sm:$0xff]   ;;  %v5375_v20 = vld [vmem:[%s7108_s0 + $0x20] ss:$8 sps:$4 sm:$0xff]   ;;  %v5388_v25 = vld [vmem:[%s7108_s0 + $0x34] ss:$8 sps:$4 sm:$0xff]  }
 0x107   :  { %758 = vmatpush1.bf16.msra.mxu0 %v5301_v27  ;;  %831 = vmatpush1.bf16.msra.mxu1 %v5302_v28  ;;  %v6487_v18 = vld [vmem:[#allocation8 + $0x84] ss:$16 sps:$4 sm:$0xff]   ;;  %v6489_v19 = vld [vmem:[#allocation8 + $0x8c] ss:$16 sps:$4 sm:$0xff]   ;;  %v6498_v21 = vld [vmem:[#allocation8 + $0x80] ss:$16 sps:$4 sm:$0xff]  }
 0x108   :  { %759 = vmatprep.subr.bf16.mxu0 %v5303_v29  ;;  %832 = vmatprep.subr.bf16.mxu1 %v5305_v30  ;;  %v6500_v22 = vld [vmem:[#allocation8 + $0x88] ss:$16 sps:$4 sm:$0xff]   ;;  %v6504_v23 = vld [vmem:[#allocation8 + $0xa4] ss:$16 sps:$4 sm:$0xff]   ;;  %v6506_v24 = vld [vmem:[#allocation8 + $0xac] ss:$16 sps:$4 sm:$0xff]  }
 0x109   :  { %v6513_v26 = vld [vmem:[#allocation8 + $0xa0] ss:$16 sps:$4 sm:$0xff]   ;;  %v6515_v27 = vld [vmem:[#allocation8 + $0xa8] ss:$16 sps:$4 sm:$0xff]   ;;  %v6519_v28 = vld [vmem:[#allocation8 + $0xc4] ss:$16 sps:$4 sm:$0xff]  }
 0x10a   :  { %v6521_v29 = vld [vmem:[#allocation8 + $0xcc] ss:$16 sps:$4 sm:$0xff]  }
 0x10b   :  { %760 = vmatpush1.bf16.msra.mxu0 %v5307_v31  ;;  %833 = vmatpush1.bf16.msra.mxu1 %v5308_v32  ;;  %v5390_v30 = vld [vmem:[%s7108_s0 + $0x30] ss:$8 sps:$4 sm:$0xff]  }
 0x10c   :  { %761 = vmatprep.subr.bf16.mxu0 %v5309_v33  ;;  %834 = vmatprep.subr.bf16.mxu1 %v5311_v34  ;;  %v6530_v31 = vld [vmem:[#allocation8 + $0xc0] ss:$16 sps:$4 sm:$0xff]   ;;  %v6532_v32 = vld [vmem:[#allocation8 + $0xc8] ss:$16 sps:$4 sm:$0xff]   ;;  %v6536_v33 = vld [vmem:[#allocation8 + $0xe4] ss:$16 sps:$4 sm:$0xff]  }
 0x10d   :  { %v6538_v34 = vld [vmem:[#allocation8 + $0xec] ss:$16 sps:$4 sm:$0xff]  }
 0x10f   :  { %762 = vmatpush1.bf16.msra.mxu0 %v5313_v35  ;;  %835 = vmatpush1.bf16.msra.mxu1 %v5314_v36  ;;  %v6542_v35 = vld [vmem:[#allocation8 + $0xe0] ss:$16 sps:$4 sm:$0xff]   ;;  %v6544_v36 = vld [vmem:[#allocation8 + $0xe8] ss:$16 sps:$4 sm:$0xff]  }
 0x110   :  { %763 = vmatprep.subr.bf16.mxu0 %v5315_v37  ;;  %836 = vmatprep.subr.bf16.mxu1 %v5317_v38  ;;  %v7124_v37 = vmov 0   ;;  %v393_v38 = vlaneseq }
 0x113   :  { %764 = vmatpush1.bf16.msra.mxu0 %v5319_v39  ;;  %837 = vmatpush1.bf16.msra.mxu1 %v5320_v40  ;;  %v394_v39 = vshrl.u32 %v393_v38, 7 }
 0x114   :  { %765 = vmatprep.subr.bf16.mxu0 %v5321_v41  ;;  %838 = vmatprep.subr.bf16.mxu1 %v5323_v43  ;;  %v391_v43 = vld [vmem:[#allocation10] sm:$0xf] }
 0x115   :  { %v6590_v40 = vsub.s32 2, %v394_v39  ;;  %v6592_v41 = vsub.s32 3, %v394_v39  ;;  %v6594_v42 = vsub.s32 0, %v394_v39 }
 0x117   :  { %766 = vmatpush1.bf16.msra.mxu0 %v5325_v44  ;;  %839 = vmatpush1.bf16.msra.mxu1 %v5326_v45  ;;  %7134 = vst [vmem:[#allocation45_spill] sm:$0xff] %v6590_v40  ;;  %7135 = vst [vmem:[#allocation46_spill] sm:$0xff] %v6592_v41  ;;  %v6596_v44 = vsub.s32 1, %v394_v39  ;;  %v6599_v45 = vrot.slane %v391_v43, %v6590_v40 }
 0x118   :  { %767 = vmatprep.subr.bf16.mxu0 %v5327_v46  ;;  %840 = vmatprep.subr.bf16.mxu1 %v5329_v47  ;;  %7136 = vst [vmem:[#allocation47_spill] sm:$0xff] %v6594_v42 }
 0x119   :  { %7137 = vst [vmem:[#allocation48_spill] sm:$0xff] %v6596_v44  ;;  %v400_v52 = vrot.slane %v391_v43, %v6596_v44 }
 0x11b   :  { %768 = vmatpush1.bf16.msra.mxu0 %v5331_v48  ;;  %841 = vmatpush1.bf16.msra.mxu1 %v5332_v49  ;;  %v6606_v48 = vrot.slane %v391_v43, %v6592_v41  ;;  %v396_v49 = vrot.slane %v391_v43, %v6594_v42 }
 0x11c   :  { %769 = vmatprep.subr.bf16.mxu0 %v5333_v50  ;;  %842 = vmatprep.subr.bf16.mxu1 %v5335_v51 }
 0x11f   :  { %770 = vmatpush1.bf16.msra.mxu0 %v5337_v54  ;;  %843 = vmatpush1.bf16.msra.mxu1 %v5338_v55 }
 0x120   :  { %4917 = vmatprep.subr.msk.bf16.mxu0 %vm732_vm1, %v4914_v56  ;;  %4922 = vmatprep.subr.msk.bf16.mxu1 %vm732_vm1, %v4916_v57 }
 0x123   :  { %772 = vmatpush1.bf16.msra.mxu0 %v734_v61  ;;  %845 = vmatpush1.bf16.msra.mxu1 %v740_v62 }
 0x124   :  { %1083 = vmatprep.subr.bf16.mxu0 %v6427_v60  ;;  %1124 = vmatprep.subr.bf16.mxu1 %v6429_v63 }
 0x126   :  { %778 = vmatmul.mubr.bf16.vlgmr.msra.gmra.mrb[0].mxu0 %v5343_v0  ;;  %851 = vmatmul.mubr.bf16.vlgmr.msra.gmra.mrb[0].mxu1 %v5343_v0 }
 0x127   :  { %1084 = vmatpush1.bf16.msra.mxu0 %v6434_v1  ;;  %1125 = vmatpush1.bf16.msra.mxu1 %v6436_v2 }
 0x128   :  { %1085 = vmatprep.subr.bf16.mxu0 %v6438_v3  ;;  %1126 = vmatprep.subr.bf16.mxu1 %v6442_v4 }
 0x129   :  { %4919 = vmatprep.mubr.msk.bf16.mxu0 %vm719_vm0, %v5358_v5  ;;  %4924 = vmatprep.mubr.msk.bf16.mxu1 %vm719_vm0, %v5358_v5 }
 0x12b   :  { %1086 = vmatpush1.bf16.msra.mxu0 %v6447_v6  ;;  %1127 = vmatpush1.bf16.msra.mxu1 %v6451_v7 }
 0x12c   :  { %1087 = vmatprep.subr.bf16.mxu0 %v6455_v8  ;;  %1128 = vmatprep.subr.bf16.mxu1 %v6457_v9 }
 0x12e   :  { %788 = vmatmul.mubr.bf16.gmra.mrb[4].mxu0 %v5360_v10  ;;  %861 = vmatmul.mubr.bf16.gmra.mrb[4].mxu1 %v5360_v10 }
 0x12f   :  { %1088 = vmatpush1.bf16.msra.mxu0 %v6466_v11  ;;  %1129 = vmatpush1.bf16.msra.mxu1 %v6468_v12 }
 0x130   :  { %1089 = vmatprep.subr.bf16.mxu0 %v6472_v13  ;;  %1130 = vmatprep.subr.bf16.mxu1 %v6474_v14 }
 0x131   :  { %4920 = vmatprep.mubr.msk.bf16.mxu0 %vm719_vm0, %v5373_v15  ;;  %4925 = vmatprep.mubr.msk.bf16.mxu1 %vm719_vm0, %v5373_v15 }
 0x133   :  { %1090 = vmatpush1.bf16.msra.mxu0 %v6481_v16  ;;  %1131 = vmatpush1.bf16.msra.mxu1 %v6483_v17 }
 0x134   :  { %1091 = vmatprep.subr.bf16.mxu0 %v6487_v18  ;;  %1132 = vmatprep.subr.bf16.mxu1 %v6489_v19 }
 0x136   :  { %798 = vmatmul.mubr.bf16.gmra.mrb[8].mxu0 %v5375_v20  ;;  %871 = vmatmul.mubr.bf16.gmra.mrb[8].mxu1 %v5375_v20 }
 0x137   :  { %1092 = vmatpush1.bf16.msra.mxu0 %v6498_v21  ;;  %1133 = vmatpush1.bf16.msra.mxu1 %v6500_v22 }
 0x138   :  { %1093 = vmatprep.subr.bf16.mxu0 %v6504_v23  ;;  %1134 = vmatprep.subr.bf16.mxu1 %v6506_v24 }
 0x139   :  { %4921 = vmatprep.mubr.msk.bf16.mxu0 %vm719_vm0, %v5388_v25  ;;  %4926 = vmatprep.mubr.msk.bf16.mxu1 %vm719_vm0, %v5388_v25 }
 0x13b   :  { %1094 = vmatpush1.bf16.msra.mxu0 %v6513_v26  ;;  %1135 = vmatpush1.bf16.msra.mxu1 %v6515_v27 }
 0x13c   :  { %1095 = vmatprep.subr.bf16.mxu0 %v6519_v28  ;;  %1136 = vmatprep.subr.bf16.mxu1 %v6521_v29 }
 0x13e   :  { %808 = vmatmul.mubr.bf16.gmra.mrb[12].mxu0 %v5390_v30  ;;  %881 = vmatmul.mubr.bf16.gmra.mrb[12].mxu1 %v5390_v30 }
 0x13f   :  { %1096 = vmatpush1.bf16.msra.mxu0 %v6530_v31  ;;  %1137 = vmatpush1.bf16.msra.mxu1 %v6532_v32 }
 0x140   :  { %1097 = vmatprep.subr.bf16.mxu0 %v6536_v33  ;;  %1138 = vmatprep.subr.bf16.mxu1 %v6538_v34 }
 0x141   :  { %1115 = vmatprep.mubr.bf16.mxu0 %v7124_v37  ;;  %1156 = vmatprep.mubr.bf16.mxu1 %v7124_v37 }
 0x143   :  { %1098 = vmatpush1.bf16.msra.mxu0 %v6542_v35  ;;  %1139 = vmatpush1.bf16.msra.mxu1 %v6544_v36 }
 0x144   :  { %1194 = vmatprep.subr.bf16.mxu0 %v6427_v60  ;;  %1235 = vmatprep.subr.bf16.mxu1 %v6429_v63 }
 0x146   :  { %1116 = vmatmul.mubr.bf16.vlgmr.msra.gmra.mrb[16].mxu0 %v7124_v37  ;;  %1157 = vmatmul.mubr.bf16.vlgmr.msra.gmra.mrb[16].mxu1 %v7124_v37 }
 0x147   :  { %1195 = vmatpush1.bf16.msra.mxu0 %v6434_v1  ;;  %1236 = vmatpush1.bf16.msra.mxu1 %v6436_v2 }
 0x148   :  { %1196 = vmatprep.subr.bf16.mxu0 %v6438_v3  ;;  %1237 = vmatprep.subr.bf16.mxu1 %v6442_v4 }
 0x149   :  { %1226 = vmatprep.mubr.bf16.mxu0 %v7124_v37  ;;  %1267 = vmatprep.mubr.bf16.mxu1 %v7124_v37 }
 0x14b   :  { %1197 = vmatpush1.bf16.msra.mxu0 %v6447_v6  ;;  %1238 = vmatpush1.bf16.msra.mxu1 %v6451_v7 }
 0x14c   :  { %1198 = vmatprep.subr.bf16.mxu0 %v6455_v8  ;;  %1239 = vmatprep.subr.bf16.mxu1 %v6457_v9 }
 0x14f   :  { %1199 = vmatpush1.bf16.msra.mxu0 %v6466_v11  ;;  %1240 = vmatpush1.bf16.msra.mxu1 %v6468_v12 }
 0x150   :  { %1200 = vmatprep.subr.bf16.mxu0 %v6472_v13  ;;  %1241 = vmatprep.subr.bf16.mxu1 %v6474_v14 }
 0x153   :  { %1201 = vmatpush1.bf16.msra.mxu0 %v6481_v16  ;;  %1242 = vmatpush1.bf16.msra.mxu1 %v6483_v17 }
 0x154   :  { %1202 = vmatprep.subr.bf16.mxu0 %v6487_v18  ;;  %1243 = vmatprep.subr.bf16.mxu1 %v6489_v19 }
 0x157   :  { %1203 = vmatpush1.bf16.msra.mxu0 %v6498_v21  ;;  %1244 = vmatpush1.bf16.msra.mxu1 %v6500_v22 }
 0x158   :  { %1204 = vmatprep.subr.bf16.mxu0 %v6504_v23  ;;  %1245 = vmatprep.subr.bf16.mxu1 %v6506_v24 }
 0x15b   :  { %1205 = vmatpush1.bf16.msra.mxu0 %v6513_v26  ;;  %1246 = vmatpush1.bf16.msra.mxu1 %v6515_v27 }
 0x15c   :  { %1206 = vmatprep.subr.bf16.mxu0 %v6519_v28  ;;  %1247 = vmatprep.subr.bf16.mxu1 %v6521_v29 }
 0x15f   :  { %1207 = vmatpush1.bf16.msra.mxu0 %v6530_v31  ;;  %1248 = vmatpush1.bf16.msra.mxu1 %v6532_v32 }
 0x160   :  { %1208 = vmatprep.subr.bf16.mxu0 %v6536_v33  ;;  %1249 = vmatprep.subr.bf16.mxu1 %v6538_v34 }
 0x163   :  { %1209 = vmatpush1.bf16.msra.mxu0 %v6542_v35  ;;  %1250 = vmatpush1.bf16.msra.mxu1 %v6544_v36 }
 0x164   :  { %1305 = vmatprep.subr.bf16.mxu0 %v6427_v60  ;;  %1346 = vmatprep.subr.bf16.mxu1 %v6429_v63 }
 0x1f9   :  { %v6601_v46 = vpop.f32.mrb[0].mxu0  ;;  %v6603_v47 = vpop.f32.mrb[0].mxu1 }
 0x1fa   :  { %v781_v50 = vpop.f32.mrb[1].mxu0  ;;  %v854_v51 = vpop.f32.mrb[1].mxu1 }
 0x1fb   :  { %v783_v53 = vpop.f32.mrb[2].mxu0  ;;  %v856_v54 = vpop.f32.mrb[2].mxu1 }
 0x1fc   :  { %v6610_v55 = vadd.f32 %v783_v53, %v396_v49  ;;  %v785_v56 = vpop.f32.mrb[3].mxu0  ;;  %v6613_v57 = vadd.f32 %v856_v54, %v6599_v45  ;;  %v858_v58 = vpop.f32.mrb[3].mxu1 }
 0x1fd   :  { %v6615_v59 = vadd.f32 %v785_v56, %v400_v52  ;;  %v6618_v61 = vadd.f32 %v858_v58, %v6606_v48 }
 0x201   :  { %v789_v62 = vpop.f32.mrb[4].mxu0  ;;  %v862_v0 = vpop.f32.mrb[4].mxu1 }
 0x202   :  { %v6620_v5 = vadd.f32 %v789_v62, %v396_v49  ;;  %v791_v10 = vpop.f32.mrb[5].mxu0  ;;  %v6623_v15 = vadd.f32 %v862_v0, %v6599_v45  ;;  %v864_v20 = vpop.f32.mrb[5].mxu1 }
 0x203   :  { %v6625_v25 = vadd.f32 %v791_v10, %v400_v52  ;;  %v793_v30 = vpop.f32.mrb[6].mxu0  ;;  %v6628_v38 = vadd.f32 %v864_v20, %v6606_v48  ;;  %v866_v39 = vpop.f32.mrb[6].mxu1 }
 0x204   :  { %v6630_v43 = vadd.f32 %v793_v30, %v396_v49  ;;  %v795_v53 = vpop.f32.mrb[7].mxu0  ;;  %v6633_v54 = vadd.f32 %v866_v39, %v6599_v45  ;;  %v868_v56 = vpop.f32.mrb[7].mxu1 }
 0x205   :  { %7138 = vst [vmem:[#allocation49_spill] sm:$0xff] %v6628_v38  ;;  %v6635_v58 = vadd.f32 %v795_v53, %v400_v52  ;;  %v6638_v62 = vadd.f32 %v868_v56, %v6606_v48 }
 0x206   :  { %7139 = vst [vmem:[#allocation50_spill] sm:$0xff] %v6630_v43  ;;  %7140 = vst [vmem:[#allocation51_spill] sm:$0xff] %v6633_v54 }
 0x207   :  { %7141 = vst [vmem:[#allocation52_spill] sm:$0xff] %v6635_v58  ;;  %7142 = vst [vmem:[#allocation53_spill] sm:$0xff] %v6638_v62 }
 0x209   :  { %v799_v0 = vpop.f32.mrb[8].mxu0  ;;  %v872_v10 = vpop.f32.mrb[8].mxu1 }
 0x20a   :  { %v6640_v37 = vadd.f32 %v799_v0, %v396_v49  ;;  %v801_v41 = vpop.f32.mrb[9].mxu0  ;;  %v6643_v20 = vadd.f32 %v872_v10, %v6599_v45  ;;  %v874_v30 = vpop.f32.mrb[9].mxu1 }
 0x20b   :  { %v6645_v44 = vadd.f32 %v801_v41, %v400_v52  ;;  %v803_v40 = vpop.f32.mrb[10].mxu0  ;;  %v6648_v39 = vadd.f32 %v874_v30, %v6606_v48  ;;  %v876_v53 = vpop.f32.mrb[10].mxu1 }
 0x20c   :  { %7143 = vst [vmem:[#allocation54_spill] sm:$0xff] %v6640_v37  ;;  %7144 = vst [vmem:[#allocation55_spill] sm:$0xff] %v6643_v20  ;;  %v6650_v42 = vadd.f32 %v803_v40, %v396_v49  ;;  %v805_v56 = vpop.f32.mrb[11].mxu0  ;;  %v6653_v62 = vadd.f32 %v876_v53, %v6599_v45  ;;  %v878_v0 = vpop.f32.mrb[11].mxu1 }
 0x20d   :  { %7145 = vst [vmem:[#allocation56_spill] sm:$0xff] %v6645_v44  ;;  %7146 = vst [vmem:[#allocation57_spill] sm:$0xff] %v6648_v39  ;;  %v6655_v37 = vadd.f32 %v805_v56, %v400_v52  ;;  %v6658_v10 = vadd.f32 %v878_v0, %v6606_v48 }
 0x20e   :  { %7147 = vst [vmem:[#allocation58_spill] sm:$0xff] %v6650_v42  ;;  %7148 = vst [vmem:[#allocation59_spill] sm:$0xff] %v6653_v62 }
 0x20f   :  { %7149 = vst [vmem:[#allocation60_spill] sm:$0xff] %v6655_v37  ;;  %7150 = vst [vmem:[#allocation61_spill] sm:$0xff] %v6658_v10 }
 0x211   :  { %v809_v20 = vpop.f32.mrb[12].mxu0  ;;  %v882_v41 = vpop.f32.mrb[12].mxu1 }
 0x212   :  { %v6660_v44 = vadd.f32 %v809_v20, %v396_v49  ;;  %v811_v58 = vpop.f32.mrb[13].mxu0  ;;  %v6663_v30 = vadd.f32 %v882_v41, %v6599_v45  ;;  %v884_v40 = vpop.f32.mrb[13].mxu1 }
 0x213   :  { %v6665_v42 = vadd.f32 %v811_v58, %v400_v52  ;;  %v813_v39 = vpop.f32.mrb[14].mxu0  ;;  %v6668_v53 = vadd.f32 %v884_v40, %v6606_v48  ;;  %v886_v56 = vpop.f32.mrb[14].mxu1  ;;  %v780_v58 = vadd.f32 %v6601_v46, %v396_v49  ;;  %v782_v40 = vadd.f32 %v781_v50, %v400_v52 }
 0x214   :  { %7151 = vst [vmem:[#allocation62_spill] sm:$0xff] %v6660_v44  ;;  %7152 = vst [vmem:[#allocation63_spill] sm:$0xff] %v6663_v30  ;;  %v6670_v37 = vadd.f32 %v813_v39, %v396_v49  ;;  %v815_v0 = vpop.f32.mrb[15].mxu0  ;;  %v6673_v10 = vadd.f32 %v886_v56, %v6599_v45  ;;  %v888_v20 = vpop.f32.mrb[15].mxu1 }
 0x215   :  { %7153 = vst [vmem:[#allocation64_spill] sm:$0xff] %v6665_v42  ;;  %7154 = vst [vmem:[#allocation65_spill] sm:$0xff] %v6668_v53  ;;  %v6675_v44 = vadd.f32 %v815_v0, %v400_v52  ;;  %v6678_v41 = vadd.f32 %v888_v20, %v6606_v48  ;;  %v853_v42 = vadd.f32 %v6603_v47, %v6599_v45 }
 0x216   :  { %7155 = vst [vmem:[#allocation66_spill] sm:$0xff] %v6670_v37  ;;  %7156 = vst [vmem:[#allocation67_spill] sm:$0xff] %v6673_v10  ;;  %v855_v53 = vadd.f32 %v854_v51, %v6606_v48 }
 0x217   :  { %7157 = vst [vmem:[#allocation68_spill] sm:$0xff] %v6675_v44  ;;  %7158 = vst [vmem:[#allocation69_spill] sm:$0xff] %v6678_v41 }
 0x219   :  { %v1117_v39 = vpop.f32.mrb[16].mxu0  ;;  %v1158_v37 = vpop.f32.mrb[16].mxu1 }
 0x21a   :  { %v1165_v30 = vadd.f32 %v1117_v39, %v780_v58  ;;  %v1167_v62 = vadd.f32 %v1158_v37, %v853_v42  ;;  %v1119_v56 = vpop.f32.mrb[17].mxu0  ;;  %v1160_v10 = vpop.f32.mrb[17].mxu1 }
 0x21b   :  { %v1166_v54 = vadd.f32 %v1119_v56, %v782_v40  ;;  %v1168_v0 = vadd.f32 %v1160_v10, %v855_v53  ;;  %v1121_v44 = vpop.f32.mrb[18].mxu0  ;;  %v1162_v43 = vpop.f32.mrb[18].mxu1 }
 0x21c   :  { %v4959_v20 = vmul.f32 -1.442695, %v1165_v30  ;;  %v1122_v41 = vpop.f32.mrb[19].mxu0  ;;  %v1163_v38 = vpop.f32.mrb[19].mxu1 }
 0x21d   :  { %v4960_v46 = vmul.f32 -1.442695, %v1166_v54  ;;  %v4961_v45 = vmul.f32 -1.442695, %v1168_v0 }
 0x21e   :  { %5403 = vpow2.f32 %v4959_v20 }
 0x21f   :  { %5405 = vpow2.f32 %v4960_v46 }
 0x220   :  { %5407 = vpow2.f32 %v4961_v45 }
 0x221   :  { %5409 = vtanh.f32 %v1167_v62  ;;  %v7159_v62 = vmov 0  }
 0x228   :  { %v5404_v47 = vpop.eup %5403 }
 0x229   :  { %v5406_v49 = vpop.eup %5405  ;;  %v1172_v48 = vadd.f32 1.0, %v5404_v47 }
 0x22a   :  { %v1178_v50 = vadd.f32 1.0, %v5406_v49  ;;  %v5408_v37 = vpop.eup %5407 }
 0x22b   :  { %5411 = vrcp.f32 %v1172_v48  ;;  %v5410_v42 = vpop.eup %5409  ;;  %v1185_v43 = vadd.f32 1.0, %v5408_v37 }
 0x22c   :  { %5413 = vrcp.f32 %v1178_v50 }
 0x22d   :  { %5415 = vrcp.f32 %v1185_v43 }
 0x235   :  { %v5412_v51 = vpop.eup %5411 }
 0x236   :  { %v5414_v44 = vpop.eup %5413  ;;  %v1189_v52 = vmul.f32 %v5412_v51, %v5410_v42 }
 0x237   :  { %v1188_v10 = vmul.f32 0.0, %v5414_v44  ;;  %v5416_v54 = vpop.eup %5415 }
 0x239   :  { %v6684_v38 = vadd.f32 %v1189_v52, %v1188_v10 }
 0x23b   :  { %5417 = vtanh.f32 %v6684_v38 }
 0x245   :  { %v5418_v30 = vpop.eup %5417 }
 0x246   :  { %v1192_v53 = vmul.f32 %v5418_v30, %v5416_v54 }
 0x248   :  { %v1193_v41 = vpack.c.bf16 %v1192_v53, %v1192_v53 }
 0x24a   :  { %1227 = vmatmul.mubr.bf16.vlgmr.msra.gmra.mrb[20].mxu0 %v1193_v41  ;;  %1268 = vmatmul.mubr.bf16.vlgmr.msra.gmra.mrb[20].mxu1 %v1193_v41 }
 0x24b   :  { %1306 = vmatpush1.bf16.msra.mxu0 %v6434_v1  ;;  %1347 = vmatpush1.bf16.msra.mxu1 %v6436_v2 }
 0x24c   :  { %1307 = vmatprep.subr.bf16.mxu0 %v6438_v3  ;;  %1348 = vmatprep.subr.bf16.mxu1 %v6442_v4 }
 0x24d   :  { %1337 = vmatprep.mubr.bf16.mxu0 %v7159_v62  ;;  %1378 = vmatprep.mubr.bf16.mxu1 %v7159_v62 }
 0x24f   :  { %1308 = vmatpush1.bf16.msra.mxu0 %v6447_v6  ;;  %1349 = vmatpush1.bf16.msra.mxu1 %v6451_v7 }
 0x250   :  { %1309 = vmatprep.subr.bf16.mxu0 %v6455_v8  ;;  %1350 = vmatprep.subr.bf16.mxu1 %v6457_v9 }
 0x253   :  { %1310 = vmatpush1.bf16.msra.mxu0 %v6466_v11  ;;  %1351 = vmatpush1.bf16.msra.mxu1 %v6468_v12 }
 0x254   :  { %1311 = vmatprep.subr.bf16.mxu0 %v6472_v13  ;;  %1352 = vmatprep.subr.bf16.mxu1 %v6474_v14 }
 0x257   :  { %1312 = vmatpush1.bf16.msra.mxu0 %v6481_v16  ;;  %1353 = vmatpush1.bf16.msra.mxu1 %v6483_v17 }
 0x258   :  { %1313 = vmatprep.subr.bf16.mxu0 %v6487_v18  ;;  %1354 = vmatprep.subr.bf16.mxu1 %v6489_v19 }
 0x25b   :  { %1314 = vmatpush1.bf16.msra.mxu0 %v6498_v21  ;;  %1355 = vmatpush1.bf16.msra.mxu1 %v6500_v22 }
 0x25c   :  { %1315 = vmatprep.subr.bf16.mxu0 %v6504_v23  ;;  %1356 = vmatprep.subr.bf16.mxu1 %v6506_v24 }
 0x25f   :  { %1316 = vmatpush1.bf16.msra.mxu0 %v6513_v26  ;;  %1357 = vmatpush1.bf16.msra.mxu1 %v6515_v27 }
 0x260   :  { %1317 = vmatprep.subr.bf16.mxu0 %v6519_v28  ;;  %1358 = vmatprep.subr.bf16.mxu1 %v6521_v29 }
 0x263   :  { %1318 = vmatpush1.bf16.msra.mxu0 %v6530_v31  ;;  %1359 = vmatpush1.bf16.msra.mxu1 %v6532_v32 }
 0x264   :  { %1319 = vmatprep.subr.bf16.mxu0 %v6536_v33  ;;  %1360 = vmatprep.subr.bf16.mxu1 %v6538_v34 }
 0x267   :  { %1320 = vmatpush1.bf16.msra.mxu0 %v6542_v35  ;;  %1361 = vmatpush1.bf16.msra.mxu1 %v6544_v36 }
 0x268   :  { %1416 = vmatprep.subr.bf16.mxu0 %v6427_v60  ;;  %1457 = vmatprep.subr.bf16.mxu1 %v6429_v63 }
 0x31d   :  { %v1228_v58 = vpop.f32.mrb[20].mxu0  ;;  %v1269_v40 = vpop.f32.mrb[20].mxu1 }
 0x31e   :  { %v1276_v39 = vadd.f32 %v1228_v58, %v6610_v55  ;;  %v1278_v56 = vadd.f32 %v1269_v40, %v6613_v57  ;;  %v1230_v0 = vpop.f32.mrb[21].mxu0  ;;  %v1271_v20 = vpop.f32.mrb[21].mxu1 }
 0x31f   :  { %v1277_v46 = vadd.f32 %v1230_v0, %v6615_v59  ;;  %v1279_v45 = vadd.f32 %v1271_v20, %v6618_v61  ;;  %v1232_v47 = vpop.f32.mrb[22].mxu0  ;;  %v1273_v49 = vpop.f32.mrb[22].mxu1 }
 0x320   :  { %v4962_v48 = vmul.f32 -1.442695, %v1276_v39  ;;  %v1233_v50 = vpop.f32.mrb[23].mxu0  ;;  %v1274_v37 = vpop.f32.mrb[23].mxu1 }
 0x321   :  { %v4963_v42 = vmul.f32 -1.442695, %v1277_v46  ;;  %v4964_v51 = vmul.f32 -1.442695, %v1279_v45 }
 0x322   :  { %5419 = vpow2.f32 %v4962_v48  ;;  %v7160_v48 = vld [vmem:[#allocation49_spill] sm:$0xff] }
 0x323   :  { %5421 = vpow2.f32 %v4963_v42 }
 0x324   :  { %5423 = vpow2.f32 %v4964_v51 }
 0x325   :  { %5425 = vtanh.f32 %v1278_v56 }
 0x32c   :  { %v5420_v44 = vpop.eup %5419 }
 0x32d   :  { %v5422_v52 = vpop.eup %5421  ;;  %v1283_v55 = vadd.f32 1.0, %v5420_v44 }
 0x32e   :  { %v1289_v57 = vadd.f32 1.0, %v5422_v52  ;;  %v5424_v59 = vpop.eup %5423 }
 0x32f   :  { %5427 = vrcp.f32 %v1283_v55  ;;  %v5426_v43 = vpop.eup %5425  ;;  %v1296_v30 = vadd.f32 1.0, %v5424_v59 }
 0x330   :  { %5429 = vrcp.f32 %v1289_v57 }
 0x331   :  { %5431 = vrcp.f32 %v1296_v30 }
 0x339   :  { %v5428_v61 = vpop.eup %5427 }
 0x33a   :  { %v5430_v10 = vpop.eup %5429  ;;  %v1300_v54 = vmul.f32 %v5428_v61, %v5426_v43 }
 0x33b   :  { %v1299_v53 = vmul.f32 %v5430_v10, %v6684_v38  ;;  %v5432_v58 = vpop.eup %5431 }
 0x33d   :  { %v6726_v41 = vadd.f32 %v1300_v54, %v1299_v53 }
 0x33f   :  { %5433 = vtanh.f32 %v6726_v41 }
 0x349   :  { %v5434_v40 = vpop.eup %5433 }
 0x34a   :  { %v1303_v39 = vmul.f32 %v5434_v40, %v5432_v58 }
 0x34c   :  { %v1304_v56 = vpack.c.bf16 %v1303_v39, %v1303_v39 }
 0x34e   :  { %1338 = vmatmul.mubr.bf16.vlgmr.msra.gmra.mrb[24].mxu0 %v1304_v56  ;;  %1379 = vmatmul.mubr.bf16.vlgmr.msra.gmra.mrb[24].mxu1 %v1304_v56 }
 0x34f   :  { %1417 = vmatpush1.bf16.msra.mxu0 %v6434_v1  ;;  %1458 = vmatpush1.bf16.msra.mxu1 %v6436_v2 }
 0x350   :  { %1418 = vmatprep.subr.bf16.mxu0 %v6438_v3  ;;  %1459 = vmatprep.subr.bf16.mxu1 %v6442_v4 }
 0x351   :  { %1448 = vmatprep.mubr.bf16.mxu0 %v7159_v62  ;;  %1489 = vmatprep.mubr.bf16.mxu1 %v7159_v62 }
 0x353   :  { %1419 = vmatpush1.bf16.msra.mxu0 %v6447_v6  ;;  %1460 = vmatpush1.bf16.msra.mxu1 %v6451_v7 }
 0x354   :  { %1420 = vmatprep.subr.bf16.mxu0 %v6455_v8  ;;  %1461 = vmatprep.subr.bf16.mxu1 %v6457_v9 }
 0x357   :  { %1421 = vmatpush1.bf16.msra.mxu0 %v6466_v11  ;;  %1462 = vmatpush1.bf16.msra.mxu1 %v6468_v12 }
 0x358   :  { %1422 = vmatprep.subr.bf16.mxu0 %v6472_v13  ;;  %1463 = vmatprep.subr.bf16.mxu1 %v6474_v14 }
 0x35b   :  { %1423 = vmatpush1.bf16.msra.mxu0 %v6481_v16  ;;  %1464 = vmatpush1.bf16.msra.mxu1 %v6483_v17 }
 0x35c   :  { %1424 = vmatprep.subr.bf16.mxu0 %v6487_v18  ;;  %1465 = vmatprep.subr.bf16.mxu1 %v6489_v19 }
 0x35f   :  { %1425 = vmatpush1.bf16.msra.mxu0 %v6498_v21  ;;  %1466 = vmatpush1.bf16.msra.mxu1 %v6500_v22 }
 0x360   :  { %1426 = vmatprep.subr.bf16.mxu0 %v6504_v23  ;;  %1467 = vmatprep.subr.bf16.mxu1 %v6506_v24 }
 0x363   :  { %1427 = vmatpush1.bf16.msra.mxu0 %v6513_v26  ;;  %1468 = vmatpush1.bf16.msra.mxu1 %v6515_v27 }
 0x364   :  { %1428 = vmatprep.subr.bf16.mxu0 %v6519_v28  ;;  %1469 = vmatprep.subr.bf16.mxu1 %v6521_v29 }
 0x367   :  { %1429 = vmatpush1.bf16.msra.mxu0 %v6530_v31  ;;  %1470 = vmatpush1.bf16.msra.mxu1 %v6532_v32 }
 0x368   :  { %1430 = vmatprep.subr.bf16.mxu0 %v6536_v33  ;;  %1471 = vmatprep.subr.bf16.mxu1 %v6538_v34 }
 0x36b   :  { %1431 = vmatpush1.bf16.msra.mxu0 %v6542_v35  ;;  %1472 = vmatpush1.bf16.msra.mxu1 %v6544_v36 }
 0x36c   :  { %1527 = vmatprep.subr.bf16.mxu0 %v6427_v60  ;;  %1568 = vmatprep.subr.bf16.mxu1 %v6429_v63 }
 0x421   :  { %v1339_v38 = vpop.f32.mrb[24].mxu0  ;;  %v1380_v0 = vpop.f32.mrb[24].mxu1 }
 0x422   :  { %v1387_v20 = vadd.f32 %v1339_v38, %v6620_v5  ;;  %v1389_v46 = vadd.f32 %v1380_v0, %v6623_v15  ;;  %v1341_v45 = vpop.f32.mrb[25].mxu0  ;;  %v1382_v47 = vpop.f32.mrb[25].mxu1 }
 0x423   :  { %v1388_v49 = vadd.f32 %v1341_v45, %v6625_v25  ;;  %v1390_v50 = vadd.f32 %v1382_v47, %v7160_v48  ;;  %v1343_v37 = vpop.f32.mrb[26].mxu0  ;;  %v1384_v42 = vpop.f32.mrb[26].mxu1  ;;  %v7162_v47 = vld [vmem:[#allocation51_spill] sm:$0xff] }
 0x424   :  { %v4965_v51 = vmul.f32 -1.442695, %v1387_v20  ;;  %v1344_v44 = vpop.f32.mrb[27].mxu0  ;;  %v1385_v52 = vpop.f32.mrb[27].mxu1  ;;  %v7163_v37 = vld [vmem:[#allocation52_spill] sm:$0xff] }
 0x425   :  { %v4966_v55 = vmul.f32 -1.442695, %v1388_v49  ;;  %v4967_v57 = vmul.f32 -1.442695, %v1390_v50 }
 0x426   :  { %5435 = vpow2.f32 %v4965_v51  ;;  %v7164_v51 = vld [vmem:[#allocation53_spill] sm:$0xff] }
 0x427   :  { %5437 = vpow2.f32 %v4966_v55 }
 0x428   :  { %5439 = vpow2.f32 %v4967_v57 }
 0x429   :  { %5441 = vtanh.f32 %v1389_v46  ;;  %v7161_v46 = vld [vmem:[#allocation50_spill] sm:$0xff] }
 0x430   :  { %v5436_v59 = vpop.eup %5435 }
 0x431   :  { %v5438_v43 = vpop.eup %5437  ;;  %v1394_v5 = vadd.f32 1.0, %v5436_v59 }
 0x432   :  { %v1400_v15 = vadd.f32 1.0, %v5438_v43  ;;  %v5440_v25 = vpop.eup %5439 }
 0x433   :  { %5443 = vrcp.f32 %v1394_v5  ;;  %v5442_v61 = vpop.eup %5441  ;;  %v1407_v53 = vadd.f32 1.0, %v5440_v25 }
 0x434   :  { %5445 = vrcp.f32 %v1400_v15 }
 0x435   :  { %5447 = vrcp.f32 %v1407_v53 }
 0x43d   :  { %v5444_v10 = vpop.eup %5443 }
 0x43e   :  { %v5446_v54 = vpop.eup %5445  ;;  %v1411_v30 = vmul.f32 %v5444_v10, %v5442_v61 }
 0x43f   :  { %v1410_v58 = vmul.f32 %v5446_v54, %v6726_v41  ;;  %v5448_v39 = vpop.eup %5447 }
 0x441   :  { %v6768_v40 = vadd.f32 %v1411_v30, %v1410_v58 }
 0x443   :  { %5449 = vtanh.f32 %v6768_v40 }
 0x44d   :  { %v5450_v56 = vpop.eup %5449 }
 0x44e   :  { %v1414_v38 = vmul.f32 %v5450_v56, %v5448_v39 }
 0x450   :  { %v1415_v0 = vpack.c.bf16 %v1414_v38, %v1414_v38 }
 0x452   :  { %1449 = vmatmul.mubr.bf16.vlgmr.msra.gmra.mrb[28].mxu0 %v1415_v0  ;;  %1490 = vmatmul.mubr.bf16.vlgmr.msra.gmra.mrb[28].mxu1 %v1415_v0 }
 0x453   :  { %1528 = vmatpush1.bf16.msra.mxu0 %v6434_v1  ;;  %1569 = vmatpush1.bf16.msra.mxu1 %v6436_v2 }
 0x454   :  { %1529 = vmatprep.subr.bf16.mxu0 %v6438_v3  ;;  %1570 = vmatprep.subr.bf16.mxu1 %v6442_v4 }
 0x455   :  { %1559 = vmatprep.mubr.bf16.mxu0 %v7159_v62  ;;  %1600 = vmatprep.mubr.bf16.mxu1 %v7159_v62 }
 0x457   :  { %1530 = vmatpush1.bf16.msra.mxu0 %v6447_v6  ;;  %1571 = vmatpush1.bf16.msra.mxu1 %v6451_v7 }
 0x458   :  { %1531 = vmatprep.subr.bf16.mxu0 %v6455_v8  ;;  %1572 = vmatprep.subr.bf16.mxu1 %v6457_v9 }
 0x45b   :  { %1532 = vmatpush1.bf16.msra.mxu0 %v6466_v11  ;;  %1573 = vmatpush1.bf16.msra.mxu1 %v6468_v12 }
 0x45c   :  { %1533 = vmatprep.subr.bf16.mxu0 %v6472_v13  ;;  %1574 = vmatprep.subr.bf16.mxu1 %v6474_v14 }
 0x45f   :  { %1534 = vmatpush1.bf16.msra.mxu0 %v6481_v16  ;;  %1575 = vmatpush1.bf16.msra.mxu1 %v6483_v17 }
 0x460   :  { %1535 = vmatprep.subr.bf16.mxu0 %v6487_v18  ;;  %1576 = vmatprep.subr.bf16.mxu1 %v6489_v19 }
 0x463   :  { %1536 = vmatpush1.bf16.msra.mxu0 %v6498_v21  ;;  %1577 = vmatpush1.bf16.msra.mxu1 %v6500_v22 }
 0x464   :  { %1537 = vmatprep.subr.bf16.mxu0 %v6504_v23  ;;  %1578 = vmatprep.subr.bf16.mxu1 %v6506_v24 }
 0x467   :  { %1538 = vmatpush1.bf16.msra.mxu0 %v6513_v26  ;;  %1579 = vmatpush1.bf16.msra.mxu1 %v6515_v27 }
 0x468   :  { %1539 = vmatprep.subr.bf16.mxu0 %v6519_v28  ;;  %1580 = vmatprep.subr.bf16.mxu1 %v6521_v29 }
 0x46b   :  { %1540 = vmatpush1.bf16.msra.mxu0 %v6530_v31  ;;  %1581 = vmatpush1.bf16.msra.mxu1 %v6532_v32 }
 0x46c   :  { %1541 = vmatprep.subr.bf16.mxu0 %v6536_v33  ;;  %1582 = vmatprep.subr.bf16.mxu1 %v6538_v34 }
 0x46f   :  { %1542 = vmatpush1.bf16.msra.mxu0 %v6542_v35  ;;  %1583 = vmatpush1.bf16.msra.mxu1 %v6544_v36 }
 0x470   :  { %1638 = vmatprep.subr.bf16.mxu0 %v6427_v60  ;;  %1679 = vmatprep.subr.bf16.mxu1 %v6429_v63 }
 0x525   :  { %v1450_v41 = vpop.f32.mrb[28].mxu0  ;;  %v1491_v20 = vpop.f32.mrb[28].mxu1 }
 0x526   :  { %v1498_v45 = vadd.f32 %v1450_v41, %v7161_v46  ;;  %v1500_v49 = vadd.f32 %v1491_v20, %v7162_v47  ;;  %v1452_v48 = vpop.f32.mrb[29].mxu0  ;;  %v1493_v50 = vpop.f32.mrb[29].mxu1 }
 0x527   :  { %v1499_v42 = vadd.f32 %v1452_v48, %v7163_v37  ;;  %v1501_v44 = vadd.f32 %v1493_v50, %v7164_v51  ;;  %v1454_v52 = vpop.f32.mrb[30].mxu0  ;;  %v1495_v55 = vpop.f32.mrb[30].mxu1 }
 0x528   :  { %v4968_v57 = vmul.f32 -1.442695, %v1498_v45  ;;  %v1455_v59 = vpop.f32.mrb[31].mxu0  ;;  %v1496_v43 = vpop.f32.mrb[31].mxu1 }
 0x529   :  { %v4969_v60 = vmul.f32 -1.442695, %v1499_v42  ;;  %v4970_v63 = vmul.f32 -1.442695, %v1501_v44 }
 0x52a   :  { %5451 = vpow2.f32 %v4968_v57 }
 0x52b   :  { %5453 = vpow2.f32 %v4969_v60 }
 0x52c   :  { %5455 = vpow2.f32 %v4970_v63 }
 0x52d   :  { %5457 = vtanh.f32 %v1500_v49 }
 0x534   :  { %v5452_v5 = vpop.eup %5451 }
 0x535   :  { %v5454_v15 = vpop.eup %5453  ;;  %v1505_v25 = vadd.f32 1.0, %v5452_v5 }
 0x536   :  { %v1511_v61 = vadd.f32 1.0, %v5454_v15  ;;  %v5456_v10 = vpop.eup %5455 }
 0x537   :  { %5459 = vrcp.f32 %v1505_v25  ;;  %v5458_v54 = vpop.eup %5457  ;;  %v1518_v39 = vadd.f32 1.0, %v5456_v10  ;;  %v6859_v25 = vld [vmem:[#allocation8] ss:$16 sps:$4 sm:$0xff]   ;;  %v6865_v10 = vld [vmem:[#allocation8 + $0x24] ss:$16 sps:$4 sm:$0xff]  }
 0x538   :  { %5461 = vrcp.f32 %v1511_v61  ;;  %v6862_v61 = vld [vmem:[#allocation8 + $0x8] ss:$16 sps:$4 sm:$0xff]  }
 0x539   :  { %5463 = vrcp.f32 %v1518_v39  ;;  %v6882_v39 = vld [vmem:[#allocation8 + $0x4c] ss:$16 sps:$4 sm:$0xff]  }
 0x541   :  { %v5460_v30 = vpop.eup %5459 }
 0x542   :  { %v5462_v53 = vpop.eup %5461  ;;  %v1522_v58 = vmul.f32 %v5460_v30, %v5458_v54  ;;  %v6868_v54 = vld [vmem:[#allocation8 + $0x2c] ss:$16 sps:$4 sm:$0xff]   ;;  %v6873_v30 = vld [vmem:[#allocation8 + $0x20] ss:$16 sps:$4 sm:$0xff]  }
 0x543   :  { %v1521_v56 = vmul.f32 %v5462_v53, %v6768_v40  ;;  %v5464_v0 = vpop.eup %5463  ;;  %v6876_v53 = vld [vmem:[#allocation8 + $0x28] ss:$16 sps:$4 sm:$0xff]  }
 0x545   :  { %v6810_v38 = vadd.f32 %v1522_v58, %v1521_v56  ;;  %v6879_v58 = vld [vmem:[#allocation8 + $0x44] ss:$16 sps:$4 sm:$0xff]   ;;  %v6885_v56 = vld [vmem:[#allocation8 + $0x40] ss:$16 sps:$4 sm:$0xff]  }
 0x547   :  { %5465 = vtanh.f32 %v6810_v38 }
 0x551   :  { %v5466_v41 = vpop.eup %5465 }
 0x552   :  { %v1525_v20 = vmul.f32 %v5466_v41, %v5464_v0  ;;  %v6891_v0 = vld [vmem:[#allocation8 + $0x64] ss:$16 sps:$4 sm:$0xff]   ;;  %v6894_v41 = vld [vmem:[#allocation8 + $0x6c] ss:$16 sps:$4 sm:$0xff]  }
 0x554   :  { %v1526_v46 = vpack.c.bf16 %v1525_v20, %v1525_v20  ;;  %v6897_v20 = vld [vmem:[#allocation8 + $0x60] ss:$16 sps:$4 sm:$0xff]  }
 0x556   :  { %1560 = vmatmul.mubr.bf16.vlgmr.msra.gmra.mrb[32].mxu0 %v1526_v46  ;;  %1601 = vmatmul.mubr.bf16.vlgmr.msra.gmra.mrb[32].mxu1 %v1526_v46  ;;  %v6900_v46 = vld [vmem:[#allocation8 + $0x68] ss:$16 sps:$4 sm:$0xff]  }
 0x557   :  { %1639 = vmatpush1.bf16.msra.mxu0 %v6434_v1  ;;  %1680 = vmatpush1.bf16.msra.mxu1 %v6436_v2  ;;  %v6845_v1 = vld [vmem:[#allocation8 + $0x4] ss:$16 sps:$4 sm:$0xff]   ;;  %v6848_v2 = vld [vmem:[#allocation8 + $0xc] ss:$16 sps:$4 sm:$0xff]  }
 0x558   :  { %1640 = vmatprep.subr.bf16.mxu0 %v6438_v3  ;;  %1681 = vmatprep.subr.bf16.mxu1 %v6442_v4 }
 0x559   :  { %1670 = vmatprep.mubr.bf16.mxu0 %v7159_v62  ;;  %1711 = vmatprep.mubr.bf16.mxu1 %v7159_v62 }
 0x55b   :  { %1641 = vmatpush1.bf16.msra.mxu0 %v6447_v6  ;;  %1682 = vmatpush1.bf16.msra.mxu1 %v6451_v7  ;;  %v7165_v6 = vld [vmem:[#allocation54_spill] sm:$0xff] }
 0x55c   :  { %1642 = vmatprep.subr.bf16.mxu0 %v6455_v8  ;;  %1683 = vmatprep.subr.bf16.mxu1 %v6457_v9  ;;  %v7166_v8 = vld [vmem:[#allocation55_spill] sm:$0xff] }
 0x55f   :  { %1643 = vmatpush1.bf16.msra.mxu0 %v6466_v11  ;;  %1684 = vmatpush1.bf16.msra.mxu1 %v6468_v12 }
 0x560   :  { %1644 = vmatprep.subr.bf16.mxu0 %v6472_v13  ;;  %1685 = vmatprep.subr.bf16.mxu1 %v6474_v14  ;;  %v7167_v13 = vld [vmem:[#allocation56_spill] sm:$0xff] }
 0x563   :  { %1645 = vmatpush1.bf16.msra.mxu0 %v6481_v16  ;;  %1686 = vmatpush1.bf16.msra.mxu1 %v6483_v17  ;;  %v7168_v16 = vld [vmem:[#allocation57_spill] sm:$0xff] }
 0x564   :  { %1646 = vmatprep.subr.bf16.mxu0 %v6487_v18  ;;  %1687 = vmatprep.subr.bf16.mxu1 %v6489_v19 }
 0x567   :  { %1647 = vmatpush1.bf16.msra.mxu0 %v6498_v21  ;;  %1688 = vmatpush1.bf16.msra.mxu1 %v6500_v22 }
 0x568   :  { %1648 = vmatprep.subr.bf16.mxu0 %v6504_v23  ;;  %1689 = vmatprep.subr.bf16.mxu1 %v6506_v24 }
 0x56b   :  { %1649 = vmatpush1.bf16.msra.mxu0 %v6513_v26  ;;  %1690 = vmatpush1.bf16.msra.mxu1 %v6515_v27 }
 0x56c   :  { %1650 = vmatprep.subr.bf16.mxu0 %v6519_v28  ;;  %1691 = vmatprep.subr.bf16.mxu1 %v6521_v29 }
 0x56f   :  { %1651 = vmatpush1.bf16.msra.mxu0 %v6530_v31  ;;  %1692 = vmatpush1.bf16.msra.mxu1 %v6532_v32 }
 0x570   :  { %1652 = vmatprep.subr.bf16.mxu0 %v6536_v33  ;;  %1693 = vmatprep.subr.bf16.mxu1 %v6538_v34 }
 0x573   :  { %1653 = vmatpush1.bf16.msra.mxu0 %v6542_v35  ;;  %1694 = vmatpush1.bf16.msra.mxu1 %v6544_v36 }
 0x574   :  { %1749 = vmatprep.subr.bf16.mxu0 %v6845_v1  ;;  %1790 = vmatprep.subr.bf16.mxu1 %v6848_v2 }
 0x629   :  { %v1561_v3 = vpop.f32.mrb[32].mxu0  ;;  %v1602_v4 = vpop.f32.mrb[32].mxu1 }
 0x62a   :  { %v1609_v7 = vadd.f32 %v1561_v3, %v7165_v6  ;;  %v1611_v9 = vadd.f32 %v1602_v4, %v7166_v8  ;;  %v1563_v11 = vpop.f32.mrb[33].mxu0  ;;  %v1604_v12 = vpop.f32.mrb[33].mxu1  ;;  %v6903_v3 = vld [vmem:[#allocation8 + $0x84] ss:$16 sps:$4 sm:$0xff]   ;;  %v6906_v4 = vld [vmem:[#allocation8 + $0x8c] ss:$16 sps:$4 sm:$0xff]  }
 0x62b   :  { %v1610_v14 = vadd.f32 %v1563_v11, %v7167_v13  ;;  %v1612_v17 = vadd.f32 %v1604_v12, %v7168_v16  ;;  %v1565_v18 = vpop.f32.mrb[34].mxu0  ;;  %v1606_v19 = vpop.f32.mrb[34].mxu1  ;;  %v6909_v6 = vld [vmem:[#allocation8 + $0x80] ss:$16 sps:$4 sm:$0xff]   ;;  %v7171_v8 = vld [vmem:[#allocation60_spill] sm:$0xff] }
 0x62c   :  { %v4971_v21 = vmul.f32 -1.442695, %v1609_v7  ;;  %v1566_v22 = vpop.f32.mrb[35].mxu0  ;;  %v1607_v40 = vpop.f32.mrb[35].mxu1  ;;  %v6912_v7 = vld [vmem:[#allocation8 + $0x88] ss:$16 sps:$4 sm:$0xff]  }
 0x62d   :  { %v4972_v45 = vmul.f32 -1.442695, %v1610_v14  ;;  %v4973_v47 = vmul.f32 -1.442695, %v1612_v17 }
 0x62e   :  { %5467 = vpow2.f32 %v4971_v21 }
 0x62f   :  { %5469 = vpow2.f32 %v4972_v45 }
 0x630   :  { %5471 = vpow2.f32 %v4973_v47 }
 0x631   :  { %5473 = vtanh.f32 %v1611_v9  ;;  %v7172_v9 = vld [vmem:[#allocation61_spill] sm:$0xff] }
 0x638   :  { %v5468_v49 = vpop.eup %5467 }
 0x639   :  { %v5470_v48 = vpop.eup %5469  ;;  %v1616_v50 = vadd.f32 1.0, %v5468_v49 }
 0x63a   :  { %v1622_v37 = vadd.f32 1.0, %v5470_v48  ;;  %v5472_v42 = vpop.eup %5471 }
 0x63b   :  { %5475 = vrcp.f32 %v1616_v50  ;;  %v5474_v51 = vpop.eup %5473  ;;  %v1629_v57 = vadd.f32 1.0, %v5472_v42 }
 0x63c   :  { %5477 = vrcp.f32 %v1622_v37 }
 0x63d   :  { %5479 = vrcp.f32 %v1629_v57  ;;  %v5554_v57 = vld [vmem:[#allocation8 + $0xa8] ss:$16 sps:$4 sm:$0xff]  }
 0x645   :  { %v5476_v44 = vpop.eup %5475 }
 0x646   :  { %v5478_v52 = vpop.eup %5477  ;;  %v1633_v55 = vmul.f32 %v5476_v44, %v5474_v51  ;;  %v5551_v44 = vld [vmem:[#allocation8 + $0xa4] ss:$16 sps:$4 sm:$0xff]  }
 0x647   :  { %v1632_v59 = vmul.f32 %v5478_v52, %v6810_v38  ;;  %v5480_v60 = vpop.eup %5479  ;;  %v6888_v38 = vld [vmem:[#allocation8 + $0x48] ss:$16 sps:$4 sm:$0xff]   ;;  %v5552_v52 = vld [vmem:[#allocation8 + $0xac] ss:$16 sps:$4 sm:$0xff]  }
 0x649   :  { %v6856_v43 = vadd.f32 %v1633_v55, %v1632_v59  ;;  %v5553_v55 = vld [vmem:[#allocation8 + $0xa0] ss:$16 sps:$4 sm:$0xff]   ;;  %v5555_v59 = vld [vmem:[#allocation8 + $0xc4] ss:$16 sps:$4 sm:$0xff]  }
 0x64b   :  { %5481 = vtanh.f32 %v6856_v43 }
 0x655   :  { %v5482_v63 = vpop.eup %5481 }
 0x656   :  { %v1636_v5 = vmul.f32 %v5482_v63, %v5480_v60  ;;  %v5557_v60 = vld [vmem:[#allocation8 + $0xc0] ss:$16 sps:$4 sm:$0xff]   ;;  %v5558_v63 = vld [vmem:[#allocation8 + $0xc8] ss:$16 sps:$4 sm:$0xff]  }
 0x658   :  { %v1637_v15 = vpack.c.bf16 %v1636_v5, %v1636_v5  ;;  %v5559_v5 = vld [vmem:[#allocation8 + $0xe4] ss:$16 sps:$4 sm:$0xff]  }
 0x65a   :  { %1671 = vmatmul.mubr.bf16.vlgmr.msra.gmra.mrb[36].mxu0 %v1637_v15  ;;  %1712 = vmatmul.mubr.bf16.vlgmr.msra.gmra.mrb[36].mxu1 %v1637_v15  ;;  %v5560_v15 = vld [vmem:[#allocation8 + $0xec] ss:$16 sps:$4 sm:$0xff]  }
 0x65b   :  { %1750 = vmatpush1.bf16.msra.mxu0 %v6859_v25  ;;  %1791 = vmatpush1.bf16.msra.mxu1 %v6862_v61 }
 0x65c   :  { %1751 = vmatprep.subr.bf16.mxu0 %v6865_v10  ;;  %1792 = vmatprep.subr.bf16.mxu1 %v6868_v54 }
 0x65d   :  { %1781 = vmatprep.mubr.bf16.mxu0 %v7159_v62  ;;  %1822 = vmatprep.mubr.bf16.mxu1 %v7159_v62 }
 0x65f   :  { %1752 = vmatpush1.bf16.msra.mxu0 %v6873_v30  ;;  %1793 = vmatpush1.bf16.msra.mxu1 %v6876_v53 }
 0x660   :  { %1753 = vmatprep.subr.bf16.mxu0 %v6879_v58  ;;  %1794 = vmatprep.subr.bf16.mxu1 %v6882_v39 }
 0x663   :  { %1754 = vmatpush1.bf16.msra.mxu0 %v6885_v56  ;;  %1795 = vmatpush1.bf16.msra.mxu1 %v6888_v38 }
 0x664   :  { %1755 = vmatprep.subr.bf16.mxu0 %v6891_v0  ;;  %1796 = vmatprep.subr.bf16.mxu1 %v6894_v41 }
 0x667   :  { %1756 = vmatpush1.bf16.msra.mxu0 %v6897_v20  ;;  %1797 = vmatpush1.bf16.msra.mxu1 %v6900_v46 }
 0x668   :  { %1757 = vmatprep.subr.bf16.mxu0 %v6903_v3  ;;  %1798 = vmatprep.subr.bf16.mxu1 %v6906_v4 }
 0x66b   :  { %1758 = vmatpush1.bf16.msra.mxu0 %v6909_v6  ;;  %1799 = vmatpush1.bf16.msra.mxu1 %v6912_v7 }
 0x66c   :  { %1759 = vmatprep.subr.bf16.mxu0 %v6504_v23  ;;  %1800 = vmatprep.subr.bf16.mxu1 %v6506_v24 }
 0x66f   :  { %1760 = vmatpush1.bf16.msra.mxu0 %v6513_v26  ;;  %1801 = vmatpush1.bf16.msra.mxu1 %v6515_v27  ;;  %v7169_v26 = vld [vmem:[#allocation58_spill] sm:$0xff] }
 0x670   :  { %1761 = vmatprep.subr.bf16.mxu0 %v6519_v28  ;;  %1802 = vmatprep.subr.bf16.mxu1 %v6521_v29  ;;  %v7170_v28 = vld [vmem:[#allocation59_spill] sm:$0xff] }
 0x673   :  { %1762 = vmatpush1.bf16.msra.mxu0 %v6530_v31  ;;  %1803 = vmatpush1.bf16.msra.mxu1 %v6532_v32 }
 0x674   :  { %1763 = vmatprep.subr.bf16.mxu0 %v6536_v33  ;;  %1804 = vmatprep.subr.bf16.mxu1 %v6538_v34 }
 0x677   :  { %1764 = vmatpush1.bf16.msra.mxu0 %v6542_v35  ;;  %1805 = vmatpush1.bf16.msra.mxu1 %v6544_v36 }
 0x678   :  { %1860 = vmatprep.subr.bf16.mxu0 %v6845_v1  ;;  %1901 = vmatprep.subr.bf16.mxu1 %v6848_v2 }
 0x72d   :  { %v1672_v23 = vpop.f32.mrb[36].mxu0  ;;  %v1713_v24 = vpop.f32.mrb[36].mxu1 }
 0x72e   :  { %v1720_v27 = vadd.f32 %v1672_v23, %v7169_v26  ;;  %v1722_v29 = vadd.f32 %v1713_v24, %v7170_v28  ;;  %v1674_v31 = vpop.f32.mrb[37].mxu0  ;;  %v1715_v32 = vpop.f32.mrb[37].mxu1 }
 0x72f   :  { %v1721_v33 = vadd.f32 %v1674_v31, %v7171_v8  ;;  %v1723_v34 = vadd.f32 %v1715_v32, %v7172_v9  ;;  %v1676_v11 = vpop.f32.mrb[38].mxu0  ;;  %v1717_v35 = vpop.f32.mrb[38].mxu1 }
 0x730   :  { %v4974_v12 = vmul.f32 -1.442695, %v1720_v27  ;;  %v1677_v36 = vpop.f32.mrb[39].mxu0  ;;  %v1718_v13 = vpop.f32.mrb[39].mxu1 }
 0x731   :  { %v4975_v1 = vmul.f32 -1.442695, %v1721_v33  ;;  %v4976_v2 = vmul.f32 -1.442695, %v1723_v34 }
 0x732   :  { %5483 = vpow2.f32 %v4974_v12 }
 0x733   :  { %5485 = vpow2.f32 %v4975_v1 }
 0x734   :  { %5487 = vpow2.f32 %v4976_v2 }
 0x735   :  { %5489 = vtanh.f32 %v1722_v29 }
 0x73c   :  { %v5484_v14 = vpop.eup %5483 }
 0x73d   :  { %v5486_v16 = vpop.eup %5485  ;;  %v1727_v17 = vadd.f32 1.0, %v5484_v14 }
 0x73e   :  { %v1733_v18 = vadd.f32 1.0, %v5486_v16  ;;  %v5488_v19 = vpop.eup %5487 }
 0x73f   :  { %5491 = vrcp.f32 %v1727_v17  ;;  %v5490_v21 = vpop.eup %5489  ;;  %v1740_v47 = vadd.f32 1.0, %v5488_v19  ;;  %v7177_v17 = vld [vmem:[#allocation66_spill] sm:$0xff]  ;;  %v7178_v19 = vld [vmem:[#allocation67_spill] sm:$0xff] }
 0x740   :  { %5493 = vrcp.f32 %v1733_v18 }
 0x741   :  { %5495 = vrcp.f32 %v1740_v47 }
 0x749   :  { %v5492_v22 = vpop.eup %5491 }
 0x74a   :  { %v5494_v40 = vpop.eup %5493  ;;  %v1744_v45 = vmul.f32 %v5492_v22, %v5490_v21 }
 0x74b   :  { %v1743_v49 = vmul.f32 %v5494_v40, %v6856_v43  ;;  %v5496_v50 = vpop.eup %5495  ;;  %v5556_v43 = vld [vmem:[#allocation8 + $0xcc] ss:$16 sps:$4 sm:$0xff]  }
 0x74d   :  { %v6934_v48 = vadd.f32 %v1744_v45, %v1743_v49  ;;  %v7179_v45 = vld [vmem:[#allocation68_spill] sm:$0xff]  ;;  %v7180_v49 = vld [vmem:[#allocation69_spill] sm:$0xff] }
 0x74f   :  { %5497 = vtanh.f32 %v6934_v48 }
 0x759   :  { %v5498_v37 = vpop.eup %5497 }
 0x75a   :  { %v1747_v42 = vmul.f32 %v5498_v37, %v5496_v50 }
 0x75c   :  { %v1748_v51 = vpack.c.bf16 %v1747_v42, %v1747_v42 }
 0x75e   :  { %1782 = vmatmul.mubr.bf16.vlgmr.msra.gmra.mrb[40].mxu0 %v1748_v51  ;;  %1823 = vmatmul.mubr.bf16.vlgmr.msra.gmra.mrb[40].mxu1 %v1748_v51 }
 0x75f   :  { %1861 = vmatpush1.bf16.msra.mxu0 %v6859_v25  ;;  %1902 = vmatpush1.bf16.msra.mxu1 %v6862_v61  ;;  %v5561_v25 = vld [vmem:[#allocation8 + $0xe0] ss:$16 sps:$4 sm:$0xff]   ;;  %v5562_v61 = vld [vmem:[#allocation8 + $0xe8] ss:$16 sps:$4 sm:$0xff]  }
 0x760   :  { %1862 = vmatprep.subr.bf16.mxu0 %v6865_v10  ;;  %1903 = vmatprep.subr.bf16.mxu1 %v6868_v54 }
 0x761   :  { %1892 = vmatprep.mubr.bf16.mxu0 %v7159_v62  ;;  %1933 = vmatprep.mubr.bf16.mxu1 %v7159_v62 }
 0x763   :  { %1863 = vmatpush1.bf16.msra.mxu0 %v6873_v30  ;;  %1904 = vmatpush1.bf16.msra.mxu1 %v6876_v53  ;;  %v7173_v30 = vld [vmem:[#allocation62_spill] sm:$0xff] }
 0x764   :  { %1864 = vmatprep.subr.bf16.mxu0 %v6879_v58  ;;  %1905 = vmatprep.subr.bf16.mxu1 %v6882_v39  ;;  %v7174_v58 = vld [vmem:[#allocation63_spill] sm:$0xff] }
 0x767   :  { %1865 = vmatpush1.bf16.msra.mxu0 %v6885_v56  ;;  %1906 = vmatpush1.bf16.msra.mxu1 %v6888_v38 }
 0x768   :  { %1866 = vmatprep.subr.bf16.mxu0 %v6891_v0  ;;  %1907 = vmatprep.subr.bf16.mxu1 %v6894_v41  ;;  %v7175_v0 = vld [vmem:[#allocation64_spill] sm:$0xff] }
 0x76b   :  { %1867 = vmatpush1.bf16.msra.mxu0 %v6897_v20  ;;  %1908 = vmatpush1.bf16.msra.mxu1 %v6900_v46  ;;  %v7176_v20 = vld [vmem:[#allocation65_spill] sm:$0xff] }
 0x76c   :  { %1868 = vmatprep.subr.bf16.mxu0 %v6903_v3  ;;  %1909 = vmatprep.subr.bf16.mxu1 %v6906_v4 }
 0x76f   :  { %1869 = vmatpush1.bf16.msra.mxu0 %v6909_v6  ;;  %1910 = vmatpush1.bf16.msra.mxu1 %v6912_v7 }
 0x770   :  { %1870 = vmatprep.subr.bf16.mxu0 %v5551_v44  ;;  %1911 = vmatprep.subr.bf16.mxu1 %v5552_v52 }
 0x773   :  { %1871 = vmatpush1.bf16.msra.mxu0 %v5553_v55  ;;  %1912 = vmatpush1.bf16.msra.mxu1 %v5554_v57 }
 0x774   :  { %1872 = vmatprep.subr.bf16.mxu0 %v5555_v59  ;;  %1913 = vmatprep.subr.bf16.mxu1 %v5556_v43 }
 0x777   :  { %1873 = vmatpush1.bf16.msra.mxu0 %v5557_v60  ;;  %1914 = vmatpush1.bf16.msra.mxu1 %v5558_v63 }
 0x778   :  { %1874 = vmatprep.subr.bf16.mxu0 %v5559_v5  ;;  %1915 = vmatprep.subr.bf16.mxu1 %v5560_v15 }
 0x77b   :  { %1875 = vmatpush1.bf16.msra.mxu0 %v5561_v25  ;;  %1916 = vmatpush1.bf16.msra.mxu1 %v5562_v61 }
 0x831   :  { %v1783_v10 = vpop.f32.mrb[40].mxu0  ;;  %v1824_v54 = vpop.f32.mrb[40].mxu1 }
 0x832   :  { %v1831_v53 = vadd.f32 %v1783_v10, %v7173_v30  ;;  %v1833_v39 = vadd.f32 %v1824_v54, %v7174_v58  ;;  %v1785_v56 = vpop.f32.mrb[41].mxu0  ;;  %v1826_v38 = vpop.f32.mrb[41].mxu1 }
 0x833   :  { %v1832_v41 = vadd.f32 %v1785_v56, %v7175_v0  ;;  %v1834_v46 = vadd.f32 %v1826_v38, %v7176_v20  ;;  %v1787_v3 = vpop.f32.mrb[42].mxu0  ;;  %v1828_v4 = vpop.f32.mrb[42].mxu1 }
 0x834   :  { %v4977_v6 = vmul.f32 -1.442695, %v1831_v53  ;;  %v1788_v7 = vpop.f32.mrb[43].mxu0  ;;  %v1829_v23 = vpop.f32.mrb[43].mxu1 }
 0x835   :  { %v4978_v24 = vmul.f32 -1.442695, %v1832_v41  ;;  %v4979_v26 = vmul.f32 -1.442695, %v1834_v46 }
 0x836   :  { %5499 = vpow2.f32 %v4977_v6 }
 0x837   :  { %5501 = vpow2.f32 %v4978_v24 }
 0x838   :  { %5503 = vpow2.f32 %v4979_v26 }
 0x839   :  { %5505 = vtanh.f32 %v1833_v39 }
 0x840   :  { %v5500_v27 = vpop.eup %5499 }
 0x841   :  { %v5502_v28 = vpop.eup %5501  ;;  %v1838_v29 = vadd.f32 1.0, %v5500_v27 }
 0x842   :  { %v1844_v31 = vadd.f32 1.0, %v5502_v28  ;;  %v5504_v32 = vpop.eup %5503 }
 0x843   :  { %5507 = vrcp.f32 %v1838_v29  ;;  %v5506_v8 = vpop.eup %5505  ;;  %v1851_v11 = vadd.f32 1.0, %v5504_v32 }
 0x844   :  { %5509 = vrcp.f32 %v1844_v31 }
 0x845   :  { %5511 = vrcp.f32 %v1851_v11 }
 0x84d   :  { %v5508_v33 = vpop.eup %5507 }
 0x84e   :  { %v5510_v9 = vpop.eup %5509  ;;  %v1855_v34 = vmul.f32 %v5508_v33, %v5506_v8 }
 0x84f   :  { %v1854_v35 = vmul.f32 %v5510_v9, %v6934_v48  ;;  %v5512_v36 = vpop.eup %5511 }
 0x851   :  { %v1856_v12 = vadd.f32 %v1855_v34, %v1854_v35 }
 0x853   :  { %5513 = vtanh.f32 %v1856_v12 }
 0x85d   :  { %v5514_v13 = vpop.eup %5513 }
 0x85e   :  { %v1858_v1 = vmul.f32 %v5514_v13, %v5512_v36 }
 0x860   :  { %v1859_v2 = vpack.c.bf16 %v1858_v1, %v1858_v1 }
 0x862   :  { %1893 = vmatmul.mubr.bf16.vlgmr.msra.gmra.mrb[44].mxu0 %v1859_v2  ;;  %1934 = vmatmul.mubr.bf16.vlgmr.msra.gmra.mrb[44].mxu1 %v1859_v2 }
 0x935   :  { %v1894_v14 = vpop.f32.mrb[44].mxu0  ;;  %v1935_v16 = vpop.f32.mrb[44].mxu1 }
 0x936   :  { %v1942_v18 = vadd.f32 %v1894_v14, %v7177_v17  ;;  %v1944_v21 = vadd.f32 %v1935_v16, %v7178_v19  ;;  %v1896_v22 = vpop.f32.mrb[45].mxu0  ;;  %v1937_v40 = vpop.f32.mrb[45].mxu1 }
 0x937   :  { %v1943_v47 = vadd.f32 %v1896_v22, %v7179_v45  ;;  %v1945_v48 = vadd.f32 %v1937_v40, %v7180_v49  ;;  %v1898_v50 = vpop.f32.mrb[46].mxu0  ;;  %v1939_v37 = vpop.f32.mrb[46].mxu1 }
 0x938   :  { %v4980_v42 = vmul.f32 -1.442695, %v1942_v18  ;;  %v1899_v51 = vpop.f32.mrb[47].mxu0  ;;  %v1940_v44 = vpop.f32.mrb[47].mxu1 }
 0x939   :  { %v4981_v52 = vmul.f32 -1.442695, %v1943_v47  ;;  %v4982_v55 = vmul.f32 -1.442695, %v1945_v48 }
 0x93a   :  { %5515 = vpow2.f32 %v4980_v42 }
 0x93b   :  { %5517 = vpow2.f32 %v4981_v52 }
 0x93c   :  { %5519 = vpow2.f32 %v4982_v55 }
 0x93d   :  { %5521 = vtanh.f32 %v1944_v21 }
 0x944   :  { %v5516_v57 = vpop.eup %5515 }
 0x945   :  { %v5518_v59 = vpop.eup %5517  ;;  %v1949_v43 = vadd.f32 1.0, %v5516_v57 }
 0x946   :  { %v1955_v60 = vadd.f32 1.0, %v5518_v59  ;;  %v5520_v63 = vpop.eup %5519 }
 0x947   :  { %5523 = vrcp.f32 %v1949_v43  ;;  %v5522_v5 = vpop.eup %5521  ;;  %v1962_v10 = vadd.f32 1.0, %v5520_v63 }
 0x948   :  { %5525 = vrcp.f32 %v1955_v60 }
 0x949   :  { %5527 = vrcp.f32 %v1962_v10 }
 0x951   :  { %v5524_v15 = vpop.eup %5523 }
 0x952   :  { %v5526_v25 = vpop.eup %5525  ;;  %v1966_v61 = vmul.f32 %v5524_v15, %v5522_v5 }
 0x953   :  { %v1965_v54 = vmul.f32 %v5526_v25, %v1856_v12  ;;  %v5528_v53 = vpop.eup %5527 }
 0x955   :  { %v1967_v30 = vadd.f32 %v1966_v61, %v1965_v54 }
 0x957   :  { %5529 = vtanh.f32 %v1967_v30 }
 0x961   :  { %v5530_v58 = vpop.eup %5529 }
 0x962   :  { %v6966_v39 = vmul.f32 %v5530_v58, %v5528_v53 }
 0x963   :  { %6096 = dma.done.wait [#allocation4], 19200 }
 0x964   :  { %6097 = vsyncadd [#allocation4], 4294948096  ;;  %v5563_v56 = vld [vmem:[#allocation2 + $0x4] ss:$16 sps:$4 sm:$0xff]   ;;  %v5567_v0 = vld [vmem:[#allocation2] ss:$16 sps:$4 sm:$0xff]  }
 0x965   :  { %v5565_v38 = vld [vmem:[#allocation2 + $0x204] ss:$16 sps:$4 sm:$0xff]   ;;  %2944 = vmatprep.subr.bf16.mxu0 %v5563_v56  ;;  %v5568_v41 = vld [vmem:[#allocation2 + $0x200] ss:$16 sps:$4 sm:$0xff]   ;;  %v1976_v57 = vld [vmem:[%s7109_s1 + $0x8] sm:$0xff]  ;;  %vm2931_vm2 = vcmask 1040384  }
 0x966   :  { %2985 = vmatprep.subr.bf16.mxu1 %v5565_v38  ;;  %v5569_v20 = vld [vmem:[#allocation2 + $0x24] ss:$16 sps:$4 sm:$0xff]   ;;  %2945 = vmatpush1.bf16.msra.mxu0 %v5567_v0  ;;  %v5573_v3 = vld [vmem:[#allocation2 + $0x20] ss:$16 sps:$4 sm:$0xff]   ;;  %v6976_v60 = vcombine.high %v1976_v57, %v1976_v57  ;;  %vm2927_vm3 = vcmask 670720  }
 0x967   :  { %2986 = vmatpush1.bf16.msra.mxu1 %v5568_v41  ;;  %v5571_v46 = vld [vmem:[#allocation2 + $0x224] ss:$16 sps:$4 sm:$0xff]   ;;  %2946 = vmatprep.subr.bf16.mxu0 %v5569_v20  ;;  %v5574_v4 = vld [vmem:[#allocation2 + $0x220] ss:$16 sps:$4 sm:$0xff]  }
 0x968   :  { %2987 = vmatprep.subr.bf16.mxu1 %v5571_v46  ;;  %v5575_v6 = vld [vmem:[#allocation2 + $0x44] ss:$16 sps:$4 sm:$0xff]   ;;  %v5579_v23 = vld [vmem:[#allocation2 + $0x40] ss:$16 sps:$4 sm:$0xff]   ;;  %3017 = vmatprep.mubr.bf16.mxu1 %v6976_v60 }
 0x969   :  { %v5577_v7 = vld [vmem:[#allocation2 + $0x244] ss:$16 sps:$4 sm:$0xff]   ;;  %v5580_v24 = vld [vmem:[#allocation2 + $0x240] ss:$16 sps:$4 sm:$0xff]  }
 0x96a   :  { %2947 = vmatpush1.bf16.msra.mxu0 %v5573_v3  ;;  %v5581_v26 = vld [vmem:[#allocation2 + $0x64] ss:$16 sps:$4 sm:$0xff]   ;;  %v5585_v28 = vld [vmem:[#allocation2 + $0x60] ss:$16 sps:$4 sm:$0xff]  }
 0x96b   :  { %2988 = vmatpush1.bf16.msra.mxu1 %v5574_v4  ;;  %2948 = vmatprep.subr.bf16.mxu0 %v5575_v6  ;;  %v5583_v27 = vld [vmem:[#allocation2 + $0x264] ss:$16 sps:$4 sm:$0xff]   ;;  %v5586_v29 = vld [vmem:[#allocation2 + $0x260] ss:$16 sps:$4 sm:$0xff]   ;;  %v5668_v4 = vld [vmem:[#allocation2 + $0xc] ss:$16 sps:$4 sm:$0xff]  }
 0x96c   :  { %2989 = vmatprep.subr.bf16.mxu1 %v5577_v7  ;;  %v5587_v31 = vld [vmem:[#allocation2 + $0x84] ss:$16 sps:$4 sm:$0xff]   ;;  %v5591_v8 = vld [vmem:[#allocation2 + $0x80] ss:$16 sps:$4 sm:$0xff]   ;;  %v6982_v7 = vcombine.low %v1976_v57, %v1976_v57  ;;  %v5722_v57 = vld [vmem:[#allocation2 + $0x26c] ss:$16 sps:$4 sm:$0xff]  }
 0x96d   :  { %v5589_v32 = vld [vmem:[#allocation2 + $0x284] ss:$16 sps:$4 sm:$0xff]   ;;  %v5592_v33 = vld [vmem:[#allocation2 + $0x280] ss:$16 sps:$4 sm:$0xff]  }
 0x96e   :  { %2949 = vmatpush1.bf16.msra.mxu0 %v5579_v23  ;;  %v5593_v9 = vld [vmem:[#allocation2 + $0xa4] ss:$16 sps:$4 sm:$0xff]   ;;  %v5597_v11 = vld [vmem:[#allocation2 + $0xa0] ss:$16 sps:$4 sm:$0xff]  }
 0x96f   :  { %2990 = vmatpush1.bf16.msra.mxu1 %v5580_v24  ;;  %2950 = vmatprep.subr.bf16.mxu0 %v5581_v26  ;;  %v5595_v34 = vld [vmem:[#allocation2 + $0x2a4] ss:$16 sps:$4 sm:$0xff]   ;;  %v5598_v35 = vld [vmem:[#allocation2 + $0x2a0] ss:$16 sps:$4 sm:$0xff]   ;;  %v5666_v24 = vld [vmem:[#allocation2 + $0x8] ss:$16 sps:$4 sm:$0xff]  }
 0x970   :  { %2991 = vmatprep.subr.bf16.mxu1 %v5583_v27  ;;  %v5599_v12 = vld [vmem:[#allocation2 + $0xc4] ss:$16 sps:$4 sm:$0xff]   ;;  %v5603_v13 = vld [vmem:[#allocation2 + $0xc0] ss:$16 sps:$4 sm:$0xff]   ;;  %v5674_v27 = vld [vmem:[#allocation2 + $0x2c] ss:$16 sps:$4 sm:$0xff]  }
 0x971   :  { %v5601_v36 = vld [vmem:[#allocation2 + $0x2c4] ss:$16 sps:$4 sm:$0xff]   ;;  %v5604_v1 = vld [vmem:[#allocation2 + $0x2c0] ss:$16 sps:$4 sm:$0xff]  }
 0x972   :  { %2951 = vmatpush1.bf16.msra.mxu0 %v5585_v28  ;;  %v5605_v2 = vld [vmem:[#allocation2 + $0xe4] ss:$16 sps:$4 sm:$0xff]   ;;  %v5609_v16 = vld [vmem:[#allocation2 + $0xe0] ss:$16 sps:$4 sm:$0xff]  }
 0x973   :  { %2992 = vmatpush1.bf16.msra.mxu1 %v5586_v29  ;;  %2952 = vmatprep.subr.bf16.mxu0 %v5587_v31  ;;  %v5607_v14 = vld [vmem:[#allocation2 + $0x2e4] ss:$16 sps:$4 sm:$0xff]   ;;  %v5610_v17 = vld [vmem:[#allocation2 + $0x2e0] ss:$16 sps:$4 sm:$0xff]   ;;  %v5672_v29 = vld [vmem:[#allocation2 + $0x28] ss:$16 sps:$4 sm:$0xff]  }
 0x974   :  { %2993 = vmatprep.subr.bf16.mxu1 %v5589_v32  ;;  %v5611_v18 = vld [vmem:[#allocation2 + $0x104] ss:$16 sps:$4 sm:$0xff]   ;;  %v5615_v21 = vld [vmem:[#allocation2 + $0x100] ss:$16 sps:$4 sm:$0xff]   ;;  %v5680_v32 = vld [vmem:[#allocation2 + $0x4c] ss:$16 sps:$4 sm:$0xff]  }
 0x975   :  { %v5613_v19 = vld [vmem:[#allocation2 + $0x304] ss:$16 sps:$4 sm:$0xff]   ;;  %v5616_v22 = vld [vmem:[#allocation2 + $0x300] ss:$16 sps:$4 sm:$0xff]  }
 0x976   :  { %2953 = vmatpush1.bf16.msra.mxu0 %v5591_v8  ;;  %v5617_v40 = vld [vmem:[#allocation2 + $0x124] ss:$16 sps:$4 sm:$0xff]   ;;  %v5621_v47 = vld [vmem:[#allocation2 + $0x120] ss:$16 sps:$4 sm:$0xff]  }
 0x977   :  { %2994 = vmatpush1.bf16.msra.mxu1 %v5592_v33  ;;  %2954 = vmatprep.subr.bf16.mxu0 %v5593_v9  ;;  %v5619_v45 = vld [vmem:[#allocation2 + $0x324] ss:$16 sps:$4 sm:$0xff]   ;;  %v5622_v49 = vld [vmem:[#allocation2 + $0x320] ss:$16 sps:$4 sm:$0xff]   ;;  %v5678_v33 = vld [vmem:[#allocation2 + $0x48] ss:$16 sps:$4 sm:$0xff]  }
 0x978   :  { %2995 = vmatprep.subr.bf16.mxu1 %v5595_v34  ;;  %v5623_v48 = vld [vmem:[#allocation2 + $0x144] ss:$16 sps:$4 sm:$0xff]   ;;  %v5627_v37 = vld [vmem:[#allocation2 + $0x140] ss:$16 sps:$4 sm:$0xff]   ;;  %v5686_v34 = vld [vmem:[#allocation2 + $0x6c] ss:$16 sps:$4 sm:$0xff]  }
 0x979   :  { %v5625_v50 = vld [vmem:[#allocation2 + $0x344] ss:$16 sps:$4 sm:$0xff]   ;;  %v5628_v42 = vld [vmem:[#allocation2 + $0x340] ss:$16 sps:$4 sm:$0xff]  }
 0x97a   :  { %2955 = vmatpush1.bf16.msra.mxu0 %v5597_v11  ;;  %v5629_v51 = vld [vmem:[#allocation2 + $0x164] ss:$16 sps:$4 sm:$0xff]   ;;  %v5633_v59 = vld [vmem:[#allocation2 + $0x160] ss:$16 sps:$4 sm:$0xff]  }
 0x97b   :  { %2996 = vmatpush1.bf16.msra.mxu1 %v5598_v35  ;;  %2956 = vmatprep.subr.bf16.mxu0 %v5599_v12  ;;  %v5631_v44 = vld [vmem:[#allocation2 + $0x364] ss:$16 sps:$4 sm:$0xff]   ;;  %v5634_v43 = vld [vmem:[#allocation2 + $0x360] ss:$16 sps:$4 sm:$0xff]   ;;  %v5684_v35 = vld [vmem:[#allocation2 + $0x68] ss:$16 sps:$4 sm:$0xff]  }
 0x97c   :  { %2997 = vmatprep.subr.bf16.mxu1 %v5601_v36  ;;  %v1975_v52 = vld [vmem:[%s7109_s1] sm:$0xff]  ;;  %v5692_v36 = vld [vmem:[#allocation2 + $0x8c] ss:$16 sps:$4 sm:$0xff]  }
 0x97d   :  { %v6971_v55 = vcombine.high %v1975_v52, %v1975_v52  ;;  %v5635_v63 = vld [vmem:[#allocation2 + $0x184] ss:$16 sps:$4 sm:$0xff]   ;;  %v5639_v15 = vld [vmem:[#allocation2 + $0x180] ss:$16 sps:$4 sm:$0xff]   ;;  %v6980_v6 = vcombine.low %v1975_v52, %v1975_v52  ;;  %v5714_v52 = vld [vmem:[#allocation2 + $0x248] ss:$16 sps:$4 sm:$0xff]  }
 0x97e   :  { %2957 = vmatpush1.bf16.msra.mxu0 %v5603_v13  ;;  %v5637_v5 = vld [vmem:[#allocation2 + $0x384] ss:$16 sps:$4 sm:$0xff]   ;;  %v5640_v25 = vld [vmem:[#allocation2 + $0x380] ss:$16 sps:$4 sm:$0xff]  }
 0x97f   :  { %2998 = vmatpush1.bf16.msra.mxu1 %v5604_v1  ;;  %2958 = vmatprep.subr.bf16.mxu0 %v5605_v2  ;;  %v5641_v61 = vld [vmem:[#allocation2 + $0x1a4] ss:$16 sps:$4 sm:$0xff]   ;;  %v5645_v54 = vld [vmem:[#allocation2 + $0x1a0] ss:$16 sps:$4 sm:$0xff]   ;;  %v5690_v2 = vld [vmem:[#allocation2 + $0x88] ss:$16 sps:$4 sm:$0xff]  }
 0x980   :  { %2999 = vmatprep.subr.bf16.mxu1 %v5607_v14  ;;  %2976 = vmatprep.mubr.bf16.mxu0 %v6971_v55  ;;  %v5643_v10 = vld [vmem:[#allocation2 + $0x3a4] ss:$16 sps:$4 sm:$0xff]   ;;  %v5646_v30 = vld [vmem:[#allocation2 + $0x3a0] ss:$16 sps:$4 sm:$0xff]  }
 0x981   :  { %v5647_v53 = vld [vmem:[#allocation2 + $0x1c4] ss:$16 sps:$4 sm:$0xff]   ;;  %v5651_v56 = vld [vmem:[#allocation2 + $0x1c0] ss:$16 sps:$4 sm:$0xff]  }
 0x982   :  { %2959 = vmatpush1.bf16.msra.mxu0 %v5609_v16  ;;  %v5649_v58 = vld [vmem:[#allocation2 + $0x3c4] ss:$16 sps:$4 sm:$0xff]   ;;  %v5652_v38 = vld [vmem:[#allocation2 + $0x3c0] ss:$16 sps:$4 sm:$0xff]   ;;  %v5696_v16 = vld [vmem:[#allocation2 + $0xac] ss:$16 sps:$4 sm:$0xff]  }
 0x983   :  { %3000 = vmatpush1.bf16.msra.mxu1 %v5610_v17  ;;  %2960 = vmatprep.subr.bf16.mxu0 %v5611_v18  ;;  %v5653_v0 = vld [vmem:[#allocation2 + $0x1e4] ss:$16 sps:$4 sm:$0xff]   ;;  %v5657_v20 = vld [vmem:[#allocation2 + $0x1e0] ss:$16 sps:$4 sm:$0xff]   ;;  %v5694_v18 = vld [vmem:[#allocation2 + $0xa8] ss:$16 sps:$4 sm:$0xff]  }
 0x984   :  { %3001 = vmatprep.subr.bf16.mxu1 %v5613_v19  ;;  %v5655_v41 = vld [vmem:[#allocation2 + $0x3e4] ss:$16 sps:$4 sm:$0xff]   ;;  %v5658_v46 = vld [vmem:[#allocation2 + $0x3e0] ss:$16 sps:$4 sm:$0xff]  }
 0x985   :  { %v5665_v3 = vld [vmem:[#allocation2 + $0x404] ss:$16 sps:$4 sm:$0xff]   ;;  %v5663_v23 = vld [vmem:[#allocation2 + $0x400] ss:$16 sps:$4 sm:$0xff]  }
 0x986   :  { %2961 = vmatpush1.bf16.msra.mxu0 %v5615_v21  ;;  %v5671_v26 = vld [vmem:[#allocation2 + $0x424] ss:$16 sps:$4 sm:$0xff]   ;;  %v5669_v28 = vld [vmem:[#allocation2 + $0x420] ss:$16 sps:$4 sm:$0xff]   ;;  %v5701_v21 = vld [vmem:[#allocation2 + $0xcc] ss:$16 sps:$4 sm:$0xff]  }
 0x987   :  { %3002 = vmatpush1.bf16.msra.mxu1 %v5616_v22  ;;  %2962 = vmatprep.subr.bf16.mxu0 %v5617_v40  ;;  %v5677_v31 = vld [vmem:[#allocation2 + $0x444] ss:$16 sps:$4 sm:$0xff]   ;;  %v5675_v8 = vld [vmem:[#allocation2 + $0x440] ss:$16 sps:$4 sm:$0xff]   ;;  %v5704_v22 = vld [vmem:[#allocation2 + $0x20c] ss:$16 sps:$4 sm:$0xff]  }
 0x988   :  { %3003 = vmatprep.subr.bf16.mxu1 %v5619_v45  ;;  %v5683_v9 = vld [vmem:[#allocation2 + $0x464] ss:$16 sps:$4 sm:$0xff]   ;;  %v5681_v11 = vld [vmem:[#allocation2 + $0x460] ss:$16 sps:$4 sm:$0xff]   ;;  %v5699_v45 = vld [vmem:[#allocation2 + $0xc8] ss:$16 sps:$4 sm:$0xff]  }
 0x989   :  { %v5689_v12 = vld [vmem:[#allocation2 + $0x484] ss:$16 sps:$4 sm:$0xff]   ;;  %v5687_v1 = vld [vmem:[#allocation2 + $0x480] ss:$16 sps:$4 sm:$0xff]  }
 0x98a   :  { %2963 = vmatpush1.bf16.msra.mxu0 %v5621_v47  ;;  %v2158_v13 = vld [vmem:[#allocation2 + $0x4a0] sm:$0x11]  ;;  %v6993_v40 = vld [vmem:[%s7109_s1 + $0x10] ss:$0 sps:$4 sm:$0xff]   ;;  %v5702_v47 = vld [vmem:[#allocation2 + $0x208] ss:$16 sps:$4 sm:$0xff]  }
 0x98b   :  { %3004 = vmatpush1.bf16.msra.mxu1 %v5622_v49  ;;  %2964 = vmatprep.subr.bf16.mxu0 %v5623_v48  ;;  %v5137_v14 = vcombine.high %v2158_v13, %v2158_v13  ;;  %v5136_v17 = vcombine.low %v2158_v13, %v2158_v13  ;;  %v5707_v49 = vld [vmem:[#allocation2 + $0xec] ss:$16 sps:$4 sm:$0xff]   ;;  %v5774_v13 = vld [vmem:[#allocation2 + $0x448] ss:$16 sps:$4 sm:$0xff]  }
 0x98c   :  { %3005 = vmatprep.subr.bf16.mxu1 %v5625_v50  ;;  %v5710_v48 = vld [vmem:[#allocation2 + $0x22c] ss:$16 sps:$4 sm:$0xff]   ;;  %v5705_v50 = vld [vmem:[#allocation2 + $0xe8] ss:$16 sps:$4 sm:$0xff]  }
 0x98d   :  { %v2933_v19 = vsel %vm2931_vm2, %v5136_v17, 0  ;;  %v5788_v17 = vld [vmem:[#allocation2 + $0x48c] ss:$16 sps:$4 sm:$0xff]  }
 0x98e   :  { %2965 = vmatpush1.bf16.msra.mxu0 %v5627_v37  ;;  %v5708_v37 = vld [vmem:[#allocation2 + $0x228] ss:$16 sps:$4 sm:$0xff]  }
 0x98f   :  { %3006 = vmatpush1.bf16.msra.mxu1 %v5628_v42  ;;  %2966 = vmatprep.subr.bf16.mxu0 %v5629_v51  ;;  %v5713_v42 = vld [vmem:[#allocation2 + $0x10c] ss:$16 sps:$4 sm:$0xff]  }
 0x990   :  { %3007 = vmatprep.subr.bf16.mxu1 %v5631_v44  ;;  %v5716_v51 = vld [vmem:[#allocation2 + $0x24c] ss:$16 sps:$4 sm:$0xff]   ;;  %v5711_v44 = vld [vmem:[#allocation2 + $0x108] ss:$16 sps:$4 sm:$0xff]  }
 0x992   :  { %2967 = vmatpush1.bf16.msra.mxu0 %v5633_v59  ;;  %v5717_v59 = vld [vmem:[#allocation2 + $0x128] ss:$16 sps:$4 sm:$0xff]  }
 0x993   :  { %3008 = vmatpush1.bf16.msra.mxu1 %v5634_v43  ;;  %2968 = vmatprep.subr.bf16.mxu0 %v5635_v63  ;;  %v5720_v43 = vld [vmem:[#allocation2 + $0x268] ss:$16 sps:$4 sm:$0xff]   ;;  %v5725_v63 = vld [vmem:[#allocation2 + $0x14c] ss:$16 sps:$4 sm:$0xff]  }
 0x994   :  { %3009 = vmatprep.subr.bf16.mxu1 %v5637_v5  ;;  %v5728_v5 = vld [vmem:[#allocation2 + $0x28c] ss:$16 sps:$4 sm:$0xff]  }
 0x996   :  { %2969 = vmatpush1.bf16.msra.mxu0 %v5639_v15  ;;  %v5723_v15 = vld [vmem:[#allocation2 + $0x148] ss:$16 sps:$4 sm:$0xff]  }
 0x997   :  { %3010 = vmatpush1.bf16.msra.mxu1 %v5640_v25  ;;  %2970 = vmatprep.subr.bf16.mxu0 %v5641_v61  ;;  %v5731_v25 = vld [vmem:[#allocation2 + $0x16c] ss:$16 sps:$4 sm:$0xff]  }
 0x998   :  { %3011 = vmatprep.subr.bf16.mxu1 %v5643_v10  ;;  %v5734_v61 = vld [vmem:[#allocation2 + $0x2ac] ss:$16 sps:$4 sm:$0xff]   ;;  %v5729_v10 = vld [vmem:[#allocation2 + $0x168] ss:$16 sps:$4 sm:$0xff]  }
 0x99a   :  { %2971 = vmatpush1.bf16.msra.mxu0 %v5645_v54  ;;  %v5732_v54 = vld [vmem:[#allocation2 + $0x2a8] ss:$16 sps:$4 sm:$0xff]  }
 0x99b   :  { %3012 = vmatpush1.bf16.msra.mxu1 %v5646_v30  ;;  %2972 = vmatprep.subr.bf16.mxu0 %v5647_v53  ;;  %v5737_v30 = vld [vmem:[#allocation2 + $0x18c] ss:$16 sps:$4 sm:$0xff]  }
 0x99c   :  { %3013 = vmatprep.subr.bf16.mxu1 %v5649_v58  ;;  %v5740_v53 = vld [vmem:[#allocation2 + $0x2cc] ss:$16 sps:$4 sm:$0xff]   ;;  %v5735_v58 = vld [vmem:[#allocation2 + $0x188] ss:$16 sps:$4 sm:$0xff]  }
 0x99e   :  { %2973 = vmatpush1.bf16.msra.mxu0 %v5651_v56  ;;  %v5738_v56 = vld [vmem:[#allocation2 + $0x2c8] ss:$16 sps:$4 sm:$0xff]  }
 0x99f   :  { %3014 = vmatpush1.bf16.msra.mxu1 %v5652_v38  ;;  %2974 = vmatprep.subr.bf16.mxu0 %v5653_v0  ;;  %v5743_v38 = vld [vmem:[#allocation2 + $0x1ac] ss:$16 sps:$4 sm:$0xff]  }
 0x9a0   :  { %3015 = vmatprep.subr.bf16.mxu1 %v5655_v41  ;;  %v5746_v0 = vld [vmem:[#allocation2 + $0x2ec] ss:$16 sps:$4 sm:$0xff]   ;;  %v5741_v41 = vld [vmem:[#allocation2 + $0x1a8] ss:$16 sps:$4 sm:$0xff]  }
 0x9a2   :  { %2975 = vmatpush1.bf16.msra.mxu0 %v5657_v20  ;;  %v5744_v20 = vld [vmem:[#allocation2 + $0x2e8] ss:$16 sps:$4 sm:$0xff]  }
 0x9a3   :  { %3016 = vmatpush1.bf16.msra.mxu1 %v5658_v46  ;;  %3026 = vmatprep.subr.bf16.mxu0 %v5665_v3  ;;  %v5749_v46 = vld [vmem:[#allocation2 + $0x1cc] ss:$16 sps:$4 sm:$0xff]  }
 0x9a4   :  { %3067 = vmatprep.subr.bf16.mxu1 %v5668_v4  ;;  %v5752_v3 = vld [vmem:[#allocation2 + $0x30c] ss:$16 sps:$4 sm:$0xff]   ;;  %v5747_v4 = vld [vmem:[#allocation2 + $0x1c8] ss:$16 sps:$4 sm:$0xff]  }
 0x9a5   :  { %2977 = vmatmul.mubr.bf16.vlgmr.msra.gmra.mrb[48].mxu0 %v6980_v6 }
 0x9a6   :  { %3018 = vmatmul.mubr.bf16.vlgmr.msra.gmra.mrb[48].mxu1 %v6982_v7  ;;  %3027 = vmatpush1.bf16.msra.mxu0 %v5663_v23  ;;  %v5750_v23 = vld [vmem:[#allocation2 + $0x308] ss:$16 sps:$4 sm:$0xff]  }
 0x9a7   :  { %3068 = vmatpush1.bf16.msra.mxu1 %v5666_v24  ;;  %3028 = vmatprep.subr.bf16.mxu0 %v5671_v26  ;;  %v5755_v24 = vld [vmem:[#allocation2 + $0x1ec] ss:$16 sps:$4 sm:$0xff]  }
 0x9a8   :  { %3069 = vmatprep.subr.bf16.mxu1 %v5674_v27  ;;  %3058 = vmatprep.mubr.bf16.mxu0 %v7159_v62  ;;  %v5758_v26 = vld [vmem:[#allocation2 + $0x32c] ss:$16 sps:$4 sm:$0xff]   ;;  %v5753_v27 = vld [vmem:[#allocation2 + $0x1e8] ss:$16 sps:$4 sm:$0xff]  }
 0x9a9   :  { %3099 = vmatprep.mubr.bf16.mxu1 %v6971_v55  ;;  %v5719_v55 = vld [vmem:[#allocation2 + $0x12c] ss:$16 sps:$4 sm:$0xff]  }
 0x9aa   :  { %3029 = vmatpush1.bf16.msra.mxu0 %v5669_v28  ;;  %v5756_v28 = vld [vmem:[#allocation2 + $0x328] ss:$16 sps:$4 sm:$0xff]  }
 0x9ab   :  { %3070 = vmatpush1.bf16.msra.mxu1 %v5672_v29  ;;  %3030 = vmatprep.subr.bf16.mxu0 %v5677_v31  ;;  %v5761_v29 = vld [vmem:[#allocation2 + $0x34c] ss:$16 sps:$4 sm:$0xff]  }
 0x9ac   :  { %3071 = vmatprep.subr.bf16.mxu1 %v5680_v32  ;;  %v5764_v31 = vld [vmem:[#allocation2 + $0x40c] ss:$16 sps:$4 sm:$0xff]   ;;  %v5759_v32 = vld [vmem:[#allocation2 + $0x348] ss:$16 sps:$4 sm:$0xff]  }
 0x9ae   :  { %3031 = vmatpush1.bf16.msra.mxu0 %v5675_v8  ;;  %v5762_v8 = vld [vmem:[#allocation2 + $0x408] ss:$16 sps:$4 sm:$0xff]  }
 0x9af   :  { %3072 = vmatpush1.bf16.msra.mxu1 %v5678_v33  ;;  %3032 = vmatprep.subr.bf16.mxu0 %v5683_v9  ;;  %v5767_v33 = vld [vmem:[#allocation2 + $0x36c] ss:$16 sps:$4 sm:$0xff]  }
 0x9b0   :  { %3073 = vmatprep.subr.bf16.mxu1 %v5686_v34  ;;  %v5770_v9 = vld [vmem:[#allocation2 + $0x42c] ss:$16 sps:$4 sm:$0xff]   ;;  %v5765_v34 = vld [vmem:[#allocation2 + $0x368] ss:$16 sps:$4 sm:$0xff]  }
 0x9b2   :  { %3033 = vmatpush1.bf16.msra.mxu0 %v5681_v11  ;;  %v5768_v11 = vld [vmem:[#allocation2 + $0x428] ss:$16 sps:$4 sm:$0xff]  }
 0x9b3   :  { %3074 = vmatpush1.bf16.msra.mxu1 %v5684_v35  ;;  %3034 = vmatprep.subr.bf16.mxu0 %v5689_v12  ;;  %v5773_v35 = vld [vmem:[#allocation2 + $0x38c] ss:$16 sps:$4 sm:$0xff]  }
 0x9b4   :  { %3075 = vmatprep.subr.bf16.mxu1 %v5692_v36  ;;  %v5776_v12 = vld [vmem:[#allocation2 + $0x44c] ss:$16 sps:$4 sm:$0xff]   ;;  %v5771_v36 = vld [vmem:[#allocation2 + $0x388] ss:$16 sps:$4 sm:$0xff]  }
 0x9b6   :  { %3035 = vmatpush1.bf16.msra.mxu0 %v5687_v1  ;;  %v5779_v1 = vld [vmem:[#allocation2 + $0x3ac] ss:$16 sps:$4 sm:$0xff]  }
 0x9b7   :  { %3076 = vmatpush1.bf16.msra.mxu1 %v5690_v2  ;;  %5140 = vmatprep.subr.msk.bf16.mxu0 %vm2931_vm2, %v5137_v14  ;;  %v5782_v2 = vld [vmem:[#allocation2 + $0x46c] ss:$16 sps:$4 sm:$0xff]   ;;  %v5780_v14 = vld [vmem:[#allocation2 + $0x468] ss:$16 sps:$4 sm:$0xff]  }
 0x9b8   :  { %3077 = vmatprep.subr.bf16.mxu1 %v5696_v16  ;;  %v5785_v16 = vld [vmem:[#allocation2 + $0x3cc] ss:$16 sps:$4 sm:$0xff]  }
 0x9ba   :  { %3037 = vmatpush1.bf16.msra.mxu0 %v2933_v19  ;;  %v5783_v19 = vld [vmem:[#allocation2 + $0x3c8] ss:$16 sps:$4 sm:$0xff]  }
 0x9bb   :  { %3078 = vmatpush1.bf16.msra.mxu1 %v5694_v18  ;;  %3108 = vmatprep.subr.bf16.mxu0 %v5704_v22  ;;  %v2159_v18 = vld [vmem:[#allocation2 + $0x4a8] sm:$0x11] }
 0x9bc   :  { %3079 = vmatprep.subr.bf16.mxu1 %v5701_v21  ;;  %v5786_v21 = vld [vmem:[#allocation2 + $0x488] ss:$16 sps:$4 sm:$0xff]   ;;  %v5791_v22 = vld [vmem:[#allocation2 + $0x3ec] ss:$16 sps:$4 sm:$0xff]  }
 0x9bd   :  { %5141 = vmatmul.mubr.msk.bf16.vlgmr.msra.gmra.mrb[52].mxu0 %vm2927_vm3, %v6993_v40 }
 0x9be   :  { %3109 = vmatpush1.bf16.msra.mxu0 %v5702_v47  ;;  %3140 = vmatprep.mubr.bf16.mxu0 %v6976_v60  ;;  %v5726_v60 = vld [vmem:[#allocation2 + $0x288] ss:$16 sps:$4 sm:$0xff]   ;;  %v5138_v47 = vcombine.low %v2159_v18, %v2159_v18 }
 0x9bf   :  { %3080 = vmatpush1.bf16.msra.mxu1 %v5699_v45  ;;  %3110 = vmatprep.subr.bf16.mxu0 %v5710_v48  ;;  %v5139_v45 = vcombine.high %v2159_v18, %v2159_v18 }
 0x9c0   :  { %3081 = vmatprep.subr.bf16.mxu1 %v5707_v49  ;;  %v5789_v49 = vld [vmem:[#allocation2 + $0x3e8] ss:$16 sps:$4 sm:$0xff]   ;;  %v2939_v48 = vsel %vm2931_vm2, %v5138_v47, 0 }
 0x9c2   :  { %3111 = vmatpush1.bf16.msra.mxu0 %v5708_v37  ;;  %v5799_v37 = vld [vmem:[#allocation11 + $0xc] ss:$16 sps:$4 sm:$0xff]  }
 0x9c3   :  { %3082 = vmatpush1.bf16.msra.mxu1 %v5705_v50  ;;  %3112 = vmatprep.subr.bf16.mxu0 %v5716_v51  ;;  %v5796_v50 = vld [vmem:[#allocation11 + $0x4] ss:$16 sps:$4 sm:$0xff]   ;;  %v5797_v51 = vld [vmem:[#allocation11 + $0x8] ss:$16 sps:$4 sm:$0xff]  }
 0x9c4   :  { %3083 = vmatprep.subr.bf16.mxu1 %v5713_v42  ;;  %v5794_v42 = vld [vmem:[#allocation11] ss:$16 sps:$4 sm:$0xff]  }
 0x9c6   :  { %3113 = vmatpush1.bf16.msra.mxu0 %v5714_v52  ;;  %v5805_v52 = vld [vmem:[#allocation11 + $0x2c] ss:$16 sps:$4 sm:$0xff]  }
 0x9c7   :  { %3084 = vmatpush1.bf16.msra.mxu1 %v5711_v44  ;;  %3114 = vmatprep.subr.bf16.mxu0 %v5722_v57  ;;  %v5802_v44 = vld [vmem:[#allocation11 + $0x24] ss:$16 sps:$4 sm:$0xff]   ;;  %v5803_v57 = vld [vmem:[#allocation11 + $0x28] ss:$16 sps:$4 sm:$0xff]  }
 0x9c8   :  { %3085 = vmatprep.subr.bf16.mxu1 %v5719_v55  ;;  %v5800_v55 = vld [vmem:[#allocation11 + $0x20] ss:$16 sps:$4 sm:$0xff]  }
 0x9ca   :  { %3115 = vmatpush1.bf16.msra.mxu0 %v5720_v43  ;;  %v5811_v43 = vld [vmem:[#allocation11 + $0x4c] ss:$16 sps:$4 sm:$0xff]  }
 0x9cb   :  { %3086 = vmatpush1.bf16.msra.mxu1 %v5717_v59  ;;  %3116 = vmatprep.subr.bf16.mxu0 %v5728_v5  ;;  %v5808_v59 = vld [vmem:[#allocation11 + $0x44] ss:$16 sps:$4 sm:$0xff]   ;;  %v5809_v5 = vld [vmem:[#allocation11 + $0x48] ss:$16 sps:$4 sm:$0xff]  }
 0x9cc   :  { %3087 = vmatprep.subr.bf16.mxu1 %v5725_v63  ;;  %v5806_v63 = vld [vmem:[#allocation11 + $0x40] ss:$16 sps:$4 sm:$0xff]  }
 0x9ce   :  { %3117 = vmatpush1.bf16.msra.mxu0 %v5726_v60  ;;  %v5815_v60 = vld [vmem:[#allocation11 + $0x68] ss:$16 sps:$4 sm:$0xff]  }
 0x9cf   :  { %3088 = vmatpush1.bf16.msra.mxu1 %v5723_v15  ;;  %3118 = vmatprep.subr.bf16.mxu0 %v5734_v61  ;;  %v5812_v15 = vld [vmem:[#allocation11 + $0x60] ss:$16 sps:$4 sm:$0xff]   ;;  %v5823_v61 = vld [vmem:[#allocation11 + $0x8c] ss:$16 sps:$4 sm:$0xff]  }
 0x9d0   :  { %3089 = vmatprep.subr.bf16.mxu1 %v5731_v25  ;;  %v5820_v25 = vld [vmem:[#allocation11 + $0x84] ss:$16 sps:$4 sm:$0xff]  }
 0x9d2   :  { %3119 = vmatpush1.bf16.msra.mxu0 %v5732_v54  ;;  %v5826_v54 = vld [vmem:[#allocation11 + $0xa4] ss:$16 sps:$4 sm:$0xff]  }
 0x9d3   :  { %3090 = vmatpush1.bf16.msra.mxu1 %v5729_v10  ;;  %3120 = vmatprep.subr.bf16.mxu0 %v5740_v53  ;;  %v5818_v10 = vld [vmem:[#allocation11 + $0x80] ss:$16 sps:$4 sm:$0xff]  }
 0x9d4   :  { %3091 = vmatprep.subr.bf16.mxu1 %v5737_v30  ;;  %v5829_v30 = vld [vmem:[#allocation11 + $0xac] ss:$16 sps:$4 sm:$0xff]   ;;  %v5824_v53 = vld [vmem:[#allocation11 + $0xa0] ss:$16 sps:$4 sm:$0xff]  }
 0x9d6   :  { %3121 = vmatpush1.bf16.msra.mxu0 %v5738_v56  ;;  %v5832_v56 = vld [vmem:[#allocation11 + $0xc4] ss:$16 sps:$4 sm:$0xff]  }
 0x9d7   :  { %3092 = vmatpush1.bf16.msra.mxu1 %v5735_v58  ;;  %3122 = vmatprep.subr.bf16.mxu0 %v5746_v0  ;;  %v5827_v58 = vld [vmem:[#allocation11 + $0xa8] ss:$16 sps:$4 sm:$0xff]   ;;  %v5830_v0 = vld [vmem:[#allocation11 + $0xc0] ss:$16 sps:$4 sm:$0xff]  }
 0x9d8   :  { %3093 = vmatprep.subr.bf16.mxu1 %v5743_v38  ;;  %v5835_v38 = vld [vmem:[#allocation11 + $0xcc] ss:$16 sps:$4 sm:$0xff]  }
 0x9da   :  { %3123 = vmatpush1.bf16.msra.mxu0 %v5744_v20  ;;  %v5838_v20 = vld [vmem:[#allocation11 + $0xe4] ss:$16 sps:$4 sm:$0xff]  }
 0x9db   :  { %3094 = vmatpush1.bf16.msra.mxu1 %v5741_v41  ;;  %3124 = vmatprep.subr.bf16.mxu0 %v5752_v3  ;;  %v5833_v41 = vld [vmem:[#allocation11 + $0xc8] ss:$16 sps:$4 sm:$0xff]   ;;  %v5836_v3 = vld [vmem:[#allocation11 + $0xe0] ss:$16 sps:$4 sm:$0xff]  }
 0x9dc   :  { %3095 = vmatprep.subr.bf16.mxu1 %v5749_v46  ;;  %v5841_v46 = vld [vmem:[#allocation11 + $0xec] ss:$16 sps:$4 sm:$0xff]  }
 0x9de   :  { %3125 = vmatpush1.bf16.msra.mxu0 %v5750_v23  ;;  %v1974_v23 = vpack.c.bf16 %v6966_v39, %v6966_v39 }
 0x9df   :  { %3096 = vmatpush1.bf16.msra.mxu1 %v5747_v4  ;;  %3126 = vmatprep.subr.bf16.mxu0 %v5758_v26  ;;  %v5839_v4 = vld [vmem:[#allocation11 + $0xe8] ss:$16 sps:$4 sm:$0xff]  }
 0x9e0   :  { %3097 = vmatprep.subr.bf16.mxu1 %v5755_v24 }
 0x9e2   :  { %3127 = vmatpush1.bf16.msra.mxu0 %v5756_v28 }
 0x9e3   :  { %3098 = vmatpush1.bf16.msra.mxu1 %v5753_v27  ;;  %3128 = vmatprep.subr.bf16.mxu0 %v5761_v29 }
 0x9e4   :  { %3149 = vmatprep.subr.bf16.mxu1 %v5764_v31 }
 0x9e6   :  { %3100 = vmatmul.mubr.bf16.vlgmr.msra.gmra.mrb[52].mxu1 %v6980_v6  ;;  %3129 = vmatpush1.bf16.msra.mxu0 %v5759_v32  ;;  %v5777_v6 = vld [vmem:[#allocation2 + $0x3a8] ss:$16 sps:$4 sm:$0xff]  }
 0x9e7   :  { %3150 = vmatpush1.bf16.msra.mxu1 %v5762_v8  ;;  %3130 = vmatprep.subr.bf16.mxu0 %v5767_v33 }
 0x9e8   :  { %3151 = vmatprep.subr.bf16.mxu1 %v5770_v9  ;;  %3181 = vmatprep.mubr.bf16.mxu1 %v7159_v62 }
 0x9ea   :  { %3131 = vmatpush1.bf16.msra.mxu0 %v5765_v34 }
 0x9eb   :  { %3152 = vmatpush1.bf16.msra.mxu1 %v5768_v11  ;;  %3132 = vmatprep.subr.bf16.mxu0 %v5773_v35 }
 0x9ec   :  { %3153 = vmatprep.subr.bf16.mxu1 %v5776_v12 }
 0x9ee   :  { %3133 = vmatpush1.bf16.msra.mxu0 %v5771_v36 }
 0x9ef   :  { %3154 = vmatpush1.bf16.msra.mxu1 %v5774_v13  ;;  %3134 = vmatprep.subr.bf16.mxu0 %v5779_v1 }
 0x9f0   :  { %3155 = vmatprep.subr.bf16.mxu1 %v5782_v2 }
 0x9f2   :  { %3135 = vmatpush1.bf16.msra.mxu0 %v5777_v6 }
 0x9f3   :  { %3156 = vmatpush1.bf16.msra.mxu1 %v5780_v14  ;;  %3136 = vmatprep.subr.bf16.mxu0 %v5785_v16 }
 0x9f4   :  { %3157 = vmatprep.subr.bf16.mxu1 %v5788_v17 }
 0x9f6   :  { %3137 = vmatpush1.bf16.msra.mxu0 %v5783_v19 }
 0x9f7   :  { %3158 = vmatpush1.bf16.msra.mxu1 %v5786_v21  ;;  %3138 = vmatprep.subr.bf16.mxu0 %v5791_v22 }
 0x9f8   :  { %5142 = vmatprep.subr.msk.bf16.mxu1 %vm2931_vm2, %v5139_v45 }
 0x9fa   :  { %3139 = vmatpush1.bf16.msra.mxu0 %v5789_v49 }
 0x9fb   :  { %3160 = vmatpush1.bf16.msra.mxu1 %v2939_v48  ;;  %3350 = vmatprep.subr.bf16.mxu0 %v5796_v50 }
 0x9fc   :  { %3391 = vmatprep.subr.bf16.mxu1 %v5799_v37  ;;  %v3432_v37 = vld [vmem:[#allocation13] sm:$0xf] }
 0x9fd   :  { %3141 = vmatmul.mubr.bf16.vlgmr.msra.gmra.mrb[56].mxu0 %v6982_v7  ;;  %v5814_v7 = vld [vmem:[#allocation11 + $0x64] ss:$16 sps:$4 sm:$0xff]  }
 0x9fe   :  { %5143 = vmatmul.mubr.msk.bf16.vlgmr.msra.gmra.mrb[56].mxu1 %vm2927_vm3, %v6993_v40  ;;  %3351 = vmatpush1.bf16.msra.mxu0 %v5794_v42  ;;  %v5817_v40 = vld [vmem:[#allocation11 + $0x6c] ss:$16 sps:$4 sm:$0xff]  }
 0x9ff   :  { %3392 = vmatpush1.bf16.msra.mxu1 %v5797_v51  ;;  %3352 = vmatprep.subr.bf16.mxu0 %v5802_v44  ;;  %v7181_v42 = vld [vmem:[#allocation47_spill] sm:$0xff]  ;;  %v7182_v44 = vld [vmem:[#allocation45_spill] sm:$0xff] }
 0xa00   :  { %3393 = vmatprep.subr.bf16.mxu1 %v5805_v52  ;;  %3382 = vmatprep.mubr.bf16.mxu0 %v7159_v62  ;;  %v3437_v51 = vrot.slane %v3432_v37, %v7181_v42  ;;  %v3445_v52 = vrot.slane %v3432_v37, %v7182_v44 }
 0xa01   :  { %3423 = vmatprep.mubr.bf16.mxu1 %v7159_v62  ;;  %v5821_v62 = vld [vmem:[#allocation11 + $0x88] ss:$16 sps:$4 sm:$0xff]  }
 0xa02   :  { %3353 = vmatpush1.bf16.msra.mxu0 %v5800_v55 }
 0xa03   :  { %3394 = vmatpush1.bf16.msra.mxu1 %v5803_v57  ;;  %3354 = vmatprep.subr.bf16.mxu0 %v5808_v59  ;;  %v7183_v59 = vld [vmem:[#allocation48_spill] sm:$0xff] }
 0xa04   :  { %3395 = vmatprep.subr.bf16.mxu1 %v5811_v43  ;;  %v3441_v43 = vrot.slane %v3432_v37, %v7183_v59 }
 0xa06   :  { %3355 = vmatpush1.bf16.msra.mxu0 %v5806_v63  ;;  %v7184_v63 = vld [vmem:[#allocation46_spill] sm:$0xff] }
 0xa07   :  { %3396 = vmatpush1.bf16.msra.mxu1 %v5809_v5  ;;  %3356 = vmatprep.subr.bf16.mxu0 %v5814_v7  ;;  %v3449_v5 = vrot.slane %v3432_v37, %v7184_v63 }
 0xa08   :  { %3397 = vmatprep.subr.bf16.mxu1 %v5817_v40 }
 0xa0a   :  { %3357 = vmatpush1.bf16.msra.mxu0 %v5812_v15 }
 0xa0b   :  { %3398 = vmatpush1.bf16.msra.mxu1 %v5815_v60  ;;  %3358 = vmatprep.subr.bf16.mxu0 %v5820_v25 }
 0xa0c   :  { %3399 = vmatprep.subr.bf16.mxu1 %v5823_v61 }
 0xa0e   :  { %3359 = vmatpush1.bf16.msra.mxu0 %v5818_v10 }
 0xa0f   :  { %3400 = vmatpush1.bf16.msra.mxu1 %v5821_v62  ;;  %3360 = vmatprep.subr.bf16.mxu0 %v5826_v54 }
 0xa10   :  { %3401 = vmatprep.subr.bf16.mxu1 %v5829_v30 }
 0xa12   :  { %3361 = vmatpush1.bf16.msra.mxu0 %v5824_v53 }
 0xa13   :  { %3402 = vmatpush1.bf16.msra.mxu1 %v5827_v58  ;;  %3362 = vmatprep.subr.bf16.mxu0 %v5832_v56 }
 0xa14   :  { %3403 = vmatprep.subr.bf16.mxu1 %v5835_v38 }
 0xa16   :  { %3363 = vmatpush1.bf16.msra.mxu0 %v5830_v0 }
 0xa17   :  { %3404 = vmatpush1.bf16.msra.mxu1 %v5833_v41  ;;  %3364 = vmatprep.subr.bf16.mxu0 %v5838_v20 }
 0xa18   :  { %3405 = vmatprep.subr.bf16.mxu1 %v5841_v46 }
 0xa1a   :  { %3365 = vmatpush1.bf16.msra.mxu0 %v5836_v3 }
 0xa1b   :  { %3406 = vmatpush1.bf16.msra.mxu1 %v5839_v4 }
 0xa1d   :  { %3383 = vmatmul.mubr.bf16.vlgmr.msra.gmra.mrb[60].mxu0 %v1974_v23 }
 0xa1e   :  { %3424 = vmatmul.mubr.bf16.vlgmr.msra.gmra.mrb[60].mxu1 %v1974_v23 }
 0xa78   :  { %v2978_v24 = vpop.f32.mrb[48].mxu0 }
 0xa79   :  { %v3019_v26 = vpop.f32.mrb[48].mxu1  ;;  %v2980_v28 = vpop.f32.mrb[49].mxu0 }
 0xa7a   :  { %v3020_v27 = vadd.f32 %v3019_v26, %v2978_v24  ;;  %v3021_v29 = vpop.f32.mrb[49].mxu1  ;;  %v2982_v32 = vpop.f32.mrb[50].mxu0 }
 0xa7b   :  { %v3022_v31 = vadd.f32 %v3021_v29, %v2980_v28  ;;  %v3023_v8 = vpop.f32.mrb[50].mxu1  ;;  %v2983_v33 = vpop.f32.mrb[51].mxu0 }
 0xa7c   :  { %v3024_v9 = vpop.f32.mrb[51].mxu1 }
 0xa90   :  { %v3060_v34 = vpop.f32.mrb[52].mxu0 }
 0xa91   :  { %v3061_v11 = vadd.f32 %v3060_v34, %v3020_v27  ;;  %v3062_v35 = vpop.f32.mrb[53].mxu0 }
 0xa92   :  { %v3063_v12 = vadd.f32 %v3062_v35, %v3022_v31  ;;  %v3064_v36 = vpop.f32.mrb[54].mxu0 }
 0xa93   :  { %v3065_v39 = vpop.f32.mrb[55].mxu0 }
 0xab9   :  { %v3101_v13 = vpop.f32.mrb[52].mxu1 }
 0xaba   :  { %v3103_v1 = vpop.f32.mrb[53].mxu1 }
 0xabb   :  { %v3105_v2 = vpop.f32.mrb[54].mxu1 }
 0xabc   :  { %v3106_v6 = vpop.f32.mrb[55].mxu1 }
 0xad0   :  { %v3142_v14 = vpop.f32.mrb[56].mxu0 }
 0xad1   :  { %v3183_v16 = vpop.f32.mrb[56].mxu1  ;;  %v3143_v17 = vadd.f32 %v3142_v14, %v3101_v13  ;;  %v3144_v18 = vpop.f32.mrb[57].mxu0 }
 0xad2   :  { %v3185_v19 = vpop.f32.mrb[57].mxu1  ;;  %v3145_v21 = vadd.f32 %v3144_v18, %v3103_v1  ;;  %v3146_v22 = vpop.f32.mrb[58].mxu0 }
 0xad3   :  { %v3187_v45 = vpop.f32.mrb[58].mxu1  ;;  %v3184_v47 = vadd.f32 %v3183_v16, %v3143_v17  ;;  %v3147_v49 = vpop.f32.mrb[59].mxu0 }
 0xad4   :  { %v3188_v48 = vpop.f32.mrb[59].mxu1  ;;  %v3186_v50 = vadd.f32 %v3185_v19, %v3145_v21 }
 0xaf0   :  { %v3384_v55 = vpop.f32.mrb[60].mxu0 }
 0xaf1   :  { %v3425_v57 = vpop.f32.mrb[60].mxu1  ;;  %v3385_v7 = vadd.f32 %v3384_v55, %v3061_v11  ;;  %v3386_v15 = vpop.f32.mrb[61].mxu0 }
 0xaf2   :  { %v3426_v40 = vadd.f32 %v3425_v57, %v3184_v47  ;;  %v3427_v60 = vpop.f32.mrb[61].mxu1  ;;  %v3387_v25 = vadd.f32 %v3386_v15, %v3063_v12  ;;  %v3388_v10 = vpop.f32.mrb[62].mxu0 }
 0xaf3   :  { %v3428_v61 = vadd.f32 %v3427_v60, %v3186_v50  ;;  %v3429_v62 = vpop.f32.mrb[62].mxu1  ;;  %v7013_v54 = vadd.f32 %v3437_v51, %v3385_v7  ;;  %v3389_v53 = vpop.f32.mrb[63].mxu0 }
 0xaf4   :  { %v7015_v30 = vadd.f32 %v3445_v52, %v3426_v40  ;;  %v3430_v58 = vpop.f32.mrb[63].mxu1  ;;  %v3455_v56 = vadd.f32 %v3441_v43, %v3387_v25 }
 0xaf5   :  { %v7017_v38 = vadd.f32 %v3449_v5, %v3428_v61  ;;  %v3458_v0 = vmax.f32 %v7013_v54, 0.0 }
 0xaf6   :  { %v3460_v41 = vmax.f32 %v7015_v30, 0.0  ;;  %v3459_v20 = vmax.f32 %v3455_v56, 0.0 }
 0xaf7   :  { %v3461_v46 = vmax.f32 %v7017_v38, 0.0 }
 0xaf8   :  { %6098 = dma.done.wait [#allocation4 + $0x1], 16384 }
 0xaf9   :  { %6099 = vsyncadd [#allocation4 + $0x1], 4294950912  ;;  %v3467_v3 = vpack.c.bf16 %v3459_v20, %v3459_v20  ;;  %v3471_v4 = vld [vmem:[#allocation3 + $0x8] sm:$0xff]  ;;  %v3473_v23 = vld [vmem:[#allocation3 + $0x18] sm:$0xff] }
 0xafa   :  { %v3470_v24 = vld [vmem:[#allocation3] sm:$0xff]  ;;  %3620 = vmatprep.subr.bf16.mxu0 %v3471_v4  ;;  %3702 = vmatprep.subr.bf16.mxu1 %v3473_v23  ;;  %v3472_v26 = vld [vmem:[#allocation3 + $0x10] sm:$0xff]  ;;  %v3475_v27 = vld [vmem:[#allocation3 + $0x28] sm:$0xff] }
 0xafb   :  { %3652 = vmatprep.mubr.bf16.mxu0 %v3467_v3  ;;  %3734 = vmatprep.mubr.bf16.mxu1 %v3467_v3  ;;  %v3477_v28 = vld [vmem:[#allocation3 + $0x38] sm:$0xff]  ;;  %v3474_v29 = vld [vmem:[#allocation3 + $0x20] sm:$0xff]  ;;  %v3476_v31 = vld [vmem:[#allocation3 + $0x30] sm:$0xff] }
 0xafc   :  { %3621 = vmatpush1.bf16.msra.mxu0 %v3470_v24  ;;  %3703 = vmatpush1.bf16.msra.mxu1 %v3472_v26  ;;  %v3479_v32 = vld [vmem:[#allocation3 + $0x48] sm:$0xff]  ;;  %v3481_v8 = vld [vmem:[#allocation3 + $0x58] sm:$0xff]  ;;  %v3478_v33 = vld [vmem:[#allocation3 + $0x40] sm:$0xff] }
 0xafd   :  { %3622 = vmatprep.subr.bf16.mxu0 %v3475_v27  ;;  %3704 = vmatprep.subr.bf16.mxu1 %v3477_v28  ;;  %v3480_v9 = vld [vmem:[#allocation3 + $0x50] sm:$0xff]  ;;  %v3483_v34 = vld [vmem:[#allocation3 + $0x68] sm:$0xff]  ;;  %v3485_v11 = vld [vmem:[#allocation3 + $0x78] sm:$0xff] }
 0xafe   :  { %v3482_v35 = vld [vmem:[#allocation3 + $0x60] sm:$0xff]  ;;  %v3484_v12 = vld [vmem:[#allocation3 + $0x70] sm:$0xff]  ;;  %v3487_v36 = vld [vmem:[#allocation3 + $0x88] sm:$0xff] }
 0xaff   :  { %v3489_v39 = vld [vmem:[#allocation3 + $0x98] sm:$0xff]  ;;  %v3486_v13 = vld [vmem:[#allocation3 + $0x80] sm:$0xff]  ;;  %v3488_v1 = vld [vmem:[#allocation3 + $0x90] sm:$0xff] }
 0xb00   :  { %3623 = vmatpush1.bf16.msra.mxu0 %v3474_v29  ;;  %3705 = vmatpush1.bf16.msra.mxu1 %v3476_v31  ;;  %v3491_v2 = vld [vmem:[#allocation3 + $0xa8] sm:$0xff]  ;;  %v3493_v6 = vld [vmem:[#allocation3 + $0xb8] sm:$0xff]  ;;  %v3490_v14 = vld [vmem:[#allocation3 + $0xa0] sm:$0xff] }
 0xb01   :  { %3624 = vmatprep.subr.bf16.mxu0 %v3479_v32  ;;  %3706 = vmatprep.subr.bf16.mxu1 %v3481_v8  ;;  %v3492_v16 = vld [vmem:[#allocation3 + $0xb0] sm:$0xff]  ;;  %v3495_v17 = vld [vmem:[#allocation3 + $0xc8] sm:$0xff]  ;;  %v3497_v18 = vld [vmem:[#allocation3 + $0xd8] sm:$0xff] }
 0xb02   :  { %v3494_v19 = vld [vmem:[#allocation3 + $0xc0] sm:$0xff]  ;;  %v3496_v21 = vld [vmem:[#allocation3 + $0xd0] sm:$0xff]  ;;  %v3499_v22 = vld [vmem:[#allocation3 + $0xe8] sm:$0xff] }
 0xb03   :  { %v3501_v45 = vld [vmem:[#allocation3 + $0xf8] sm:$0xff]  ;;  %v3498_v47 = vld [vmem:[#allocation3 + $0xe0] sm:$0xff]  ;;  %v3500_v49 = vld [vmem:[#allocation3 + $0xf0] sm:$0xff] }
 0xb04   :  { %3625 = vmatpush1.bf16.msra.mxu0 %v3478_v33  ;;  %3707 = vmatpush1.bf16.msra.mxu1 %v3480_v9  ;;  %v3503_v48 = vld [vmem:[#allocation3 + $0x108] sm:$0xff]  ;;  %v3505_v50 = vld [vmem:[#allocation3 + $0x118] sm:$0xff]  ;;  %v3502_v37 = vld [vmem:[#allocation3 + $0x100] sm:$0xff] }
 0xb05   :  { %3626 = vmatprep.subr.bf16.mxu0 %v3483_v34  ;;  %3708 = vmatprep.subr.bf16.mxu1 %v3485_v11  ;;  %v3504_v51 = vld [vmem:[#allocation3 + $0x110] sm:$0xff]  ;;  %v3507_v52 = vld [vmem:[#allocation3 + $0x128] sm:$0xff]  ;;  %v3509_v55 = vld [vmem:[#allocation3 + $0x138] sm:$0xff]  ;;  %v3466_v34 = vpack.c.bf16 %v3458_v0, %v3458_v0 }
 0xb06   :  { %v3506_v57 = vld [vmem:[#allocation3 + $0x120] sm:$0xff]  ;;  %v3508_v43 = vld [vmem:[#allocation3 + $0x130] sm:$0xff]  ;;  %v3511_v5 = vld [vmem:[#allocation3 + $0x148] sm:$0xff] }
 0xb07   :  { %v3513_v7 = vld [vmem:[#allocation3 + $0x158] sm:$0xff]  ;;  %v3510_v40 = vld [vmem:[#allocation3 + $0x140] sm:$0xff]  ;;  %v3512_v15 = vld [vmem:[#allocation3 + $0x150] sm:$0xff] }
 0xb08   :  { %3627 = vmatpush1.bf16.msra.mxu0 %v3482_v35  ;;  %3709 = vmatpush1.bf16.msra.mxu1 %v3484_v12  ;;  %v3515_v60 = vld [vmem:[#allocation3 + $0x168] sm:$0xff]  ;;  %v3517_v25 = vld [vmem:[#allocation3 + $0x178] sm:$0xff]  ;;  %v3514_v61 = vld [vmem:[#allocation3 + $0x160] sm:$0xff] }
 0xb09   :  { %3628 = vmatprep.subr.bf16.mxu0 %v3487_v36  ;;  %3710 = vmatprep.subr.bf16.mxu1 %v3489_v39  ;;  %v3516_v10 = vld [vmem:[#allocation3 + $0x170] sm:$0xff]  ;;  %v3519_v62 = vld [vmem:[#allocation3 + $0x188] sm:$0xff]  ;;  %v3521_v53 = vld [vmem:[#allocation3 + $0x198] sm:$0xff]  ;;  %v3469_v39 = vpack.c.bf16 %v3461_v46, %v3461_v46 }
 0xb0a   :  { %v3518_v58 = vld [vmem:[#allocation3 + $0x180] sm:$0xff]  ;;  %v3520_v56 = vld [vmem:[#allocation3 + $0x190] sm:$0xff]  ;;  %v3523_v20 = vld [vmem:[#allocation3 + $0x1a8] sm:$0xff] }
 0xb0b   :  { %v3525_v3 = vld [vmem:[#allocation3 + $0x1b8] sm:$0xff]  ;;  %v3522_v4 = vld [vmem:[#allocation3 + $0x1a0] sm:$0xff]  ;;  %v3524_v23 = vld [vmem:[#allocation3 + $0x1b0] sm:$0xff] }
 0xb0c   :  { %3629 = vmatpush1.bf16.msra.mxu0 %v3486_v13  ;;  %3711 = vmatpush1.bf16.msra.mxu1 %v3488_v1  ;;  %v3527_v24 = vld [vmem:[#allocation3 + $0x1c8] sm:$0xff]  ;;  %v3529_v26 = vld [vmem:[#allocation3 + $0x1d8] sm:$0xff]  ;;  %v3526_v27 = vld [vmem:[#allocation3 + $0x1c0] sm:$0xff] }
 0xb0d   :  { %3630 = vmatprep.subr.bf16.mxu0 %v3491_v2  ;;  %3712 = vmatprep.subr.bf16.mxu1 %v3493_v6  ;;  %v3528_v28 = vld [vmem:[#allocation3 + $0x1d0] sm:$0xff]  ;;  %v3531_v29 = vld [vmem:[#allocation3 + $0x1e8] sm:$0xff]  ;;  %v3533_v31 = vld [vmem:[#allocation3 + $0x1f8] sm:$0xff] }
 0xb0e   :  { %v3530_v32 = vld [vmem:[#allocation3 + $0x1e0] sm:$0xff]  ;;  %v3532_v8 = vld [vmem:[#allocation3 + $0x1f0] sm:$0xff]  ;;  %v3535_v33 = vld [vmem:[#allocation3 + $0x208] sm:$0xff] }
 0xb0f   :  { %v3537_v9 = vld [vmem:[#allocation3 + $0x218] sm:$0xff]  ;;  %v3534_v11 = vld [vmem:[#allocation3 + $0x200] sm:$0xff]  ;;  %v3536_v35 = vld [vmem:[#allocation3 + $0x210] sm:$0xff] }
 0xb10   :  { %3631 = vmatpush1.bf16.msra.mxu0 %v3490_v14  ;;  %3713 = vmatpush1.bf16.msra.mxu1 %v3492_v16  ;;  %v3539_v12 = vld [vmem:[#allocation3 + $0x228] sm:$0xff]  ;;  %v3541_v36 = vld [vmem:[#allocation3 + $0x238] sm:$0xff]  ;;  %v3538_v54 = vld [vmem:[#allocation3 + $0x220] sm:$0xff] }
 0xb11   :  { %3632 = vmatprep.subr.bf16.mxu0 %v3495_v17  ;;  %3714 = vmatprep.subr.bf16.mxu1 %v3497_v18  ;;  %v3540_v0 = vld [vmem:[#allocation3 + $0x230] sm:$0xff]  ;;  %v3543_v13 = vld [vmem:[#allocation3 + $0x248] sm:$0xff]  ;;  %v3545_v1 = vld [vmem:[#allocation3 + $0x258] sm:$0xff] }
 0xb12   :  { %v3542_v2 = vld [vmem:[#allocation3 + $0x240] sm:$0xff]  ;;  %v3544_v38 = vld [vmem:[#allocation3 + $0x250] sm:$0xff]  ;;  %v3547_v6 = vld [vmem:[#allocation3 + $0x268] sm:$0xff] }
 0xb13   :  { %v3549_v46 = vld [vmem:[#allocation3 + $0x278] sm:$0xff]  ;;  %v3546_v14 = vld [vmem:[#allocation3 + $0x260] sm:$0xff]  ;;  %v3548_v16 = vld [vmem:[#allocation3 + $0x270] sm:$0xff] }
 0xb14   :  { %3633 = vmatpush1.bf16.msra.mxu0 %v3494_v19  ;;  %3715 = vmatpush1.bf16.msra.mxu1 %v3496_v21  ;;  %v3551_v17 = vld [vmem:[#allocation3 + $0x288] sm:$0xff]  ;;  %v3553_v18 = vld [vmem:[#allocation3 + $0x298] sm:$0xff]  ;;  %v3550_v19 = vld [vmem:[#allocation3 + $0x280] sm:$0xff] }
 0xb15   :  { %3634 = vmatprep.subr.bf16.mxu0 %v3499_v22  ;;  %3716 = vmatprep.subr.bf16.mxu1 %v3501_v45  ;;  %v3552_v21 = vld [vmem:[#allocation3 + $0x290] sm:$0xff]  ;;  %v3555_v22 = vld [vmem:[#allocation3 + $0x2a8] sm:$0xff]  ;;  %v3557_v45 = vld [vmem:[#allocation3 + $0x2b8] sm:$0xff] }
 0xb18   :  { %3635 = vmatpush1.bf16.msra.mxu0 %v3498_v47  ;;  %3717 = vmatpush1.bf16.msra.mxu1 %v3500_v49  ;;  %v3554_v47 = vld [vmem:[#allocation3 + $0x2a0] sm:$0xff]  ;;  %v3556_v49 = vld [vmem:[#allocation3 + $0x2b0] sm:$0xff] }
 0xb19   :  { %3636 = vmatprep.subr.bf16.mxu0 %v3503_v48  ;;  %3718 = vmatprep.subr.bf16.mxu1 %v3505_v50  ;;  %v3559_v48 = vld [vmem:[#allocation3 + $0x2c8] sm:$0xff]  ;;  %v3561_v50 = vld [vmem:[#allocation3 + $0x2d8] sm:$0xff] }
 0xb1c   :  { %3637 = vmatpush1.bf16.msra.mxu0 %v3502_v37  ;;  %3719 = vmatpush1.bf16.msra.mxu1 %v3504_v51  ;;  %v3558_v37 = vld [vmem:[#allocation3 + $0x2c0] sm:$0xff]  ;;  %v3560_v51 = vld [vmem:[#allocation3 + $0x2d0] sm:$0xff] }
 0xb1d   :  { %3638 = vmatprep.subr.bf16.mxu0 %v3507_v52  ;;  %3720 = vmatprep.subr.bf16.mxu1 %v3509_v55  ;;  %v3563_v52 = vld [vmem:[#allocation3 + $0x2e8] sm:$0xff]  ;;  %v3565_v55 = vld [vmem:[#allocation3 + $0x2f8] sm:$0xff] }
 0xb20   :  { %3639 = vmatpush1.bf16.msra.mxu0 %v3506_v57  ;;  %3721 = vmatpush1.bf16.msra.mxu1 %v3508_v43  ;;  %v3562_v57 = vld [vmem:[#allocation3 + $0x2e0] sm:$0xff]  ;;  %v3564_v43 = vld [vmem:[#allocation3 + $0x2f0] sm:$0xff] }
 0xb21   :  { %3640 = vmatprep.subr.bf16.mxu0 %v3511_v5  ;;  %3722 = vmatprep.subr.bf16.mxu1 %v3513_v7  ;;  %v3567_v5 = vld [vmem:[#allocation3 + $0x308] sm:$0xff]  ;;  %v3569_v7 = vld [vmem:[#allocation3 + $0x318] sm:$0xff] }
 0xb24   :  { %3641 = vmatpush1.bf16.msra.mxu0 %v3510_v40  ;;  %3723 = vmatpush1.bf16.msra.mxu1 %v3512_v15  ;;  %v3566_v40 = vld [vmem:[#allocation3 + $0x300] sm:$0xff]  ;;  %v3568_v15 = vld [vmem:[#allocation3 + $0x310] sm:$0xff] }
 0xb25   :  { %3642 = vmatprep.subr.bf16.mxu0 %v3515_v60  ;;  %3724 = vmatprep.subr.bf16.mxu1 %v3517_v25  ;;  %v3571_v60 = vld [vmem:[#allocation3 + $0x328] sm:$0xff]  ;;  %v3573_v25 = vld [vmem:[#allocation3 + $0x338] sm:$0xff] }
 0xb28   :  { %3643 = vmatpush1.bf16.msra.mxu0 %v3514_v61  ;;  %3725 = vmatpush1.bf16.msra.mxu1 %v3516_v10  ;;  %v3570_v61 = vld [vmem:[#allocation3 + $0x320] sm:$0xff]  ;;  %v3572_v10 = vld [vmem:[#allocation3 + $0x330] sm:$0xff] }
 0xb29   :  { %3644 = vmatprep.subr.bf16.mxu0 %v3519_v62  ;;  %3726 = vmatprep.subr.bf16.mxu1 %v3521_v53  ;;  %v3575_v62 = vld [vmem:[#allocation3 + $0x348] sm:$0xff]  ;;  %v3577_v53 = vld [vmem:[#allocation3 + $0x358] sm:$0xff] }
 0xb2c   :  { %3645 = vmatpush1.bf16.msra.mxu0 %v3518_v58  ;;  %3727 = vmatpush1.bf16.msra.mxu1 %v3520_v56  ;;  %v3574_v58 = vld [vmem:[#allocation3 + $0x340] sm:$0xff]  ;;  %v3576_v56 = vld [vmem:[#allocation3 + $0x350] sm:$0xff] }
 0xb2d   :  { %3646 = vmatprep.subr.bf16.mxu0 %v3523_v20  ;;  %3728 = vmatprep.subr.bf16.mxu1 %v3525_v3  ;;  %v3579_v20 = vld [vmem:[#allocation3 + $0x368] sm:$0xff]  ;;  %v3581_v3 = vld [vmem:[#allocation3 + $0x378] sm:$0xff] }
 0xb30   :  { %3647 = vmatpush1.bf16.msra.mxu0 %v3522_v4  ;;  %3729 = vmatpush1.bf16.msra.mxu1 %v3524_v23  ;;  %v3578_v4 = vld [vmem:[#allocation3 + $0x360] sm:$0xff]  ;;  %v3580_v23 = vld [vmem:[#allocation3 + $0x370] sm:$0xff] }
 0xb31   :  { %3648 = vmatprep.subr.bf16.mxu0 %v3527_v24  ;;  %3730 = vmatprep.subr.bf16.mxu1 %v3529_v26  ;;  %v3583_v24 = vld [vmem:[#allocation3 + $0x388] sm:$0xff]  ;;  %v3585_v26 = vld [vmem:[#allocation3 + $0x398] sm:$0xff] }
 0xb34   :  { %3649 = vmatpush1.bf16.msra.mxu0 %v3526_v27  ;;  %3731 = vmatpush1.bf16.msra.mxu1 %v3528_v28  ;;  %v3582_v27 = vld [vmem:[#allocation3 + $0x380] sm:$0xff]  ;;  %v3584_v28 = vld [vmem:[#allocation3 + $0x390] sm:$0xff] }
 0xb35   :  { %3650 = vmatprep.subr.bf16.mxu0 %v3531_v29  ;;  %3732 = vmatprep.subr.bf16.mxu1 %v3533_v31  ;;  %v3587_v29 = vld [vmem:[#allocation3 + $0x3a8] sm:$0xff]  ;;  %v3589_v31 = vld [vmem:[#allocation3 + $0x3b8] sm:$0xff] }
 0xb38   :  { %3651 = vmatpush1.bf16.msra.mxu0 %v3530_v32  ;;  %3733 = vmatpush1.bf16.msra.mxu1 %v3532_v8  ;;  %v3586_v32 = vld [vmem:[#allocation3 + $0x3a0] sm:$0xff]  ;;  %v3588_v8 = vld [vmem:[#allocation3 + $0x3b0] sm:$0xff] }
 0xb39   :  { %3661 = vmatprep.subr.bf16.mxu0 %v3535_v33  ;;  %3743 = vmatprep.subr.bf16.mxu1 %v3537_v9  ;;  %v3591_v33 = vld [vmem:[#allocation3 + $0x3c8] sm:$0xff]  ;;  %v3593_v9 = vld [vmem:[#allocation3 + $0x3d8] sm:$0xff] }
 0xb3b   :  { %3653 = vmatmul.mubr.bf16.vlgmr.msra.gmra.mrb[64].mxu0 %v3466_v34  ;;  %3735 = vmatmul.mubr.bf16.vlgmr.msra.gmra.mrb[64].mxu1 %v3466_v34  ;;  %v3590_v34 = vld [vmem:[#allocation3 + $0x3c0] sm:$0xff] }
 0xb3c   :  { %3662 = vmatpush1.bf16.msra.mxu0 %v3534_v11  ;;  %3744 = vmatpush1.bf16.msra.mxu1 %v3536_v35  ;;  %v3592_v11 = vld [vmem:[#allocation3 + $0x3d0] sm:$0xff]  ;;  %v3595_v35 = vld [vmem:[#allocation3 + $0x3e8] sm:$0xff] }
 0xb3d   :  { %3663 = vmatprep.subr.bf16.mxu0 %v3539_v12  ;;  %3745 = vmatprep.subr.bf16.mxu1 %v3541_v36  ;;  %v3597_v12 = vld [vmem:[#allocation3 + $0x3f8] sm:$0xff]  ;;  %v3594_v36 = vld [vmem:[#allocation3 + $0x3e0] sm:$0xff] }
 0xb3e   :  { %3693 = vmatprep.mubr.bf16.mxu0 %v3469_v39  ;;  %3775 = vmatprep.mubr.bf16.mxu1 %v3469_v39  ;;  %v3596_v39 = vld [vmem:[#allocation3 + $0x3f0] sm:$0xff] }
 0xb40   :  { %3664 = vmatpush1.bf16.msra.mxu0 %v3538_v54  ;;  %3746 = vmatpush1.bf16.msra.mxu1 %v3540_v0  ;;  %v3468_v54 = vpack.c.bf16 %v3460_v41, %v3460_v41  ;;  %v3598_v0 = vld [vmem:[#allocation14] sm:$0xf] }
 0xb41   :  { %3665 = vmatprep.subr.bf16.mxu0 %v3543_v13  ;;  %3747 = vmatprep.subr.bf16.mxu1 %v3545_v1  ;;  %v3603_v13 = vrot.slane %v3598_v0, %v7181_v42  ;;  %v3611_v1 = vrot.slane %v3598_v0, %v7182_v44 }
 0xb44   :  { %3666 = vmatpush1.bf16.msra.mxu0 %v3542_v2  ;;  %3748 = vmatpush1.bf16.msra.mxu1 %v3544_v38  ;;  %v3607_v2 = vrot.slane %v3598_v0, %v7183_v59  ;;  %v3615_v38 = vrot.slane %v3598_v0, %v7184_v63 }
 0xb45   :  { %3667 = vmatprep.subr.bf16.mxu0 %v3547_v6  ;;  %3749 = vmatprep.subr.bf16.mxu1 %v3549_v46 }
 0xb48   :  { %3668 = vmatpush1.bf16.msra.mxu0 %v3546_v14  ;;  %3750 = vmatpush1.bf16.msra.mxu1 %v3548_v16 }
 0xb49   :  { %3669 = vmatprep.subr.bf16.mxu0 %v3551_v17  ;;  %3751 = vmatprep.subr.bf16.mxu1 %v3553_v18 }
 0xb4c   :  { %3670 = vmatpush1.bf16.msra.mxu0 %v3550_v19  ;;  %3752 = vmatpush1.bf16.msra.mxu1 %v3552_v21 }
 0xb4d   :  { %3671 = vmatprep.subr.bf16.mxu0 %v3555_v22  ;;  %3753 = vmatprep.subr.bf16.mxu1 %v3557_v45 }
 0xb50   :  { %3672 = vmatpush1.bf16.msra.mxu0 %v3554_v47  ;;  %3754 = vmatpush1.bf16.msra.mxu1 %v3556_v49 }
 0xb51   :  { %3673 = vmatprep.subr.bf16.mxu0 %v3559_v48  ;;  %3755 = vmatprep.subr.bf16.mxu1 %v3561_v50 }
 0xb54   :  { %3674 = vmatpush1.bf16.msra.mxu0 %v3558_v37  ;;  %3756 = vmatpush1.bf16.msra.mxu1 %v3560_v51 }
 0xb55   :  { %3675 = vmatprep.subr.bf16.mxu0 %v3563_v52  ;;  %3757 = vmatprep.subr.bf16.mxu1 %v3565_v55 }
 0xb58   :  { %3676 = vmatpush1.bf16.msra.mxu0 %v3562_v57  ;;  %3758 = vmatpush1.bf16.msra.mxu1 %v3564_v43 }
 0xb59   :  { %3677 = vmatprep.subr.bf16.mxu0 %v3567_v5  ;;  %3759 = vmatprep.subr.bf16.mxu1 %v3569_v7 }
 0xb5c   :  { %3678 = vmatpush1.bf16.msra.mxu0 %v3566_v40  ;;  %3760 = vmatpush1.bf16.msra.mxu1 %v3568_v15 }
 0xb5d   :  { %3679 = vmatprep.subr.bf16.mxu0 %v3571_v60  ;;  %3761 = vmatprep.subr.bf16.mxu1 %v3573_v25 }
 0xb60   :  { %3680 = vmatpush1.bf16.msra.mxu0 %v3570_v61  ;;  %3762 = vmatpush1.bf16.msra.mxu1 %v3572_v10 }
 0xb61   :  { %3681 = vmatprep.subr.bf16.mxu0 %v3575_v62  ;;  %3763 = vmatprep.subr.bf16.mxu1 %v3577_v53 }
 0xb64   :  { %3682 = vmatpush1.bf16.msra.mxu0 %v3574_v58  ;;  %3764 = vmatpush1.bf16.msra.mxu1 %v3576_v56 }
 0xb65   :  { %3683 = vmatprep.subr.bf16.mxu0 %v3579_v20  ;;  %3765 = vmatprep.subr.bf16.mxu1 %v3581_v3 }
 0xb68   :  { %3684 = vmatpush1.bf16.msra.mxu0 %v3578_v4  ;;  %3766 = vmatpush1.bf16.msra.mxu1 %v3580_v23 }
 0xb69   :  { %3685 = vmatprep.subr.bf16.mxu0 %v3583_v24  ;;  %3767 = vmatprep.subr.bf16.mxu1 %v3585_v26 }
 0xb6c   :  { %3686 = vmatpush1.bf16.msra.mxu0 %v3582_v27  ;;  %3768 = vmatpush1.bf16.msra.mxu1 %v3584_v28 }
 0xb6d   :  { %3687 = vmatprep.subr.bf16.mxu0 %v3587_v29  ;;  %3769 = vmatprep.subr.bf16.mxu1 %v3589_v31 }
 0xb70   :  { %3688 = vmatpush1.bf16.msra.mxu0 %v3586_v32  ;;  %3770 = vmatpush1.bf16.msra.mxu1 %v3588_v8 }
 0xb71   :  { %3689 = vmatprep.subr.bf16.mxu0 %v3591_v33  ;;  %3771 = vmatprep.subr.bf16.mxu1 %v3593_v9 }
 0xb74   :  { %3690 = vmatpush1.bf16.msra.mxu0 %v3590_v34  ;;  %3772 = vmatpush1.bf16.msra.mxu1 %v3592_v11 }
 0xb75   :  { %3691 = vmatprep.subr.bf16.mxu0 %v3595_v35  ;;  %3773 = vmatprep.subr.bf16.mxu1 %v3597_v12 }
 0xb78   :  { %3692 = vmatpush1.bf16.msra.mxu0 %v3594_v36  ;;  %3774 = vmatpush1.bf16.msra.mxu1 %v3596_v39 }
 0xb7b   :  { %3694 = vmatmul.mubr.bf16.vlgmr.msra.gmra.mrb[64].mxu0 %v3468_v54  ;;  %3776 = vmatmul.mubr.bf16.vlgmr.msra.gmra.mrb[64].mxu1 %v3468_v54 }
 0xc4e   :  { %v3695_v6 = vpop.f32.mrb[64].mxu0  ;;  %v3777_v46 = vpop.f32.mrb[64].mxu1 }
 0xc4f   :  { %v7035_v14 = vadd.f32 %v3695_v6, %v3603_v13  ;;  %v7037_v30 = vadd.f32 %v3777_v46, %v3611_v1  ;;  %v3697_v41 = vpop.f32.mrb[65].mxu0  ;;  %v3779_v16 = vpop.f32.mrb[65].mxu1 }
 0xc50   :  { %v5183_v17 = vadd.f32 %v3697_v41, %v3607_v2  ;;  %v7039_v18 = vadd.f32 %v3779_v16, %v3615_v38  ;;  %v3699_v19 = vpop.f32.mrb[66].mxu0  ;;  %v3781_v21 = vpop.f32.mrb[66].mxu1 }
 0xc51   :  { %v3784_v22 = vmax.f32 %v7035_v14, 0.0  ;;  %v3786_v45 = vmax.f32 %v7037_v30, 0.0  ;;  %v3700_v47 = vpop.f32.mrb[67].mxu0  ;;  %v3782_v49 = vpop.f32.mrb[67].mxu1 }
 0xc52   :  { %v3785_v48 = vmax.f32 %v5183_v17, 0.0  ;;  %v3787_v50 = vmax.f32 %v7039_v18, 0.0 }
 0xc53   :  { %6100 = dma.done.wait [#allocation4 + $0x2], 16384 }
 0xc54   :  { %6101 = vsyncadd [#allocation4 + $0x2], 4294950912  ;;  %v3791_v37 = vpack.c.bf16 %v3785_v48, %v3785_v48  ;;  %v3795_v51 = vld [vmem:[#allocation3 + $0x408] sm:$0xff]  ;;  %v3797_v52 = vld [vmem:[#allocation3 + $0x418] sm:$0xff] }
 0xc55   :  { %v3794_v55 = vld [vmem:[#allocation3 + $0x400] sm:$0xff]  ;;  %3944 = vmatprep.subr.bf16.mxu0 %v3795_v51  ;;  %4026 = vmatprep.subr.bf16.mxu1 %v3797_v52  ;;  %v3796_v57 = vld [vmem:[#allocation3 + $0x410] sm:$0xff]  ;;  %v3799_v43 = vld [vmem:[#allocation3 + $0x428] sm:$0xff] }
 0xc56   :  { %3976 = vmatprep.mubr.bf16.mxu0 %v3791_v37  ;;  %4058 = vmatprep.mubr.bf16.mxu1 %v3791_v37  ;;  %v3801_v5 = vld [vmem:[#allocation3 + $0x438] sm:$0xff]  ;;  %v3798_v7 = vld [vmem:[#allocation3 + $0x420] sm:$0xff]  ;;  %v3800_v40 = vld [vmem:[#allocation3 + $0x430] sm:$0xff] }
 0xc57   :  { %3945 = vmatpush1.bf16.msra.mxu0 %v3794_v55  ;;  %4027 = vmatpush1.bf16.msra.mxu1 %v3796_v57  ;;  %v3803_v15 = vld [vmem:[#allocation3 + $0x448] sm:$0xff]  ;;  %v3805_v60 = vld [vmem:[#allocation3 + $0x458] sm:$0xff]  ;;  %v3802_v25 = vld [vmem:[#allocation3 + $0x440] sm:$0xff] }
 0xc58   :  { %3946 = vmatprep.subr.bf16.mxu0 %v3799_v43  ;;  %4028 = vmatprep.subr.bf16.mxu1 %v3801_v5  ;;  %v3804_v61 = vld [vmem:[#allocation3 + $0x450] sm:$0xff]  ;;  %v3807_v10 = vld [vmem:[#allocation3 + $0x468] sm:$0xff]  ;;  %v3809_v62 = vld [vmem:[#allocation3 + $0x478] sm:$0xff] }
 0xc59   :  { %v3806_v53 = vld [vmem:[#allocation3 + $0x460] sm:$0xff]  ;;  %v3808_v58 = vld [vmem:[#allocation3 + $0x470] sm:$0xff]  ;;  %v3811_v56 = vld [vmem:[#allocation3 + $0x488] sm:$0xff] }
 0xc5a   :  { %v3813_v20 = vld [vmem:[#allocation3 + $0x498] sm:$0xff]  ;;  %v3810_v3 = vld [vmem:[#allocation3 + $0x480] sm:$0xff]  ;;  %v3812_v4 = vld [vmem:[#allocation3 + $0x490] sm:$0xff] }
 0xc5b   :  { %3947 = vmatpush1.bf16.msra.mxu0 %v3798_v7  ;;  %4029 = vmatpush1.bf16.msra.mxu1 %v3800_v40  ;;  %v3815_v23 = vld [vmem:[#allocation3 + $0x4a8] sm:$0xff]  ;;  %v3817_v24 = vld [vmem:[#allocation3 + $0x4b8] sm:$0xff]  ;;  %v3814_v26 = vld [vmem:[#allocation3 + $0x4a0] sm:$0xff] }
 0xc5c   :  { %3948 = vmatprep.subr.bf16.mxu0 %v3803_v15  ;;  %4030 = vmatprep.subr.bf16.mxu1 %v3805_v60  ;;  %v3816_v27 = vld [vmem:[#allocation3 + $0x4b0] sm:$0xff]  ;;  %v3819_v28 = vld [vmem:[#allocation3 + $0x4c8] sm:$0xff]  ;;  %v3821_v29 = vld [vmem:[#allocation3 + $0x4d8] sm:$0xff] }
 0xc5d   :  { %v3818_v31 = vld [vmem:[#allocation3 + $0x4c0] sm:$0xff]  ;;  %v3820_v32 = vld [vmem:[#allocation3 + $0x4d0] sm:$0xff]  ;;  %v3823_v8 = vld [vmem:[#allocation3 + $0x4e8] sm:$0xff] }
 0xc5e   :  { %v3825_v33 = vld [vmem:[#allocation3 + $0x4f8] sm:$0xff]  ;;  %v3822_v9 = vld [vmem:[#allocation3 + $0x4e0] sm:$0xff]  ;;  %v3824_v34 = vld [vmem:[#allocation3 + $0x4f0] sm:$0xff] }
 0xc5f   :  { %3949 = vmatpush1.bf16.msra.mxu0 %v3802_v25  ;;  %4031 = vmatpush1.bf16.msra.mxu1 %v3804_v61  ;;  %v3827_v11 = vld [vmem:[#allocation3 + $0x508] sm:$0xff]  ;;  %v3829_v35 = vld [vmem:[#allocation3 + $0x518] sm:$0xff]  ;;  %v3826_v12 = vld [vmem:[#allocation3 + $0x500] sm:$0xff] }
 0xc60   :  { %3950 = vmatprep.subr.bf16.mxu0 %v3807_v10  ;;  %4032 = vmatprep.subr.bf16.mxu1 %v3809_v62  ;;  %v3828_v36 = vld [vmem:[#allocation3 + $0x510] sm:$0xff]  ;;  %v3831_v39 = vld [vmem:[#allocation3 + $0x528] sm:$0xff]  ;;  %v3833_v54 = vld [vmem:[#allocation3 + $0x538] sm:$0xff]  ;;  %v3790_v10 = vpack.c.bf16 %v3784_v22, %v3784_v22 }
 0xc61   :  { %v3830_v0 = vld [vmem:[#allocation3 + $0x520] sm:$0xff]  ;;  %v3832_v13 = vld [vmem:[#allocation3 + $0x530] sm:$0xff]  ;;  %v3835_v1 = vld [vmem:[#allocation3 + $0x548] sm:$0xff] }
 0xc62   :  { %v3837_v2 = vld [vmem:[#allocation3 + $0x558] sm:$0xff]  ;;  %v3834_v38 = vld [vmem:[#allocation3 + $0x540] sm:$0xff]  ;;  %v3836_v6 = vld [vmem:[#allocation3 + $0x550] sm:$0xff] }
 0xc63   :  { %3951 = vmatpush1.bf16.msra.mxu0 %v3806_v53  ;;  %4033 = vmatpush1.bf16.msra.mxu1 %v3808_v58  ;;  %v3839_v46 = vld [vmem:[#allocation3 + $0x568] sm:$0xff]  ;;  %v3841_v41 = vld [vmem:[#allocation3 + $0x578] sm:$0xff]  ;;  %v3838_v16 = vld [vmem:[#allocation3 + $0x560] sm:$0xff] }
 0xc64   :  { %3952 = vmatprep.subr.bf16.mxu0 %v3811_v56  ;;  %4034 = vmatprep.subr.bf16.mxu1 %v3813_v20  ;;  %v3840_v17 = vld [vmem:[#allocation3 + $0x570] sm:$0xff]  ;;  %v3843_v19 = vld [vmem:[#allocation3 + $0x588] sm:$0xff]  ;;  %v3845_v21 = vld [vmem:[#allocation3 + $0x598] sm:$0xff]  ;;  %v3793_v20 = vpack.c.bf16 %v3787_v50, %v3787_v50 }
 0xc65   :  { %v3842_v47 = vld [vmem:[#allocation3 + $0x580] sm:$0xff]  ;;  %v3844_v49 = vld [vmem:[#allocation3 + $0x590] sm:$0xff]  ;;  %v3847_v48 = vld [vmem:[#allocation3 + $0x5a8] sm:$0xff] }
 0xc66   :  { %v3849_v37 = vld [vmem:[#allocation3 + $0x5b8] sm:$0xff]  ;;  %v3846_v51 = vld [vmem:[#allocation3 + $0x5a0] sm:$0xff]  ;;  %v3848_v52 = vld [vmem:[#allocation3 + $0x5b0] sm:$0xff] }
 0xc67   :  { %3953 = vmatpush1.bf16.msra.mxu0 %v3810_v3  ;;  %4035 = vmatpush1.bf16.msra.mxu1 %v3812_v4  ;;  %v3851_v55 = vld [vmem:[#allocation3 + $0x5c8] sm:$0xff]  ;;  %v3853_v57 = vld [vmem:[#allocation3 + $0x5d8] sm:$0xff]  ;;  %v3850_v43 = vld [vmem:[#allocation3 + $0x5c0] sm:$0xff] }
 0xc68   :  { %3954 = vmatprep.subr.bf16.mxu0 %v3815_v23  ;;  %4036 = vmatprep.subr.bf16.mxu1 %v3817_v24  ;;  %v3852_v5 = vld [vmem:[#allocation3 + $0x5d0] sm:$0xff]  ;;  %v3855_v7 = vld [vmem:[#allocation3 + $0x5e8] sm:$0xff]  ;;  %v3857_v40 = vld [vmem:[#allocation3 + $0x5f8] sm:$0xff] }
 0xc69   :  { %v3854_v15 = vld [vmem:[#allocation3 + $0x5e0] sm:$0xff]  ;;  %v3856_v60 = vld [vmem:[#allocation3 + $0x5f0] sm:$0xff]  ;;  %v3859_v25 = vld [vmem:[#allocation3 + $0x608] sm:$0xff] }
 0xc6a   :  { %v3861_v61 = vld [vmem:[#allocation3 + $0x618] sm:$0xff]  ;;  %v3858_v62 = vld [vmem:[#allocation3 + $0x600] sm:$0xff]  ;;  %v3860_v53 = vld [vmem:[#allocation3 + $0x610] sm:$0xff] }
 0xc6b   :  { %3955 = vmatpush1.bf16.msra.mxu0 %v3814_v26  ;;  %4037 = vmatpush1.bf16.msra.mxu1 %v3816_v27  ;;  %v3863_v58 = vld [vmem:[#allocation3 + $0x628] sm:$0xff]  ;;  %v3865_v56 = vld [vmem:[#allocation3 + $0x638] sm:$0xff]  ;;  %v3862_v14 = vld [vmem:[#allocation3 + $0x620] sm:$0xff] }
 0xc6c   :  { %3956 = vmatprep.subr.bf16.mxu0 %v3819_v28  ;;  %4038 = vmatprep.subr.bf16.mxu1 %v3821_v29  ;;  %v3864_v22 = vld [vmem:[#allocation3 + $0x630] sm:$0xff]  ;;  %v3867_v3 = vld [vmem:[#allocation3 + $0x648] sm:$0xff]  ;;  %v3869_v4 = vld [vmem:[#allocation3 + $0x658] sm:$0xff] }
 0xc6d   :  { %v3866_v23 = vld [vmem:[#allocation3 + $0x640] sm:$0xff]  ;;  %v3868_v18 = vld [vmem:[#allocation3 + $0x650] sm:$0xff]  ;;  %v3871_v24 = vld [vmem:[#allocation3 + $0x668] sm:$0xff] }
 0xc6e   :  { %v3873_v50 = vld [vmem:[#allocation3 + $0x678] sm:$0xff]  ;;  %v3870_v26 = vld [vmem:[#allocation3 + $0x660] sm:$0xff]  ;;  %v3872_v27 = vld [vmem:[#allocation3 + $0x670] sm:$0xff] }
 0xc6f   :  { %3957 = vmatpush1.bf16.msra.mxu0 %v3818_v31  ;;  %4039 = vmatpush1.bf16.msra.mxu1 %v3820_v32  ;;  %v3875_v28 = vld [vmem:[#allocation3 + $0x688] sm:$0xff]  ;;  %v3877_v29 = vld [vmem:[#allocation3 + $0x698] sm:$0xff]  ;;  %v3874_v31 = vld [vmem:[#allocation3 + $0x680] sm:$0xff] }
 0xc70   :  { %3958 = vmatprep.subr.bf16.mxu0 %v3823_v8  ;;  %4040 = vmatprep.subr.bf16.mxu1 %v3825_v33  ;;  %v3876_v32 = vld [vmem:[#allocation3 + $0x690] sm:$0xff]  ;;  %v3879_v8 = vld [vmem:[#allocation3 + $0x6a8] sm:$0xff]  ;;  %v3881_v33 = vld [vmem:[#allocation3 + $0x6b8] sm:$0xff] }
 0xc73   :  { %3959 = vmatpush1.bf16.msra.mxu0 %v3822_v9  ;;  %4041 = vmatpush1.bf16.msra.mxu1 %v3824_v34  ;;  %v3878_v9 = vld [vmem:[#allocation3 + $0x6a0] sm:$0xff]  ;;  %v3880_v34 = vld [vmem:[#allocation3 + $0x6b0] sm:$0xff] }
 0xc74   :  { %3960 = vmatprep.subr.bf16.mxu0 %v3827_v11  ;;  %4042 = vmatprep.subr.bf16.mxu1 %v3829_v35  ;;  %v3883_v11 = vld [vmem:[#allocation3 + $0x6c8] sm:$0xff]  ;;  %v3885_v35 = vld [vmem:[#allocation3 + $0x6d8] sm:$0xff] }
 0xc77   :  { %3961 = vmatpush1.bf16.msra.mxu0 %v3826_v12  ;;  %4043 = vmatpush1.bf16.msra.mxu1 %v3828_v36  ;;  %v3882_v12 = vld [vmem:[#allocation3 + $0x6c0] sm:$0xff]  ;;  %v3884_v36 = vld [vmem:[#allocation3 + $0x6d0] sm:$0xff] }
 0xc78   :  { %3962 = vmatprep.subr.bf16.mxu0 %v3831_v39  ;;  %4044 = vmatprep.subr.bf16.mxu1 %v3833_v54  ;;  %v3887_v39 = vld [vmem:[#allocation3 + $0x6e8] sm:$0xff]  ;;  %v3889_v54 = vld [vmem:[#allocation3 + $0x6f8] sm:$0xff] }
 0xc7b   :  { %3963 = vmatpush1.bf16.msra.mxu0 %v3830_v0  ;;  %4045 = vmatpush1.bf16.msra.mxu1 %v3832_v13  ;;  %v3886_v0 = vld [vmem:[#allocation3 + $0x6e0] sm:$0xff]  ;;  %v3888_v13 = vld [vmem:[#allocation3 + $0x6f0] sm:$0xff] }
 0xc7c   :  { %3964 = vmatprep.subr.bf16.mxu0 %v3835_v1  ;;  %4046 = vmatprep.subr.bf16.mxu1 %v3837_v2  ;;  %v3891_v1 = vld [vmem:[#allocation3 + $0x708] sm:$0xff]  ;;  %v3893_v2 = vld [vmem:[#allocation3 + $0x718] sm:$0xff] }
 0xc7f   :  { %3965 = vmatpush1.bf16.msra.mxu0 %v3834_v38  ;;  %4047 = vmatpush1.bf16.msra.mxu1 %v3836_v6  ;;  %v3890_v38 = vld [vmem:[#allocation3 + $0x700] sm:$0xff]  ;;  %v3892_v6 = vld [vmem:[#allocation3 + $0x710] sm:$0xff] }
 0xc80   :  { %3966 = vmatprep.subr.bf16.mxu0 %v3839_v46  ;;  %4048 = vmatprep.subr.bf16.mxu1 %v3841_v41  ;;  %v3895_v46 = vld [vmem:[#allocation3 + $0x728] sm:$0xff]  ;;  %v3897_v41 = vld [vmem:[#allocation3 + $0x738] sm:$0xff] }
 0xc83   :  { %3967 = vmatpush1.bf16.msra.mxu0 %v3838_v16  ;;  %4049 = vmatpush1.bf16.msra.mxu1 %v3840_v17  ;;  %v3894_v16 = vld [vmem:[#allocation3 + $0x720] sm:$0xff]  ;;  %v3896_v17 = vld [vmem:[#allocation3 + $0x730] sm:$0xff] }
 0xc84   :  { %3968 = vmatprep.subr.bf16.mxu0 %v3843_v19  ;;  %4050 = vmatprep.subr.bf16.mxu1 %v3845_v21  ;;  %v3899_v19 = vld [vmem:[#allocation3 + $0x748] sm:$0xff]  ;;  %v3901_v21 = vld [vmem:[#allocation3 + $0x758] sm:$0xff] }
 0xc87   :  { %3969 = vmatpush1.bf16.msra.mxu0 %v3842_v47  ;;  %4051 = vmatpush1.bf16.msra.mxu1 %v3844_v49  ;;  %v3898_v47 = vld [vmem:[#allocation3 + $0x740] sm:$0xff]  ;;  %v3900_v49 = vld [vmem:[#allocation3 + $0x750] sm:$0xff] }
 0xc88   :  { %3970 = vmatprep.subr.bf16.mxu0 %v3847_v48  ;;  %4052 = vmatprep.subr.bf16.mxu1 %v3849_v37  ;;  %v3903_v48 = vld [vmem:[#allocation3 + $0x768] sm:$0xff]  ;;  %v3905_v37 = vld [vmem:[#allocation3 + $0x778] sm:$0xff] }
 0xc8b   :  { %3971 = vmatpush1.bf16.msra.mxu0 %v3846_v51  ;;  %4053 = vmatpush1.bf16.msra.mxu1 %v3848_v52  ;;  %v3902_v51 = vld [vmem:[#allocation3 + $0x760] sm:$0xff]  ;;  %v3904_v52 = vld [vmem:[#allocation3 + $0x770] sm:$0xff] }
 0xc8c   :  { %3972 = vmatprep.subr.bf16.mxu0 %v3851_v55  ;;  %4054 = vmatprep.subr.bf16.mxu1 %v3853_v57  ;;  %v3907_v55 = vld [vmem:[#allocation3 + $0x788] sm:$0xff]  ;;  %v3909_v57 = vld [vmem:[#allocation3 + $0x798] sm:$0xff] }
 0xc8f   :  { %3973 = vmatpush1.bf16.msra.mxu0 %v3850_v43  ;;  %4055 = vmatpush1.bf16.msra.mxu1 %v3852_v5  ;;  %v3906_v43 = vld [vmem:[#allocation3 + $0x780] sm:$0xff]  ;;  %v3908_v5 = vld [vmem:[#allocation3 + $0x790] sm:$0xff] }
 0xc90   :  { %3974 = vmatprep.subr.bf16.mxu0 %v3855_v7  ;;  %4056 = vmatprep.subr.bf16.mxu1 %v3857_v40  ;;  %v3911_v7 = vld [vmem:[#allocation3 + $0x7a8] sm:$0xff]  ;;  %v3913_v40 = vld [vmem:[#allocation3 + $0x7b8] sm:$0xff] }
 0xc93   :  { %3975 = vmatpush1.bf16.msra.mxu0 %v3854_v15  ;;  %4057 = vmatpush1.bf16.msra.mxu1 %v3856_v60  ;;  %v3910_v15 = vld [vmem:[#allocation3 + $0x7a0] sm:$0xff]  ;;  %v3912_v60 = vld [vmem:[#allocation3 + $0x7b0] sm:$0xff] }
 0xc94   :  { %3985 = vmatprep.subr.bf16.mxu0 %v3859_v25  ;;  %4067 = vmatprep.subr.bf16.mxu1 %v3861_v61  ;;  %v3915_v25 = vld [vmem:[#allocation3 + $0x7c8] sm:$0xff]  ;;  %v3917_v61 = vld [vmem:[#allocation3 + $0x7d8] sm:$0xff] }
 0xc96   :  { %3977 = vmatmul.mubr.bf16.vlgmr.msra.gmra.mrb[68].mxu0 %v3790_v10  ;;  %4059 = vmatmul.mubr.bf16.vlgmr.msra.gmra.mrb[68].mxu1 %v3790_v10  ;;  %v3914_v10 = vld [vmem:[#allocation3 + $0x7c0] sm:$0xff] }
 0xc97   :  { %3986 = vmatpush1.bf16.msra.mxu0 %v3858_v62  ;;  %4068 = vmatpush1.bf16.msra.mxu1 %v3860_v53  ;;  %v3916_v62 = vld [vmem:[#allocation3 + $0x7d0] sm:$0xff]  ;;  %v3919_v53 = vld [vmem:[#allocation3 + $0x7e8] sm:$0xff] }
 0xc98   :  { %3987 = vmatprep.subr.bf16.mxu0 %v3863_v58  ;;  %4069 = vmatprep.subr.bf16.mxu1 %v3865_v56  ;;  %v3921_v58 = vld [vmem:[#allocation3 + $0x7f8] sm:$0xff]  ;;  %v3918_v56 = vld [vmem:[#allocation3 + $0x7e0] sm:$0xff] }
 0xc99   :  { %4017 = vmatprep.mubr.bf16.mxu0 %v3793_v20  ;;  %4099 = vmatprep.mubr.bf16.mxu1 %v3793_v20  ;;  %v3920_v20 = vld [vmem:[#allocation3 + $0x7f0] sm:$0xff] }
 0xc9b   :  { %3988 = vmatpush1.bf16.msra.mxu0 %v3862_v14  ;;  %4070 = vmatpush1.bf16.msra.mxu1 %v3864_v22  ;;  %v3792_v14 = vpack.c.bf16 %v3786_v45, %v3786_v45  ;;  %v3922_v22 = vld [vmem:[#allocation16] sm:$0xf] }
 0xc9c   :  { %3989 = vmatprep.subr.bf16.mxu0 %v3867_v3  ;;  %4071 = vmatprep.subr.bf16.mxu1 %v3869_v4  ;;  %v3927_v3 = vrot.slane %v3922_v22, %v7181_v42  ;;  %v3935_v4 = vrot.slane %v3922_v22, %v7182_v44 }
 0xc9f   :  { %3990 = vmatpush1.bf16.msra.mxu0 %v3866_v23  ;;  %4072 = vmatpush1.bf16.msra.mxu1 %v3868_v18  ;;  %v3931_v23 = vrot.slane %v3922_v22, %v7183_v59  ;;  %v3939_v18 = vrot.slane %v3922_v22, %v7184_v63 }
 0xca0   :  { %3991 = vmatprep.subr.bf16.mxu0 %v3871_v24  ;;  %4073 = vmatprep.subr.bf16.mxu1 %v3873_v50 }
 0xca3   :  { %3992 = vmatpush1.bf16.msra.mxu0 %v3870_v26  ;;  %4074 = vmatpush1.bf16.msra.mxu1 %v3872_v27 }
 0xca4   :  { %3993 = vmatprep.subr.bf16.mxu0 %v3875_v28  ;;  %4075 = vmatprep.subr.bf16.mxu1 %v3877_v29 }
 0xca7   :  { %3994 = vmatpush1.bf16.msra.mxu0 %v3874_v31  ;;  %4076 = vmatpush1.bf16.msra.mxu1 %v3876_v32 }
 0xca8   :  { %3995 = vmatprep.subr.bf16.mxu0 %v3879_v8  ;;  %4077 = vmatprep.subr.bf16.mxu1 %v3881_v33 }
 0xcab   :  { %3996 = vmatpush1.bf16.msra.mxu0 %v3878_v9  ;;  %4078 = vmatpush1.bf16.msra.mxu1 %v3880_v34 }
 0xcac   :  { %3997 = vmatprep.subr.bf16.mxu0 %v3883_v11  ;;  %4079 = vmatprep.subr.bf16.mxu1 %v3885_v35 }
 0xcaf   :  { %3998 = vmatpush1.bf16.msra.mxu0 %v3882_v12  ;;  %4080 = vmatpush1.bf16.msra.mxu1 %v3884_v36 }
 0xcb0   :  { %3999 = vmatprep.subr.bf16.mxu0 %v3887_v39  ;;  %4081 = vmatprep.subr.bf16.mxu1 %v3889_v54 }
 0xcb3   :  { %4000 = vmatpush1.bf16.msra.mxu0 %v3886_v0  ;;  %4082 = vmatpush1.bf16.msra.mxu1 %v3888_v13 }
 0xcb4   :  { %4001 = vmatprep.subr.bf16.mxu0 %v3891_v1  ;;  %4083 = vmatprep.subr.bf16.mxu1 %v3893_v2 }
 0xcb7   :  { %4002 = vmatpush1.bf16.msra.mxu0 %v3890_v38  ;;  %4084 = vmatpush1.bf16.msra.mxu1 %v3892_v6 }
 0xcb8   :  { %4003 = vmatprep.subr.bf16.mxu0 %v3895_v46  ;;  %4085 = vmatprep.subr.bf16.mxu1 %v3897_v41 }
 0xcbb   :  { %4004 = vmatpush1.bf16.msra.mxu0 %v3894_v16  ;;  %4086 = vmatpush1.bf16.msra.mxu1 %v3896_v17 }
 0xcbc   :  { %4005 = vmatprep.subr.bf16.mxu0 %v3899_v19  ;;  %4087 = vmatprep.subr.bf16.mxu1 %v3901_v21 }
 0xcbf   :  { %4006 = vmatpush1.bf16.msra.mxu0 %v3898_v47  ;;  %4088 = vmatpush1.bf16.msra.mxu1 %v3900_v49 }
 0xcc0   :  { %4007 = vmatprep.subr.bf16.mxu0 %v3903_v48  ;;  %4089 = vmatprep.subr.bf16.mxu1 %v3905_v37 }
 0xcc3   :  { %4008 = vmatpush1.bf16.msra.mxu0 %v3902_v51  ;;  %4090 = vmatpush1.bf16.msra.mxu1 %v3904_v52 }
 0xcc4   :  { %4009 = vmatprep.subr.bf16.mxu0 %v3907_v55  ;;  %4091 = vmatprep.subr.bf16.mxu1 %v3909_v57 }
 0xcc7   :  { %4010 = vmatpush1.bf16.msra.mxu0 %v3906_v43  ;;  %4092 = vmatpush1.bf16.msra.mxu1 %v3908_v5 }
 0xcc8   :  { %4011 = vmatprep.subr.bf16.mxu0 %v3911_v7  ;;  %4093 = vmatprep.subr.bf16.mxu1 %v3913_v40 }
 0xccb   :  { %4012 = vmatpush1.bf16.msra.mxu0 %v3910_v15  ;;  %4094 = vmatpush1.bf16.msra.mxu1 %v3912_v60 }
 0xccc   :  { %4013 = vmatprep.subr.bf16.mxu0 %v3915_v25  ;;  %4095 = vmatprep.subr.bf16.mxu1 %v3917_v61 }
 0xccf   :  { %4014 = vmatpush1.bf16.msra.mxu0 %v3914_v10  ;;  %4096 = vmatpush1.bf16.msra.mxu1 %v3916_v62 }
 0xcd0   :  { %4015 = vmatprep.subr.bf16.mxu0 %v3919_v53  ;;  %4097 = vmatprep.subr.bf16.mxu1 %v3921_v58 }
 0xcd3   :  { %4016 = vmatpush1.bf16.msra.mxu0 %v3918_v56  ;;  %4098 = vmatpush1.bf16.msra.mxu1 %v3920_v20 }
 0xcd6   :  { %4018 = vmatmul.mubr.bf16.vlgmr.msra.gmra.mrb[68].mxu0 %v3792_v14  ;;  %4100 = vmatmul.mubr.bf16.vlgmr.msra.gmra.mrb[68].mxu1 %v3792_v14 }
 0xda9   :  { %v4019_v24 = vpop.f32.mrb[68].mxu0  ;;  %v4101_v50 = vpop.f32.mrb[68].mxu1 }
 0xdaa   :  { %v7057_v26 = vadd.f32 %v4019_v24, %v3927_v3  ;;  %v7059_v30 = vadd.f32 %v4101_v50, %v3935_v4  ;;  %v4021_v45 = vpop.f32.mrb[69].mxu0  ;;  %v4103_v27 = vpop.f32.mrb[69].mxu1 }
 0xdab   :  { %v5187_v28 = vadd.f32 %v4021_v45, %v3931_v23  ;;  %v7061_v29 = vadd.f32 %v4103_v27, %v3939_v18  ;;  %v4023_v31 = vpop.f32.mrb[70].mxu0  ;;  %v4105_v32 = vpop.f32.mrb[70].mxu1 }
 0xdac   :  { %v4108_v8 = vmax.f32 %v7057_v26, 0.0  ;;  %v4110_v33 = vmax.f32 %v7059_v30, 0.0  ;;  %v4024_v9 = vpop.f32.mrb[71].mxu0  ;;  %v4106_v34 = vpop.f32.mrb[71].mxu1 }
 0xdad   :  { %v4109_v11 = vmax.f32 %v5187_v28, 0.0  ;;  %v4111_v35 = vmax.f32 %v7061_v29, 0.0 }
 0xdae   :  { %6102 = dma.done.wait [#allocation4 + $0x3], 16384 }
 0xdaf   :  { %6103 = vsyncadd [#allocation4 + $0x3], 4294950912  ;;  %v4115_v12 = vpack.c.bf16 %v4109_v11, %v4109_v11  ;;  %v4119_v36 = vld [vmem:[#allocation3 + $0x808] sm:$0xff]  ;;  %v4121_v39 = vld [vmem:[#allocation3 + $0x818] sm:$0xff] }
 0xdb0   :  { %v4118_v54 = vld [vmem:[#allocation3 + $0x800] sm:$0xff]  ;;  %4268 = vmatprep.subr.bf16.mxu0 %v4119_v36  ;;  %4350 = vmatprep.subr.bf16.mxu1 %v4121_v39  ;;  %v4120_v0 = vld [vmem:[#allocation3 + $0x810] sm:$0xff]  ;;  %v4123_v13 = vld [vmem:[#allocation3 + $0x828] sm:$0xff] }
 0xdb1   :  { %4300 = vmatprep.mubr.bf16.mxu0 %v4115_v12  ;;  %4382 = vmatprep.mubr.bf16.mxu1 %v4115_v12  ;;  %v4125_v1 = vld [vmem:[#allocation3 + $0x838] sm:$0xff]  ;;  %v4122_v2 = vld [vmem:[#allocation3 + $0x820] sm:$0xff]  ;;  %v4124_v38 = vld [vmem:[#allocation3 + $0x830] sm:$0xff] }
 0xdb2   :  { %4269 = vmatpush1.bf16.msra.mxu0 %v4118_v54  ;;  %4351 = vmatpush1.bf16.msra.mxu1 %v4120_v0  ;;  %v4127_v6 = vld [vmem:[#allocation3 + $0x848] sm:$0xff]  ;;  %v4129_v46 = vld [vmem:[#allocation3 + $0x858] sm:$0xff]  ;;  %v4126_v41 = vld [vmem:[#allocation3 + $0x840] sm:$0xff] }
 0xdb3   :  { %4270 = vmatprep.subr.bf16.mxu0 %v4123_v13  ;;  %4352 = vmatprep.subr.bf16.mxu1 %v4125_v1  ;;  %v4128_v16 = vld [vmem:[#allocation3 + $0x850] sm:$0xff]  ;;  %v4131_v17 = vld [vmem:[#allocation3 + $0x868] sm:$0xff]  ;;  %v4133_v19 = vld [vmem:[#allocation3 + $0x878] sm:$0xff] }
 0xdb4   :  { %v4130_v21 = vld [vmem:[#allocation3 + $0x860] sm:$0xff]  ;;  %v4132_v47 = vld [vmem:[#allocation3 + $0x870] sm:$0xff]  ;;  %v4135_v49 = vld [vmem:[#allocation3 + $0x888] sm:$0xff] }
 0xdb5   :  { %v4137_v48 = vld [vmem:[#allocation3 + $0x898] sm:$0xff]  ;;  %v4134_v37 = vld [vmem:[#allocation3 + $0x880] sm:$0xff]  ;;  %v4136_v51 = vld [vmem:[#allocation3 + $0x890] sm:$0xff] }
 0xdb6   :  { %4271 = vmatpush1.bf16.msra.mxu0 %v4122_v2  ;;  %4353 = vmatpush1.bf16.msra.mxu1 %v4124_v38  ;;  %v4139_v52 = vld [vmem:[#allocation3 + $0x8a8] sm:$0xff]  ;;  %v4141_v55 = vld [vmem:[#allocation3 + $0x8b8] sm:$0xff]  ;;  %v4138_v57 = vld [vmem:[#allocation3 + $0x8a0] sm:$0xff] }
 0xdb7   :  { %4272 = vmatprep.subr.bf16.mxu0 %v4127_v6  ;;  %4354 = vmatprep.subr.bf16.mxu1 %v4129_v46  ;;  %v4140_v43 = vld [vmem:[#allocation3 + $0x8b0] sm:$0xff]  ;;  %v4143_v5 = vld [vmem:[#allocation3 + $0x8c8] sm:$0xff]  ;;  %v4145_v7 = vld [vmem:[#allocation3 + $0x8d8] sm:$0xff] }
 0xdb8   :  { %v4142_v40 = vld [vmem:[#allocation3 + $0x8c0] sm:$0xff]  ;;  %v4144_v15 = vld [vmem:[#allocation3 + $0x8d0] sm:$0xff]  ;;  %v4147_v60 = vld [vmem:[#allocation3 + $0x8e8] sm:$0xff] }
 0xdb9   :  { %v4149_v25 = vld [vmem:[#allocation3 + $0x8f8] sm:$0xff]  ;;  %v4146_v61 = vld [vmem:[#allocation3 + $0x8e0] sm:$0xff]  ;;  %v4148_v10 = vld [vmem:[#allocation3 + $0x8f0] sm:$0xff] }
 0xdba   :  { %4273 = vmatpush1.bf16.msra.mxu0 %v4126_v41  ;;  %4355 = vmatpush1.bf16.msra.mxu1 %v4128_v16  ;;  %v4151_v62 = vld [vmem:[#allocation3 + $0x908] sm:$0xff]  ;;  %v4153_v53 = vld [vmem:[#allocation3 + $0x918] sm:$0xff]  ;;  %v4150_v58 = vld [vmem:[#allocation3 + $0x900] sm:$0xff] }
 0xdbb   :  { %4274 = vmatprep.subr.bf16.mxu0 %v4131_v17  ;;  %4356 = vmatprep.subr.bf16.mxu1 %v4133_v19  ;;  %v4152_v56 = vld [vmem:[#allocation3 + $0x910] sm:$0xff]  ;;  %v4155_v20 = vld [vmem:[#allocation3 + $0x928] sm:$0xff]  ;;  %v4157_v14 = vld [vmem:[#allocation3 + $0x938] sm:$0xff]  ;;  %v4114_v17 = vpack.c.bf16 %v4108_v8, %v4108_v8 }
 0xdbc   :  { %v4154_v22 = vld [vmem:[#allocation3 + $0x920] sm:$0xff]  ;;  %v4156_v3 = vld [vmem:[#allocation3 + $0x930] sm:$0xff]  ;;  %v4159_v4 = vld [vmem:[#allocation3 + $0x948] sm:$0xff] }
 0xdbd   :  { %v4161_v23 = vld [vmem:[#allocation3 + $0x958] sm:$0xff]  ;;  %v4158_v18 = vld [vmem:[#allocation3 + $0x940] sm:$0xff]  ;;  %v4160_v24 = vld [vmem:[#allocation3 + $0x950] sm:$0xff] }
 0xdbe   :  { %4275 = vmatpush1.bf16.msra.mxu0 %v4130_v21  ;;  %4357 = vmatpush1.bf16.msra.mxu1 %v4132_v47  ;;  %v4163_v50 = vld [vmem:[#allocation3 + $0x968] sm:$0xff]  ;;  %v4165_v45 = vld [vmem:[#allocation3 + $0x978] sm:$0xff]  ;;  %v4162_v27 = vld [vmem:[#allocation3 + $0x960] sm:$0xff] }
 0xdbf   :  { %4276 = vmatprep.subr.bf16.mxu0 %v4135_v49  ;;  %4358 = vmatprep.subr.bf16.mxu1 %v4137_v48  ;;  %v4164_v28 = vld [vmem:[#allocation3 + $0x970] sm:$0xff]  ;;  %v4167_v31 = vld [vmem:[#allocation3 + $0x988] sm:$0xff]  ;;  %v4169_v32 = vld [vmem:[#allocation3 + $0x998] sm:$0xff]  ;;  %v4117_v48 = vpack.c.bf16 %v4111_v35, %v4111_v35 }
 0xdc0   :  { %v4166_v9 = vld [vmem:[#allocation3 + $0x980] sm:$0xff]  ;;  %v4168_v34 = vld [vmem:[#allocation3 + $0x990] sm:$0xff]  ;;  %v4171_v11 = vld [vmem:[#allocation3 + $0x9a8] sm:$0xff] }
 0xdc1   :  { %v4173_v12 = vld [vmem:[#allocation3 + $0x9b8] sm:$0xff]  ;;  %v4170_v36 = vld [vmem:[#allocation3 + $0x9a0] sm:$0xff]  ;;  %v4172_v39 = vld [vmem:[#allocation3 + $0x9b0] sm:$0xff] }
 0xdc2   :  { %4277 = vmatpush1.bf16.msra.mxu0 %v4134_v37  ;;  %4359 = vmatpush1.bf16.msra.mxu1 %v4136_v51  ;;  %v4175_v54 = vld [vmem:[#allocation3 + $0x9c8] sm:$0xff]  ;;  %v4177_v0 = vld [vmem:[#allocation3 + $0x9d8] sm:$0xff]  ;;  %v4174_v13 = vld [vmem:[#allocation3 + $0x9c0] sm:$0xff] }
 0xdc3   :  { %4278 = vmatprep.subr.bf16.mxu0 %v4139_v52  ;;  %4360 = vmatprep.subr.bf16.mxu1 %v4141_v55  ;;  %v4176_v1 = vld [vmem:[#allocation3 + $0x9d0] sm:$0xff]  ;;  %v4179_v2 = vld [vmem:[#allocation3 + $0x9e8] sm:$0xff]  ;;  %v4181_v38 = vld [vmem:[#allocation3 + $0x9f8] sm:$0xff] }
 0xdc4   :  { %v4178_v6 = vld [vmem:[#allocation3 + $0x9e0] sm:$0xff]  ;;  %v4180_v46 = vld [vmem:[#allocation3 + $0x9f0] sm:$0xff]  ;;  %v4183_v41 = vld [vmem:[#allocation3 + $0xa08] sm:$0xff] }
 0xdc5   :  { %v4185_v16 = vld [vmem:[#allocation3 + $0xa18] sm:$0xff]  ;;  %v4182_v19 = vld [vmem:[#allocation3 + $0xa00] sm:$0xff]  ;;  %v4184_v21 = vld [vmem:[#allocation3 + $0xa10] sm:$0xff] }
 0xdc6   :  { %4279 = vmatpush1.bf16.msra.mxu0 %v4138_v57  ;;  %4361 = vmatpush1.bf16.msra.mxu1 %v4140_v43  ;;  %v4187_v47 = vld [vmem:[#allocation3 + $0xa28] sm:$0xff]  ;;  %v4189_v49 = vld [vmem:[#allocation3 + $0xa38] sm:$0xff]  ;;  %v4186_v26 = vld [vmem:[#allocation3 + $0xa20] sm:$0xff] }
 0xdc7   :  { %4280 = vmatprep.subr.bf16.mxu0 %v4143_v5  ;;  %4362 = vmatprep.subr.bf16.mxu1 %v4145_v7  ;;  %v4188_v8 = vld [vmem:[#allocation3 + $0xa30] sm:$0xff]  ;;  %v4191_v37 = vld [vmem:[#allocation3 + $0xa48] sm:$0xff]  ;;  %v4193_v51 = vld [vmem:[#allocation3 + $0xa58] sm:$0xff] }
 0xdc8   :  { %v4190_v52 = vld [vmem:[#allocation3 + $0xa40] sm:$0xff]  ;;  %v4192_v29 = vld [vmem:[#allocation3 + $0xa50] sm:$0xff]  ;;  %v4195_v55 = vld [vmem:[#allocation3 + $0xa68] sm:$0xff] }
 0xdc9   :  { %v4197_v35 = vld [vmem:[#allocation3 + $0xa78] sm:$0xff]  ;;  %v4194_v57 = vld [vmem:[#allocation3 + $0xa60] sm:$0xff]  ;;  %v4196_v43 = vld [vmem:[#allocation3 + $0xa70] sm:$0xff] }
 0xdca   :  { %4281 = vmatpush1.bf16.msra.mxu0 %v4142_v40  ;;  %4363 = vmatpush1.bf16.msra.mxu1 %v4144_v15  ;;  %v4199_v5 = vld [vmem:[#allocation3 + $0xa88] sm:$0xff]  ;;  %v4201_v7 = vld [vmem:[#allocation3 + $0xa98] sm:$0xff]  ;;  %v4198_v40 = vld [vmem:[#allocation3 + $0xa80] sm:$0xff] }
 0xdcb   :  { %4282 = vmatprep.subr.bf16.mxu0 %v4147_v60  ;;  %4364 = vmatprep.subr.bf16.mxu1 %v4149_v25  ;;  %v4200_v15 = vld [vmem:[#allocation3 + $0xa90] sm:$0xff]  ;;  %v4203_v60 = vld [vmem:[#allocation3 + $0xaa8] sm:$0xff]  ;;  %v4205_v25 = vld [vmem:[#allocation3 + $0xab8] sm:$0xff] }
 0xdce   :  { %4283 = vmatpush1.bf16.msra.mxu0 %v4146_v61  ;;  %4365 = vmatpush1.bf16.msra.mxu1 %v4148_v10  ;;  %v4202_v61 = vld [vmem:[#allocation3 + $0xaa0] sm:$0xff]  ;;  %v4204_v10 = vld [vmem:[#allocation3 + $0xab0] sm:$0xff] }
 0xdcf   :  { %4284 = vmatprep.subr.bf16.mxu0 %v4151_v62  ;;  %4366 = vmatprep.subr.bf16.mxu1 %v4153_v53  ;;  %v4207_v62 = vld [vmem:[#allocation3 + $0xac8] sm:$0xff]  ;;  %v4209_v53 = vld [vmem:[#allocation3 + $0xad8] sm:$0xff] }
 0xdd2   :  { %4285 = vmatpush1.bf16.msra.mxu0 %v4150_v58  ;;  %4367 = vmatpush1.bf16.msra.mxu1 %v4152_v56  ;;  %v4206_v58 = vld [vmem:[#allocation3 + $0xac0] sm:$0xff]  ;;  %v4208_v56 = vld [vmem:[#allocation3 + $0xad0] sm:$0xff] }
 0xdd3   :  { %4286 = vmatprep.subr.bf16.mxu0 %v4155_v20  ;;  %4368 = vmatprep.subr.bf16.mxu1 %v4157_v14  ;;  %v4211_v20 = vld [vmem:[#allocation3 + $0xae8] sm:$0xff]  ;;  %v4213_v14 = vld [vmem:[#allocation3 + $0xaf8] sm:$0xff] }
 0xdd6   :  { %4287 = vmatpush1.bf16.msra.mxu0 %v4154_v22  ;;  %4369 = vmatpush1.bf16.msra.mxu1 %v4156_v3  ;;  %v4210_v22 = vld [vmem:[#allocation3 + $0xae0] sm:$0xff]  ;;  %v4212_v3 = vld [vmem:[#allocation3 + $0xaf0] sm:$0xff] }
 0xdd7   :  { %4288 = vmatprep.subr.bf16.mxu0 %v4159_v4  ;;  %4370 = vmatprep.subr.bf16.mxu1 %v4161_v23  ;;  %v4215_v4 = vld [vmem:[#allocation3 + $0xb08] sm:$0xff]  ;;  %v4217_v23 = vld [vmem:[#allocation3 + $0xb18] sm:$0xff] }
 0xdda   :  { %4289 = vmatpush1.bf16.msra.mxu0 %v4158_v18  ;;  %4371 = vmatpush1.bf16.msra.mxu1 %v4160_v24  ;;  %v4214_v18 = vld [vmem:[#allocation3 + $0xb00] sm:$0xff]  ;;  %v4216_v24 = vld [vmem:[#allocation3 + $0xb10] sm:$0xff] }
 0xddb   :  { %4290 = vmatprep.subr.bf16.mxu0 %v4163_v50  ;;  %4372 = vmatprep.subr.bf16.mxu1 %v4165_v45  ;;  %v4219_v50 = vld [vmem:[#allocation3 + $0xb28] sm:$0xff]  ;;  %v4221_v45 = vld [vmem:[#allocation3 + $0xb38] sm:$0xff] }
 0xdde   :  { %4291 = vmatpush1.bf16.msra.mxu0 %v4162_v27  ;;  %4373 = vmatpush1.bf16.msra.mxu1 %v4164_v28  ;;  %v4218_v27 = vld [vmem:[#allocation3 + $0xb20] sm:$0xff]  ;;  %v4220_v28 = vld [vmem:[#allocation3 + $0xb30] sm:$0xff] }
 0xddf   :  { %4292 = vmatprep.subr.bf16.mxu0 %v4167_v31  ;;  %4374 = vmatprep.subr.bf16.mxu1 %v4169_v32  ;;  %v4223_v31 = vld [vmem:[#allocation3 + $0xb48] sm:$0xff]  ;;  %v4225_v32 = vld [vmem:[#allocation3 + $0xb58] sm:$0xff] }
 0xde2   :  { %4293 = vmatpush1.bf16.msra.mxu0 %v4166_v9  ;;  %4375 = vmatpush1.bf16.msra.mxu1 %v4168_v34  ;;  %v4222_v9 = vld [vmem:[#allocation3 + $0xb40] sm:$0xff]  ;;  %v4224_v34 = vld [vmem:[#allocation3 + $0xb50] sm:$0xff] }
 0xde3   :  { %4294 = vmatprep.subr.bf16.mxu0 %v4171_v11  ;;  %4376 = vmatprep.subr.bf16.mxu1 %v4173_v12  ;;  %v4227_v11 = vld [vmem:[#allocation3 + $0xb68] sm:$0xff]  ;;  %v4229_v12 = vld [vmem:[#allocation3 + $0xb78] sm:$0xff] }
 0xde6   :  { %4295 = vmatpush1.bf16.msra.mxu0 %v4170_v36  ;;  %4377 = vmatpush1.bf16.msra.mxu1 %v4172_v39  ;;  %v4226_v36 = vld [vmem:[#allocation3 + $0xb60] sm:$0xff]  ;;  %v4228_v39 = vld [vmem:[#allocation3 + $0xb70] sm:$0xff] }
 0xde7   :  { %4296 = vmatprep.subr.bf16.mxu0 %v4175_v54  ;;  %4378 = vmatprep.subr.bf16.mxu1 %v4177_v0  ;;  %v4231_v54 = vld [vmem:[#allocation3 + $0xb88] sm:$0xff]  ;;  %v4233_v0 = vld [vmem:[#allocation3 + $0xb98] sm:$0xff] }
 0xdea   :  { %4297 = vmatpush1.bf16.msra.mxu0 %v4174_v13  ;;  %4379 = vmatpush1.bf16.msra.mxu1 %v4176_v1  ;;  %v4230_v13 = vld [vmem:[#allocation3 + $0xb80] sm:$0xff]  ;;  %v4232_v1 = vld [vmem:[#allocation3 + $0xb90] sm:$0xff] }
 0xdeb   :  { %4298 = vmatprep.subr.bf16.mxu0 %v4179_v2  ;;  %4380 = vmatprep.subr.bf16.mxu1 %v4181_v38  ;;  %v4235_v2 = vld [vmem:[#allocation3 + $0xba8] sm:$0xff]  ;;  %v4237_v38 = vld [vmem:[#allocation3 + $0xbb8] sm:$0xff] }
 0xdee   :  { %4299 = vmatpush1.bf16.msra.mxu0 %v4178_v6  ;;  %4381 = vmatpush1.bf16.msra.mxu1 %v4180_v46  ;;  %v4234_v6 = vld [vmem:[#allocation3 + $0xba0] sm:$0xff]  ;;  %v4236_v46 = vld [vmem:[#allocation3 + $0xbb0] sm:$0xff] }
 0xdef   :  { %4309 = vmatprep.subr.bf16.mxu0 %v4183_v41  ;;  %4391 = vmatprep.subr.bf16.mxu1 %v4185_v16  ;;  %v4239_v41 = vld [vmem:[#allocation3 + $0xbc8] sm:$0xff]  ;;  %v4241_v16 = vld [vmem:[#allocation3 + $0xbd8] sm:$0xff] }
 0xdf1   :  { %4301 = vmatmul.mubr.bf16.vlgmr.msra.gmra.mrb[72].mxu0 %v4114_v17  ;;  %4383 = vmatmul.mubr.bf16.vlgmr.msra.gmra.mrb[72].mxu1 %v4114_v17  ;;  %v4238_v17 = vld [vmem:[#allocation3 + $0xbc0] sm:$0xff] }
 0xdf2   :  { %4310 = vmatpush1.bf16.msra.mxu0 %v4182_v19  ;;  %4392 = vmatpush1.bf16.msra.mxu1 %v4184_v21  ;;  %v4240_v19 = vld [vmem:[#allocation3 + $0xbd0] sm:$0xff]  ;;  %v4243_v21 = vld [vmem:[#allocation3 + $0xbe8] sm:$0xff] }
 0xdf3   :  { %4311 = vmatprep.subr.bf16.mxu0 %v4187_v47  ;;  %4393 = vmatprep.subr.bf16.mxu1 %v4189_v49  ;;  %v4245_v47 = vld [vmem:[#allocation3 + $0xbf8] sm:$0xff]  ;;  %v4242_v49 = vld [vmem:[#allocation3 + $0xbe0] sm:$0xff] }
 0xdf4   :  { %4341 = vmatprep.mubr.bf16.mxu0 %v4117_v48  ;;  %4423 = vmatprep.mubr.bf16.mxu1 %v4117_v48  ;;  %v4244_v48 = vld [vmem:[#allocation3 + $0xbf0] sm:$0xff] }
 0xdf6   :  { %4312 = vmatpush1.bf16.msra.mxu0 %v4186_v26  ;;  %4394 = vmatpush1.bf16.msra.mxu1 %v4188_v8  ;;  %v4116_v26 = vpack.c.bf16 %v4110_v33, %v4110_v33  ;;  %v4246_v8 = vld [vmem:[#allocation17] sm:$0xf] }
 0xdf7   :  { %4313 = vmatprep.subr.bf16.mxu0 %v4191_v37  ;;  %4395 = vmatprep.subr.bf16.mxu1 %v4193_v51  ;;  %v4251_v37 = vrot.slane %v4246_v8, %v7181_v42  ;;  %v4259_v51 = vrot.slane %v4246_v8, %v7182_v44 }
 0xdfa   :  { %4314 = vmatpush1.bf16.msra.mxu0 %v4190_v52  ;;  %4396 = vmatpush1.bf16.msra.mxu1 %v4192_v29  ;;  %v4255_v52 = vrot.slane %v4246_v8, %v7183_v59  ;;  %v4263_v29 = vrot.slane %v4246_v8, %v7184_v63 }
 0xdfb   :  { %4315 = vmatprep.subr.bf16.mxu0 %v4195_v55  ;;  %4397 = vmatprep.subr.bf16.mxu1 %v4197_v35 }
 0xdfe   :  { %4316 = vmatpush1.bf16.msra.mxu0 %v4194_v57  ;;  %4398 = vmatpush1.bf16.msra.mxu1 %v4196_v43 }
 0xdff   :  { %4317 = vmatprep.subr.bf16.mxu0 %v4199_v5  ;;  %4399 = vmatprep.subr.bf16.mxu1 %v4201_v7 }
 0xe02   :  { %4318 = vmatpush1.bf16.msra.mxu0 %v4198_v40  ;;  %4400 = vmatpush1.bf16.msra.mxu1 %v4200_v15 }
 0xe03   :  { %4319 = vmatprep.subr.bf16.mxu0 %v4203_v60  ;;  %4401 = vmatprep.subr.bf16.mxu1 %v4205_v25 }
 0xe06   :  { %4320 = vmatpush1.bf16.msra.mxu0 %v4202_v61  ;;  %4402 = vmatpush1.bf16.msra.mxu1 %v4204_v10 }
 0xe07   :  { %4321 = vmatprep.subr.bf16.mxu0 %v4207_v62  ;;  %4403 = vmatprep.subr.bf16.mxu1 %v4209_v53 }
 0xe0a   :  { %4322 = vmatpush1.bf16.msra.mxu0 %v4206_v58  ;;  %4404 = vmatpush1.bf16.msra.mxu1 %v4208_v56 }
 0xe0b   :  { %4323 = vmatprep.subr.bf16.mxu0 %v4211_v20  ;;  %4405 = vmatprep.subr.bf16.mxu1 %v4213_v14 }
 0xe0e   :  { %4324 = vmatpush1.bf16.msra.mxu0 %v4210_v22  ;;  %4406 = vmatpush1.bf16.msra.mxu1 %v4212_v3 }
 0xe0f   :  { %4325 = vmatprep.subr.bf16.mxu0 %v4215_v4  ;;  %4407 = vmatprep.subr.bf16.mxu1 %v4217_v23 }
 0xe12   :  { %4326 = vmatpush1.bf16.msra.mxu0 %v4214_v18  ;;  %4408 = vmatpush1.bf16.msra.mxu1 %v4216_v24 }
 0xe13   :  { %4327 = vmatprep.subr.bf16.mxu0 %v4219_v50  ;;  %4409 = vmatprep.subr.bf16.mxu1 %v4221_v45 }
 0xe16   :  { %4328 = vmatpush1.bf16.msra.mxu0 %v4218_v27  ;;  %4410 = vmatpush1.bf16.msra.mxu1 %v4220_v28 }
 0xe17   :  { %4329 = vmatprep.subr.bf16.mxu0 %v4223_v31  ;;  %4411 = vmatprep.subr.bf16.mxu1 %v4225_v32 }
 0xe1a   :  { %4330 = vmatpush1.bf16.msra.mxu0 %v4222_v9  ;;  %4412 = vmatpush1.bf16.msra.mxu1 %v4224_v34 }
 0xe1b   :  { %4331 = vmatprep.subr.bf16.mxu0 %v4227_v11  ;;  %4413 = vmatprep.subr.bf16.mxu1 %v4229_v12 }
 0xe1e   :  { %4332 = vmatpush1.bf16.msra.mxu0 %v4226_v36  ;;  %4414 = vmatpush1.bf16.msra.mxu1 %v4228_v39 }
 0xe1f   :  { %4333 = vmatprep.subr.bf16.mxu0 %v4231_v54  ;;  %4415 = vmatprep.subr.bf16.mxu1 %v4233_v0 }
 0xe22   :  { %4334 = vmatpush1.bf16.msra.mxu0 %v4230_v13  ;;  %4416 = vmatpush1.bf16.msra.mxu1 %v4232_v1 }
 0xe23   :  { %4335 = vmatprep.subr.bf16.mxu0 %v4235_v2  ;;  %4417 = vmatprep.subr.bf16.mxu1 %v4237_v38 }
 0xe26   :  { %4336 = vmatpush1.bf16.msra.mxu0 %v4234_v6  ;;  %4418 = vmatpush1.bf16.msra.mxu1 %v4236_v46 }
 0xe27   :  { %4337 = vmatprep.subr.bf16.mxu0 %v4239_v41  ;;  %4419 = vmatprep.subr.bf16.mxu1 %v4241_v16 }
 0xe2a   :  { %4338 = vmatpush1.bf16.msra.mxu0 %v4238_v17  ;;  %4420 = vmatpush1.bf16.msra.mxu1 %v4240_v19 }
 0xe2b   :  { %4339 = vmatprep.subr.bf16.mxu0 %v4243_v21  ;;  %4421 = vmatprep.subr.bf16.mxu1 %v4245_v47 }
 0xe2e   :  { %4340 = vmatpush1.bf16.msra.mxu0 %v4242_v49  ;;  %4422 = vmatpush1.bf16.msra.mxu1 %v4244_v48 }
 0xe31   :  { %4342 = vmatmul.mubr.bf16.vlgmr.msra.gmra.mrb[72].mxu0 %v4116_v26  ;;  %4424 = vmatmul.mubr.bf16.vlgmr.msra.gmra.mrb[72].mxu1 %v4116_v26 }
 0xf04   :  { %v4343_v55 = vpop.f32.mrb[72].mxu0  ;;  %v4425_v35 = vpop.f32.mrb[72].mxu1 }
 0xf05   :  { %v7079_v57 = vadd.f32 %v4343_v55, %v4251_v37  ;;  %v7081_v30 = vadd.f32 %v4425_v35, %v4259_v51  ;;  %v4345_v33 = vpop.f32.mrb[73].mxu0  ;;  %v4427_v43 = vpop.f32.mrb[73].mxu1 }
 0xf06   :  { %v5191_v5 = vadd.f32 %v4345_v33, %v4255_v52  ;;  %v7083_v7 = vadd.f32 %v4427_v43, %v4263_v29  ;;  %v4347_v40 = vpop.f32.mrb[74].mxu0  ;;  %v4429_v15 = vpop.f32.mrb[74].mxu1 }
 0xf07   :  { %v4432_v60 = vmax.f32 %v7079_v57, 0.0  ;;  %v4434_v25 = vmax.f32 %v7081_v30, 0.0  ;;  %v4348_v61 = vpop.f32.mrb[75].mxu0  ;;  %v4430_v10 = vpop.f32.mrb[75].mxu1 }
 0xf08   :  { %v4433_v62 = vmax.f32 %v5191_v5, 0.0  ;;  %v4435_v53 = vmax.f32 %v7083_v7, 0.0 }
 0xf09   :  { %6104 = dma.done.wait [#allocation4 + $0x4], 16384 }
 0xf0a   :  { %6105 = vsyncadd [#allocation4 + $0x4], 4294950912  ;;  %v4439_v58 = vpack.c.bf16 %v4433_v62, %v4433_v62  ;;  %v4443_v56 = vld [vmem:[#allocation3 + $0xc08] sm:$0xff]  ;;  %v4445_v20 = vld [vmem:[#allocation3 + $0xc18] sm:$0xff]  ;;  %vm4799_vm4 = vcmask 7168  }
 0xf0b   :  { %v4442_v14 = vld [vmem:[#allocation3 + $0xc00] sm:$0xff]  ;;  %4592 = vmatprep.subr.bf16.mxu0 %v4443_v56  ;;  %4674 = vmatprep.subr.bf16.mxu1 %v4445_v20  ;;  %v4444_v22 = vld [vmem:[#allocation3 + $0xc10] sm:$0xff]  ;;  %v4447_v3 = vld [vmem:[#allocation3 + $0xc28] sm:$0xff] }
 0xf0c   :  { %4624 = vmatprep.mubr.bf16.mxu0 %v4439_v58  ;;  %4706 = vmatprep.mubr.bf16.mxu1 %v4439_v58  ;;  %v4449_v4 = vld [vmem:[#allocation3 + $0xc38] sm:$0xff]  ;;  %v4446_v23 = vld [vmem:[#allocation3 + $0xc20] sm:$0xff]  ;;  %v4448_v18 = vld [vmem:[#allocation3 + $0xc30] sm:$0xff] }
 0xf0d   :  { %4593 = vmatpush1.bf16.msra.mxu0 %v4442_v14  ;;  %4675 = vmatpush1.bf16.msra.mxu1 %v4444_v22  ;;  %v4451_v24 = vld [vmem:[#allocation3 + $0xc48] sm:$0xff]  ;;  %v4453_v50 = vld [vmem:[#allocation3 + $0xc58] sm:$0xff]  ;;  %v4450_v45 = vld [vmem:[#allocation3 + $0xc40] sm:$0xff] }
 0xf0e   :  { %4594 = vmatprep.subr.bf16.mxu0 %v4447_v3  ;;  %4676 = vmatprep.subr.bf16.mxu1 %v4449_v4  ;;  %v4452_v27 = vld [vmem:[#allocation3 + $0xc50] sm:$0xff]  ;;  %v4455_v28 = vld [vmem:[#allocation3 + $0xc68] sm:$0xff]  ;;  %v4457_v31 = vld [vmem:[#allocation3 + $0xc78] sm:$0xff] }
 0xf0f   :  { %v4454_v32 = vld [vmem:[#allocation3 + $0xc60] sm:$0xff]  ;;  %v4456_v9 = vld [vmem:[#allocation3 + $0xc70] sm:$0xff]  ;;  %v4459_v34 = vld [vmem:[#allocation3 + $0xc88] sm:$0xff] }
 0xf10   :  { %v4461_v11 = vld [vmem:[#allocation3 + $0xc98] sm:$0xff]  ;;  %v4458_v12 = vld [vmem:[#allocation3 + $0xc80] sm:$0xff]  ;;  %v4460_v36 = vld [vmem:[#allocation3 + $0xc90] sm:$0xff] }
 0xf11   :  { %4595 = vmatpush1.bf16.msra.mxu0 %v4446_v23  ;;  %4677 = vmatpush1.bf16.msra.mxu1 %v4448_v18  ;;  %v4463_v39 = vld [vmem:[#allocation3 + $0xca8] sm:$0xff]  ;;  %v4465_v54 = vld [vmem:[#allocation3 + $0xcb8] sm:$0xff]  ;;  %v4462_v0 = vld [vmem:[#allocation3 + $0xca0] sm:$0xff] }
 0xf12   :  { %4596 = vmatprep.subr.bf16.mxu0 %v4451_v24  ;;  %4678 = vmatprep.subr.bf16.mxu1 %v4453_v50  ;;  %v4464_v13 = vld [vmem:[#allocation3 + $0xcb0] sm:$0xff]  ;;  %v4467_v1 = vld [vmem:[#allocation3 + $0xcc8] sm:$0xff]  ;;  %v4469_v2 = vld [vmem:[#allocation3 + $0xcd8] sm:$0xff] }
 0xf13   :  { %v4466_v38 = vld [vmem:[#allocation3 + $0xcc0] sm:$0xff]  ;;  %v4468_v6 = vld [vmem:[#allocation3 + $0xcd0] sm:$0xff]  ;;  %v4471_v46 = vld [vmem:[#allocation3 + $0xce8] sm:$0xff] }
 0xf14   :  { %v4473_v41 = vld [vmem:[#allocation3 + $0xcf8] sm:$0xff]  ;;  %v4470_v16 = vld [vmem:[#allocation3 + $0xce0] sm:$0xff]  ;;  %v4472_v17 = vld [vmem:[#allocation3 + $0xcf0] sm:$0xff] }
 0xf15   :  { %4597 = vmatpush1.bf16.msra.mxu0 %v4450_v45  ;;  %4679 = vmatpush1.bf16.msra.mxu1 %v4452_v27  ;;  %v4475_v19 = vld [vmem:[#allocation3 + $0xd08] sm:$0xff]  ;;  %v4477_v21 = vld [vmem:[#allocation3 + $0xd18] sm:$0xff]  ;;  %v4474_v47 = vld [vmem:[#allocation3 + $0xd00] sm:$0xff] }
 0xf16   :  { %4598 = vmatprep.subr.bf16.mxu0 %v4455_v28  ;;  %4680 = vmatprep.subr.bf16.mxu1 %v4457_v31  ;;  %v4476_v49 = vld [vmem:[#allocation3 + $0xd10] sm:$0xff]  ;;  %v4479_v48 = vld [vmem:[#allocation3 + $0xd28] sm:$0xff]  ;;  %v4481_v26 = vld [vmem:[#allocation3 + $0xd38] sm:$0xff]  ;;  %v4438_v28 = vpack.c.bf16 %v4432_v60, %v4432_v60 }
 0xf17   :  { %v4478_v8 = vld [vmem:[#allocation3 + $0xd20] sm:$0xff]  ;;  %v4480_v37 = vld [vmem:[#allocation3 + $0xd30] sm:$0xff]  ;;  %v4483_v51 = vld [vmem:[#allocation3 + $0xd48] sm:$0xff] }
 0xf18   :  { %v4485_v52 = vld [vmem:[#allocation3 + $0xd58] sm:$0xff]  ;;  %v4482_v29 = vld [vmem:[#allocation3 + $0xd40] sm:$0xff]  ;;  %v4484_v55 = vld [vmem:[#allocation3 + $0xd50] sm:$0xff] }
 0xf19   :  { %4599 = vmatpush1.bf16.msra.mxu0 %v4454_v32  ;;  %4681 = vmatpush1.bf16.msra.mxu1 %v4456_v9  ;;  %v4487_v35 = vld [vmem:[#allocation3 + $0xd68] sm:$0xff]  ;;  %v4489_v33 = vld [vmem:[#allocation3 + $0xd78] sm:$0xff]  ;;  %v4486_v43 = vld [vmem:[#allocation3 + $0xd60] sm:$0xff] }
 0xf1a   :  { %4600 = vmatprep.subr.bf16.mxu0 %v4459_v34  ;;  %4682 = vmatprep.subr.bf16.mxu1 %v4461_v11  ;;  %v4488_v5 = vld [vmem:[#allocation3 + $0xd70] sm:$0xff]  ;;  %v4491_v40 = vld [vmem:[#allocation3 + $0xd88] sm:$0xff]  ;;  %v4493_v15 = vld [vmem:[#allocation3 + $0xd98] sm:$0xff]  ;;  %v4441_v11 = vpack.c.bf16 %v4435_v53, %v4435_v53 }
 0xf1b   :  { %v4490_v61 = vld [vmem:[#allocation3 + $0xd80] sm:$0xff]  ;;  %v4492_v10 = vld [vmem:[#allocation3 + $0xd90] sm:$0xff]  ;;  %v4495_v62 = vld [vmem:[#allocation3 + $0xda8] sm:$0xff] }
 0xf1c   :  { %v4497_v58 = vld [vmem:[#allocation3 + $0xdb8] sm:$0xff]  ;;  %v4494_v56 = vld [vmem:[#allocation3 + $0xda0] sm:$0xff]  ;;  %v4496_v20 = vld [vmem:[#allocation3 + $0xdb0] sm:$0xff] }
 0xf1d   :  { %4601 = vmatpush1.bf16.msra.mxu0 %v4458_v12  ;;  %4683 = vmatpush1.bf16.msra.mxu1 %v4460_v36  ;;  %v4499_v14 = vld [vmem:[#allocation3 + $0xdc8] sm:$0xff]  ;;  %v4501_v22 = vld [vmem:[#allocation3 + $0xdd8] sm:$0xff]  ;;  %v4498_v3 = vld [vmem:[#allocation3 + $0xdc0] sm:$0xff] }
 0xf1e   :  { %4602 = vmatprep.subr.bf16.mxu0 %v4463_v39  ;;  %4684 = vmatprep.subr.bf16.mxu1 %v4465_v54  ;;  %v4500_v4 = vld [vmem:[#allocation3 + $0xdd0] sm:$0xff]  ;;  %v4503_v23 = vld [vmem:[#allocation3 + $0xde8] sm:$0xff]  ;;  %v4505_v18 = vld [vmem:[#allocation3 + $0xdf8] sm:$0xff] }
 0xf1f   :  { %v4502_v24 = vld [vmem:[#allocation3 + $0xde0] sm:$0xff]  ;;  %v4504_v50 = vld [vmem:[#allocation3 + $0xdf0] sm:$0xff]  ;;  %v4507_v45 = vld [vmem:[#allocation3 + $0xe08] sm:$0xff] }
 0xf20   :  { %v4509_v27 = vld [vmem:[#allocation3 + $0xe18] sm:$0xff]  ;;  %v4506_v31 = vld [vmem:[#allocation3 + $0xe00] sm:$0xff]  ;;  %v4508_v32 = vld [vmem:[#allocation3 + $0xe10] sm:$0xff] }
 0xf21   :  { %4603 = vmatpush1.bf16.msra.mxu0 %v4462_v0  ;;  %4685 = vmatpush1.bf16.msra.mxu1 %v4464_v13  ;;  %v4511_v9 = vld [vmem:[#allocation3 + $0xe28] sm:$0xff]  ;;  %v4513_v34 = vld [vmem:[#allocation3 + $0xe38] sm:$0xff]  ;;  %v4510_v57 = vld [vmem:[#allocation3 + $0xe20] sm:$0xff] }
 0xf22   :  { %4604 = vmatprep.subr.bf16.mxu0 %v4467_v1  ;;  %4686 = vmatprep.subr.bf16.mxu1 %v4469_v2  ;;  %v4512_v60 = vld [vmem:[#allocation3 + $0xe30] sm:$0xff]  ;;  %v4515_v12 = vld [vmem:[#allocation3 + $0xe48] sm:$0xff]  ;;  %v4517_v36 = vld [vmem:[#allocation3 + $0xe58] sm:$0xff] }
 0xf23   :  { %v4514_v39 = vld [vmem:[#allocation3 + $0xe40] sm:$0xff]  ;;  %v4516_v7 = vld [vmem:[#allocation3 + $0xe50] sm:$0xff]  ;;  %v4519_v54 = vld [vmem:[#allocation3 + $0xe68] sm:$0xff] }
 0xf24   :  { %v4521_v53 = vld [vmem:[#allocation3 + $0xe78] sm:$0xff]  ;;  %v4518_v0 = vld [vmem:[#allocation3 + $0xe60] sm:$0xff]  ;;  %v4520_v13 = vld [vmem:[#allocation3 + $0xe70] sm:$0xff] }
 0xf25   :  { %4605 = vmatpush1.bf16.msra.mxu0 %v4466_v38  ;;  %4687 = vmatpush1.bf16.msra.mxu1 %v4468_v6  ;;  %v4523_v1 = vld [vmem:[#allocation3 + $0xe88] sm:$0xff]  ;;  %v4525_v2 = vld [vmem:[#allocation3 + $0xe98] sm:$0xff]  ;;  %v4522_v38 = vld [vmem:[#allocation3 + $0xe80] sm:$0xff] }
 0xf26   :  { %4606 = vmatprep.subr.bf16.mxu0 %v4471_v46  ;;  %4688 = vmatprep.subr.bf16.mxu1 %v4473_v41  ;;  %v4524_v6 = vld [vmem:[#allocation3 + $0xe90] sm:$0xff]  ;;  %v4527_v46 = vld [vmem:[#allocation3 + $0xea8] sm:$0xff]  ;;  %v4529_v41 = vld [vmem:[#allocation3 + $0xeb8] sm:$0xff] }
 0xf29   :  { %4607 = vmatpush1.bf16.msra.mxu0 %v4470_v16  ;;  %4689 = vmatpush1.bf16.msra.mxu1 %v4472_v17  ;;  %v4526_v16 = vld [vmem:[#allocation3 + $0xea0] sm:$0xff]  ;;  %v4528_v17 = vld [vmem:[#allocation3 + $0xeb0] sm:$0xff] }
 0xf2a   :  { %4608 = vmatprep.subr.bf16.mxu0 %v4475_v19  ;;  %4690 = vmatprep.subr.bf16.mxu1 %v4477_v21  ;;  %v4531_v19 = vld [vmem:[#allocation3 + $0xec8] sm:$0xff]  ;;  %v4533_v21 = vld [vmem:[#allocation3 + $0xed8] sm:$0xff] }
 0xf2d   :  { %4609 = vmatpush1.bf16.msra.mxu0 %v4474_v47  ;;  %4691 = vmatpush1.bf16.msra.mxu1 %v4476_v49  ;;  %v4530_v47 = vld [vmem:[#allocation3 + $0xec0] sm:$0xff]  ;;  %v4532_v49 = vld [vmem:[#allocation3 + $0xed0] sm:$0xff] }
 0xf2e   :  { %4610 = vmatprep.subr.bf16.mxu0 %v4479_v48  ;;  %4692 = vmatprep.subr.bf16.mxu1 %v4481_v26  ;;  %v4535_v48 = vld [vmem:[#allocation3 + $0xee8] sm:$0xff]  ;;  %v4537_v26 = vld [vmem:[#allocation3 + $0xef8] sm:$0xff] }
 0xf31   :  { %4611 = vmatpush1.bf16.msra.mxu0 %v4478_v8  ;;  %4693 = vmatpush1.bf16.msra.mxu1 %v4480_v37  ;;  %v4534_v8 = vld [vmem:[#allocation3 + $0xee0] sm:$0xff]  ;;  %v4536_v37 = vld [vmem:[#allocation3 + $0xef0] sm:$0xff] }
 0xf32   :  { %4612 = vmatprep.subr.bf16.mxu0 %v4483_v51  ;;  %4694 = vmatprep.subr.bf16.mxu1 %v4485_v52  ;;  %v4539_v51 = vld [vmem:[#allocation3 + $0xf08] sm:$0xff]  ;;  %v4541_v52 = vld [vmem:[#allocation3 + $0xf18] sm:$0xff] }
 0xf35   :  { %4613 = vmatpush1.bf16.msra.mxu0 %v4482_v29  ;;  %4695 = vmatpush1.bf16.msra.mxu1 %v4484_v55  ;;  %v4538_v29 = vld [vmem:[#allocation3 + $0xf00] sm:$0xff]  ;;  %v4540_v55 = vld [vmem:[#allocation3 + $0xf10] sm:$0xff] }
 0xf36   :  { %4614 = vmatprep.subr.bf16.mxu0 %v4487_v35  ;;  %4696 = vmatprep.subr.bf16.mxu1 %v4489_v33  ;;  %v4543_v35 = vld [vmem:[#allocation3 + $0xf28] sm:$0xff]  ;;  %v4545_v33 = vld [vmem:[#allocation3 + $0xf38] sm:$0xff] }
 0xf39   :  { %4615 = vmatpush1.bf16.msra.mxu0 %v4486_v43  ;;  %4697 = vmatpush1.bf16.msra.mxu1 %v4488_v5  ;;  %v4542_v43 = vld [vmem:[#allocation3 + $0xf20] sm:$0xff]  ;;  %v4544_v5 = vld [vmem:[#allocation3 + $0xf30] sm:$0xff] }
 0xf3a   :  { %4616 = vmatprep.subr.bf16.mxu0 %v4491_v40  ;;  %4698 = vmatprep.subr.bf16.mxu1 %v4493_v15  ;;  %v4547_v40 = vld [vmem:[#allocation3 + $0xf48] sm:$0xff]  ;;  %v4549_v15 = vld [vmem:[#allocation3 + $0xf58] sm:$0xff] }
 0xf3d   :  { %4617 = vmatpush1.bf16.msra.mxu0 %v4490_v61  ;;  %4699 = vmatpush1.bf16.msra.mxu1 %v4492_v10  ;;  %v4546_v61 = vld [vmem:[#allocation3 + $0xf40] sm:$0xff]  ;;  %v4548_v10 = vld [vmem:[#allocation3 + $0xf50] sm:$0xff] }
 0xf3e   :  { %4618 = vmatprep.subr.bf16.mxu0 %v4495_v62  ;;  %4700 = vmatprep.subr.bf16.mxu1 %v4497_v58  ;;  %v4551_v62 = vld [vmem:[#allocation3 + $0xf68] sm:$0xff]  ;;  %v4553_v58 = vld [vmem:[#allocation3 + $0xf78] sm:$0xff] }
 0xf41   :  { %4619 = vmatpush1.bf16.msra.mxu0 %v4494_v56  ;;  %4701 = vmatpush1.bf16.msra.mxu1 %v4496_v20  ;;  %v4550_v56 = vld [vmem:[#allocation3 + $0xf60] sm:$0xff]  ;;  %v4552_v20 = vld [vmem:[#allocation3 + $0xf70] sm:$0xff] }
 0xf42   :  { %4620 = vmatprep.subr.bf16.mxu0 %v4499_v14  ;;  %4702 = vmatprep.subr.bf16.mxu1 %v4501_v22  ;;  %v4555_v14 = vld [vmem:[#allocation3 + $0xf88] sm:$0xff]  ;;  %v4557_v22 = vld [vmem:[#allocation3 + $0xf98] sm:$0xff] }
 0xf45   :  { %4621 = vmatpush1.bf16.msra.mxu0 %v4498_v3  ;;  %4703 = vmatpush1.bf16.msra.mxu1 %v4500_v4  ;;  %v4554_v3 = vld [vmem:[#allocation3 + $0xf80] sm:$0xff]  ;;  %v4556_v4 = vld [vmem:[#allocation3 + $0xf90] sm:$0xff] }
 0xf46   :  { %4622 = vmatprep.subr.bf16.mxu0 %v4503_v23  ;;  %4704 = vmatprep.subr.bf16.mxu1 %v4505_v18  ;;  %v4559_v23 = vld [vmem:[#allocation3 + $0xfa8] sm:$0xff]  ;;  %v4561_v18 = vld [vmem:[#allocation3 + $0xfb8] sm:$0xff] }
 0xf49   :  { %4623 = vmatpush1.bf16.msra.mxu0 %v4502_v24  ;;  %4705 = vmatpush1.bf16.msra.mxu1 %v4504_v50  ;;  %v4558_v24 = vld [vmem:[#allocation3 + $0xfa0] sm:$0xff]  ;;  %v4560_v50 = vld [vmem:[#allocation3 + $0xfb0] sm:$0xff] }
 0xf4a   :  { %4633 = vmatprep.subr.bf16.mxu0 %v4507_v45  ;;  %4715 = vmatprep.subr.bf16.mxu1 %v4509_v27  ;;  %v4563_v45 = vld [vmem:[#allocation3 + $0xfc8] sm:$0xff]  ;;  %v4565_v27 = vld [vmem:[#allocation3 + $0xfd8] sm:$0xff] }
 0xf4c   :  { %4625 = vmatmul.mubr.bf16.vlgmr.msra.gmra.mrb[76].mxu0 %v4438_v28  ;;  %4707 = vmatmul.mubr.bf16.vlgmr.msra.gmra.mrb[76].mxu1 %v4438_v28  ;;  %v4562_v28 = vld [vmem:[#allocation3 + $0xfc0] sm:$0xff] }
 0xf4d   :  { %4634 = vmatpush1.bf16.msra.mxu0 %v4506_v31  ;;  %4716 = vmatpush1.bf16.msra.mxu1 %v4508_v32  ;;  %v4564_v31 = vld [vmem:[#allocation3 + $0xfd0] sm:$0xff]  ;;  %v4567_v32 = vld [vmem:[#allocation3 + $0xfe8] sm:$0xff] }
 0xf4e   :  { %4635 = vmatprep.subr.bf16.mxu0 %v4511_v9  ;;  %4717 = vmatprep.subr.bf16.mxu1 %v4513_v34  ;;  %v4569_v9 = vld [vmem:[#allocation3 + $0xff8] sm:$0xff]  ;;  %v4566_v34 = vld [vmem:[#allocation3 + $0xfe0] sm:$0xff] }
 0xf4f   :  { %4665 = vmatprep.mubr.bf16.mxu0 %v4441_v11  ;;  %4747 = vmatprep.mubr.bf16.mxu1 %v4441_v11  ;;  %v4568_v11 = vld [vmem:[#allocation3 + $0xff0] sm:$0xff] }
 0xf51   :  { %4636 = vmatpush1.bf16.msra.mxu0 %v4510_v57  ;;  %4718 = vmatpush1.bf16.msra.mxu1 %v4512_v60  ;;  %v4440_v57 = vpack.c.bf16 %v4434_v25, %v4434_v25  ;;  %v4570_v60 = vld [vmem:[#allocation19] sm:$0xf] }
 0xf52   :  { %4637 = vmatprep.subr.bf16.mxu0 %v4515_v12  ;;  %4719 = vmatprep.subr.bf16.mxu1 %v4517_v36  ;;  %v4575_v12 = vrot.slane %v4570_v60, %v7181_v42  ;;  %v4583_v36 = vrot.slane %v4570_v60, %v7182_v44 }
 0xf55   :  { %4638 = vmatpush1.bf16.msra.mxu0 %v4514_v39  ;;  %4720 = vmatpush1.bf16.msra.mxu1 %v4516_v7  ;;  %v4760_v39 = vld [vmem:[#allocation20] sm:$0xf]  ;;  %v4579_v7 = vrot.slane %v4570_v60, %v7183_v59 }
 0xf56   :  { %4639 = vmatprep.subr.bf16.mxu0 %v4519_v54  ;;  %4721 = vmatprep.subr.bf16.mxu1 %v4521_v53  ;;  %v4587_v54 = vrot.slane %v4570_v60, %v7184_v63  ;;  %v4765_v30 = vrot.slane %v4760_v39, %v7181_v42  ;;  %v4777_v42 = vrot.slane %v4760_v39, %v7184_v63 }
 0xf59   :  { %4640 = vmatpush1.bf16.msra.mxu0 %v4518_v0  ;;  %4722 = vmatpush1.bf16.msra.mxu1 %v4520_v13 }
 0xf5a   :  { %4641 = vmatprep.subr.bf16.mxu0 %v4523_v1  ;;  %4723 = vmatprep.subr.bf16.mxu1 %v4525_v2 }
 0xf5d   :  { %4642 = vmatpush1.bf16.msra.mxu0 %v4522_v38  ;;  %4724 = vmatpush1.bf16.msra.mxu1 %v4524_v6  ;;  %v4769_v6 = vrot.slane %v4760_v39, %v7183_v59 }
 0xf5e   :  { %4643 = vmatprep.subr.bf16.mxu0 %v4527_v46  ;;  %4725 = vmatprep.subr.bf16.mxu1 %v4529_v41 }
 0xf61   :  { %4644 = vmatpush1.bf16.msra.mxu0 %v4526_v16  ;;  %4726 = vmatpush1.bf16.msra.mxu1 %v4528_v17 }
 0xf62   :  { %4645 = vmatprep.subr.bf16.mxu0 %v4531_v19  ;;  %4727 = vmatprep.subr.bf16.mxu1 %v4533_v21 }
 0xf65   :  { %4646 = vmatpush1.bf16.msra.mxu0 %v4530_v47  ;;  %4728 = vmatpush1.bf16.msra.mxu1 %v4532_v49  ;;  %v4773_v49 = vrot.slane %v4760_v39, %v7182_v44 }
 0xf66   :  { %4647 = vmatprep.subr.bf16.mxu0 %v4535_v48  ;;  %4729 = vmatprep.subr.bf16.mxu1 %v4537_v26 }
 0xf69   :  { %4648 = vmatpush1.bf16.msra.mxu0 %v4534_v8  ;;  %4730 = vmatpush1.bf16.msra.mxu1 %v4536_v37 }
 0xf6a   :  { %4649 = vmatprep.subr.bf16.mxu0 %v4539_v51  ;;  %4731 = vmatprep.subr.bf16.mxu1 %v4541_v52 }
 0xf6d   :  { %4650 = vmatpush1.bf16.msra.mxu0 %v4538_v29  ;;  %4732 = vmatpush1.bf16.msra.mxu1 %v4540_v55 }
 0xf6e   :  { %4651 = vmatprep.subr.bf16.mxu0 %v4543_v35  ;;  %4733 = vmatprep.subr.bf16.mxu1 %v4545_v33  ;;  %v5176_v35 = vld [vmem:[#allocation5] ss:$0 sm:$0xff] }
 0xf71   :  { %4652 = vmatpush1.bf16.msra.mxu0 %v4542_v43  ;;  %4734 = vmatpush1.bf16.msra.mxu1 %v4544_v5 }
 0xf72   :  { %4653 = vmatprep.subr.bf16.mxu0 %v4547_v40  ;;  %4735 = vmatprep.subr.bf16.mxu1 %v4549_v15 }
 0xf75   :  { %4654 = vmatpush1.bf16.msra.mxu0 %v4546_v61  ;;  %4736 = vmatpush1.bf16.msra.mxu1 %v4548_v10 }
 0xf76   :  { %4655 = vmatprep.subr.bf16.mxu0 %v4551_v62  ;;  %4737 = vmatprep.subr.bf16.mxu1 %v4553_v58 }
 0xf79   :  { %4656 = vmatpush1.bf16.msra.mxu0 %v4550_v56  ;;  %4738 = vmatpush1.bf16.msra.mxu1 %v4552_v20 }
 0xf7a   :  { %4657 = vmatprep.subr.bf16.mxu0 %v4555_v14  ;;  %4739 = vmatprep.subr.bf16.mxu1 %v4557_v22 }
 0xf7d   :  { %4658 = vmatpush1.bf16.msra.mxu0 %v4554_v3  ;;  %4740 = vmatpush1.bf16.msra.mxu1 %v4556_v4 }
 0xf7e   :  { %4659 = vmatprep.subr.bf16.mxu0 %v4559_v23  ;;  %4741 = vmatprep.subr.bf16.mxu1 %v4561_v18 }
 0xf81   :  { %4660 = vmatpush1.bf16.msra.mxu0 %v4558_v24  ;;  %4742 = vmatpush1.bf16.msra.mxu1 %v4560_v50 }
 0xf82   :  { %4661 = vmatprep.subr.bf16.mxu0 %v4563_v45  ;;  %4743 = vmatprep.subr.bf16.mxu1 %v4565_v27 }
 0xf85   :  { %4662 = vmatpush1.bf16.msra.mxu0 %v4562_v28  ;;  %4744 = vmatpush1.bf16.msra.mxu1 %v4564_v31 }
 0xf86   :  { %4663 = vmatprep.subr.bf16.mxu0 %v4567_v32  ;;  %4745 = vmatprep.subr.bf16.mxu1 %v4569_v9 }
 0xf89   :  { %4664 = vmatpush1.bf16.msra.mxu0 %v4566_v34  ;;  %4746 = vmatpush1.bf16.msra.mxu1 %v4568_v11 }
 0xf8c   :  { %4666 = vmatmul.mubr.bf16.vlgmr.msra.gmra.mrb[76].mxu0 %v4440_v57  ;;  %4748 = vmatmul.mubr.bf16.vlgmr.msra.gmra.mrb[76].mxu1 %v4440_v57 }
0x105f   :  { %v4667_v53 = vpop.f32.mrb[76].mxu0  ;;  %v4749_v0 = vpop.f32.mrb[76].mxu1 }
0x1060   :  { %v5194_v13 = vadd.f32 %v4667_v53, %v4575_v12  ;;  %v5196_v25 = vadd.f32 %v4749_v0, %v4583_v36  ;;  %v4669_v1 = vpop.f32.mrb[77].mxu0  ;;  %v4751_v2 = vpop.f32.mrb[77].mxu1 }
0x1061   :  { %v5195_v38 = vadd.f32 %v4669_v1, %v4579_v7  ;;  %v5197_v46 = vadd.f32 %v4751_v2, %v4587_v54  ;;  %v4671_v41 = vpop.f32.mrb[78].mxu0  ;;  %v4753_v16 = vpop.f32.mrb[78].mxu1 }
0x1062   :  { %v4756_v17 = vmax.f32 %v5194_v13, 0.0  ;;  %v4672_v19 = vpop.f32.mrb[79].mxu0  ;;  %v4754_v21 = vpop.f32.mrb[79].mxu1  ;;  %v4758_v47 = vmax.f32 %v5196_v25, 0.0 }
0x1063   :  { %v4757_v48 = vmax.f32 %v5195_v38, 0.0  ;;  %v4759_v37 = vmax.f32 %v5197_v46, 0.0 }
0x1064   :  { %v4782_v26 = vmul.f32 %v4765_v30, %v4756_v17  ;;  %v4784_v51 = vmul.f32 %v4773_v49, %v4758_v47 }
0x1065   :  { %v4783_v8 = vmul.f32 %v4769_v6, %v4757_v48  ;;  %v4785_v29 = vmul.f32 %v4777_v42, %v4759_v37 }
0x1067   :  { %v4786_v52 = vadd.f32 %v4783_v8, %v4782_v26 }
0x1069   :  { %v4787_v55 = vadd.f32 %v4786_v52, %v4784_v51 }
0x106b   :  { %v4788_v59 = vadd.f32 %v4787_v55, %v4785_v29 }
0x106d   :  { %4789 = vadd.xlane.f32.xlu0 %v4788_v59 }
0x10fa   :  { %v4790_v33 = vpop.xlane.xlu0 %4789 }
0x10fb   :  { %v4798_v43 = vadd.f32 %v5176_v35, %v4790_v33 }
0x10fd   :  { %4800 = vst.msk [vmem:[%s7123_s15] sm:$0xff] %vm4799_vm4, %v4798_v43 }
0x10fe   :  { %4805 = vsyncpa [#allocation7], 1 }
0x10ff   :  { %4806 = vsyncpa [#allocation9], 1 }
0x1100   :  { %4807 = vsyncpa [#allocation12], 1 }
0x1101   :  { %4808 = vsyncpa [#allocation15], 1 }
0x1102   :  { %4809 = vsyncpa [#allocation18], 1 }
0x1103   :  { %4810 = vsyncpa [#allocation21], 1 }
0x1104   :  { %4811 = vsyncmov [#allocation4] }
0x1107   :  { %s4812_s2 = vpop.sfrf %4811 }
0x1108   :  { %p5177_p4 = scmp.ne.s32.totalorder %s4812_s2, 0 }
0x110a   :  { %4816 = shalt.err (%p5177_p4)  }
0x110b   :  { %4818 = vsyncmov [#allocation4 + $0x1] }
0x110e   :  { %s4819_s6 = vpop.sfrf %4818 }
0x110f   :  { %p5178_p5 = scmp.ne.s32.totalorder %s4819_s6, 0 }
0x1111   :  { %4823 = shalt.err (%p5178_p5)  }
0x1112   :  { %4825 = vsyncmov [#allocation4 + $0x2] }
0x1115   :  { %s4826_s10 = vpop.sfrf %4825 }
0x1116   :  { %p5179_p6 = scmp.ne.s32.totalorder %s4826_s10, 0 }
0x1118   :  { %4830 = shalt.err (%p5179_p6)  }
0x1119   :  { %4832 = vsyncmov [#allocation4 + $0x3] }
0x111c   :  { %s4833_s15 = vpop.sfrf %4832 }
0x111d   :  { %p5180_p7 = scmp.ne.s32.totalorder %s4833_s15, 0 }
0x111f   :  { %4837 = shalt.err (%p5180_p7)  }
0x1120   :  { %4839 = vsyncmov [#allocation4 + $0x4] }
0x1123   :  { %s4840_s3 = vpop.sfrf %4839 }
0x1124   :  { %p5181_p8 = scmp.ne.s32.totalorder %s4840_s3, 0 }
0x1126   :  { %4844 = shalt.err (%p5181_p8)  }

</bundles_post_ra>
